<compile_context>
chip_gen: v7x
topology: tpu7x:2x2x1
jax: 0.10.0
libtpu: 0.0.40
codegen_flags: <defaults>
</compile_context>

<pallas_src>
import functools
import math

import jax
import jax.numpy as jnp
from jax.experimental import pallas as pl
from jax.experimental.pallas import tpu as pltpu

# ----------------------------- model config ---------------------------------
VOCAB = 128
D_MODEL = 128
NHEAD = 4
HEAD_DIM = D_MODEL // NHEAD
D_FF = 256
NUM_LAYERS = 3
MAX_POS = 512
LN_EPS = 1e-5


# ------------------------- fused Pallas kernel ------------------------------
def _transformer_kernel(
    src_ref,      # (1, S, 1)  int32 token ids
    mask_ref,     # (1, S, 1)  f32   0/1 padding mask
    tok_ref,      # (V, D)     f32   token embedding table
    pos_ref,      # (S, D)     f32   positional embeddings for positions [0, S)
    wqkv_ref,     # (L, D, 3D) bf16
    bqkv_ref,     # (L, 1, 3D) f32
    wo_ref,       # (L, D, D)  bf16
    bo_ref,       # (L, 1, D)  f32
    ln1g_ref,     # (L, 1, D)  f32
    ln1b_ref,     # (L, 1, D)  f32
    w1_ref,       # (L, D, F)  bf16
    b1_ref,       # (L, 1, F)  f32
    w2_ref,       # (L, F, D)  bf16
    b2_ref,       # (L, 1, D)  f32
    ln2g_ref,     # (L, 1, D)  f32
    ln2b_ref,     # (L, 1, D)  f32
    fcw_ref,      # (D, V)     bf16
    fcb_ref,      # (1, V)     f32
    o_ref,        # (1, S, V)  f32
    *, d_model, nhead, num_layers,
):
    S = src_ref.shape[1]
    V = tok_ref.shape[0]
    hd = d_model // nhead
    scale = 1.0 / math.sqrt(hd)

    # ---- embedding lookup as a one-hot matmul (kept f32 -> exact lookup) ----
    ids = src_ref[0]                                             # (S, 1) int32
    onehot = (ids == jax.lax.broadcasted_iota(jnp.int32, (S, V), 1)).astype(
        jnp.float32
    )                                                            # (S, V)
    x = jnp.dot(onehot, tok_ref[...], preferred_element_type=jnp.float32)
    x = x + pos_ref[...]                                         # (S, D)
    x = x * mask_ref[0]                                          # (S, 1) bcast

    # ---- encoder layers (unrolled; L=3, weights resident in VMEM) -----------
    for l in range(num_layers):
        # --- multi-head self attention, batched over heads ---
        qkv = (
            jnp.dot(x.astype(jnp.bfloat16), wqkv_ref[l],
                    preferred_element_type=jnp.float32)
            + bqkv_ref[l]
        )                                                        # (S, 3D) f32
        q = qkv[:, :d_model]
        k = qkv[:, d_model:2 * d_model]
        v = qkv[:, 2 * d_model:]
        # head-major (H, S, hd)
        qh = jnp.transpose(q.reshape(S, nhead, hd), (1, 0, 2)).astype(jnp.bfloat16)
        kh = jnp.transpose(k.reshape(S, nhead, hd), (1, 0, 2)).astype(jnp.bfloat16)
        vh = jnp.transpose(v.reshape(S, nhead, hd), (1, 0, 2)).astype(jnp.bfloat16)

        s = jnp.einsum("hqd,hkd->hqk", qh, kh,
                       preferred_element_type=jnp.float32) * scale   # (H, S, S)
        s = s - jnp.max(s, axis=-1, keepdims=True)
        p = jnp.exp(s)
        p = p * pl.reciprocal(jnp.sum(p, axis=-1, keepdims=True), approx=True)

        av = jnp.einsum("hqk,hkd->hqd", p.astype(jnp.bfloat16), vh,
                        preferred_element_type=jnp.float32)          # (H, S, hd)
        attn = jnp.transpose(av, (1, 0, 2)).reshape(S, d_model)      # (S, D)
        attn = (
            jnp.dot(attn.astype(jnp.bfloat16), wo_ref[l],
                    preferred_element_type=jnp.float32)
            + bo_ref[l]
        )

        # --- residual + layernorm 1 (post-norm, f32 statistics) ---
        x1 = x + attn
        mu = jnp.mean(x1, axis=-1, keepdims=True)
        var = jnp.mean((x1 - mu) ** 2, axis=-1, keepdims=True)
        x1 = (x1 - mu) * jax.lax.rsqrt(var + LN_EPS) * ln1g_ref[l] + ln1b_ref[l]

        # --- feed-forward (relu) ---
        h1 = (
            jnp.dot(x1.astype(jnp.bfloat16), w1_ref[l],
                    preferred_element_type=jnp.float32)
            + b1_ref[l]
        )
        h1 = jnp.maximum(h1, 0.0)
        ffn = (
            jnp.dot(h1.astype(jnp.bfloat16), w2_ref[l],
                    preferred_element_type=jnp.float32)
            + b2_ref[l]
        )

        # --- residual + layernorm 2 ---
        x2 = x1 + ffn
        mu2 = jnp.mean(x2, axis=-1, keepdims=True)
        var2 = jnp.mean((x2 - mu2) ** 2, axis=-1, keepdims=True)
        x = (x2 - mu2) * jax.lax.rsqrt(var2 + LN_EPS) * ln2g_ref[l] + ln2b_ref[l]

    # ---- final projection to vocabulary --------------------------------------
    logits = (
        jnp.dot(x.astype(jnp.bfloat16), fcw_ref[...],
                preferred_element_type=jnp.float32)
        + fcb_ref[...]
    )                                                            # (S, V)
    o_ref[0] = logits.astype(o_ref.dtype)
    # TODO(synk): dropout is treated as identity (inference semantics); PyTorch
    # training-mode dropout has no deterministic Pallas equivalent here.


# ------------------------------ wrapper --------------------------------------
def _const_spec(shape):
    # whole array, same block for every grid step (Pallas does not re-DMA it)
    n = len(shape)
    return pl.BlockSpec(shape, lambda b, _n=n: (0,) * _n)


def transformer_forward(params, src, src_mask=None):
    """src: int32 [B, S]; src_mask: optional f32/bool [B, S]; returns f32 [B, S, V]."""
    B, S = src.shape
    src3 = src.astype(jnp.int32).reshape(B, S, 1)
    if src_mask is None:
        mask3 = jnp.ones((B, S, 1), jnp.float32)
    else:
        mask3 = src_mask.astype(jnp.float32).reshape(B, S, 1)
    pos = params["pos_emb"][:S]                                   # (S, D)

    st = params["stack"]
    args = (
        src3, mask3, params["tok_emb"], pos,
        st["wqkv"], st["bqkv"], st["wo"], st["bo"],
        st["ln1_g"], st["ln1_b"],
        st["w1"], st["b1"], st["w2"], st["b2"],
        st["ln2_g"], st["ln2_b"],
        params["fc_w"], params["fc_b"],
    )

    in_specs = [
        pl.BlockSpec((1, S, 1), lambda b: (b, 0, 0)),             # src ids
        pl.BlockSpec((1, S, 1), lambda b: (b, 0, 0)),             # mask
    ] + [_const_spec(a.shape) for a in args[2:]]

    kernel = functools.partial(
        _transformer_kernel, d_model=D_MODEL, nhead=NHEAD, num_layers=NUM_LAYERS
    )
    return pl.pallas_call(
        kernel,
        out_shape=jax.ShapeDtypeStruct((B, S, VOCAB), jnp.float32),
        grid_spec=pltpu.PrefetchScalarGridSpec(
            num_scalar_prefetch=0,
            grid=(B,),
            in_specs=in_specs,
            out_specs=pl.BlockSpec((1, S, VOCAB), lambda b: (b, 0, 0)),
        ),
        compiler_params=pltpu.CompilerParams(dimension_semantics=("parallel",)),
    )(*args)


# --------------------------- parameter init ----------------------------------
def init_params(key):
    ks = jax.random.split(key, 4)
    initrange = 0.1
    params = {
        # mimics module._init_weights: uniform(-0.1, 0.1); kept f32 so the
        # in-kernel one-hot lookup reproduces the exact table values.
        "tok_emb": jax.random.uniform(
            ks[0], (VOCAB, D_MODEL), jnp.float32, -initrange, initrange
        ),
        "pos_emb": 0.02 * jax.random.normal(ks[1], (MAX_POS, D_MODEL), jnp.float32),
        # fc_out stored pre-transposed [in, out]; matmul weights stored bf16
        "fc_w": jax.random.uniform(
            ks[2], (D_MODEL, VOCAB), jnp.float32, -initrange, initrange
        ).astype(jnp.bfloat16),
        "fc_b": jnp.zeros((1, VOCAB), jnp.float32),
    }

    lk = jax.random.split(ks[3], 4 * NUM_LAYERS)
    sc_d = 1.0 / math.sqrt(D_MODEL)
    sc_f = 1.0 / math.sqrt(D_FF)

    def U(k, shape, s):
        return jax.random.uniform(k, shape, jnp.float32, -s, s)

    params["stack"] = {
        # attention in-projection (qkv fused), pre-transposed [D, 3D], stacked [L,...]
        "wqkv": jnp.stack(
            [U(lk[4 * i + 0], (D_MODEL, 3 * D_MODEL), sc_d) for i in range(NUM_LAYERS)]
        ).astype(jnp.bfloat16),
        "bqkv": jnp.zeros((NUM_LAYERS, 1, 3 * D_MODEL), jnp.float32),
        "wo": jnp.stack(
            [U(lk[4 * i + 1], (D_MODEL, D_MODEL), sc_d) for i in range(NUM_LAYERS)]
        ).astype(jnp.bfloat16),
        "bo": jnp.zeros((NUM_LAYERS, 1, D_MODEL), jnp.float32),
        "ln1_g": jnp.ones((NUM_LAYERS, 1, D_MODEL), jnp.float32),
        "ln1_b": jnp.zeros((NUM_LAYERS, 1, D_MODEL), jnp.float32),
        "w1": jnp.stack(
            [U(lk[4 * i + 2], (D_MODEL, D_FF), sc_d) for i in range(NUM_LAYERS)]
        ).astype(jnp.bfloat16),
        "b1": jnp.zeros((NUM_LAYERS, 1, D_FF), jnp.float32),
        "w2": jnp.stack(
            [U(lk[4 * i + 3], (D_FF, D_MODEL), sc_f) for i in range(NUM_LAYERS)]
        ).astype(jnp.bfloat16),
        "b2": jnp.zeros((NUM_LAYERS, 1, D_MODEL), jnp.float32),
        "ln2_g": jnp.ones((NUM_LAYERS, 1, D_MODEL), jnp.float32),
        "ln2_b": jnp.zeros((NUM_LAYERS, 1, D_MODEL), jnp.float32),
    }
    return params


# ---------------------------------- main --------------------------------------
if __name__ == "__main__":
    key = jax.random.PRNGKey(0)
    pkey, dkey, mkey = jax.random.split(key, 3)

    params = init_params(pkey)

    B, S = 2, 8
    src = jax.random.randint(dkey, (B, S), 0, VOCAB, dtype=jnp.int32)
    # padding mask (1.0 = keep, 0.0 = pad), applied to embeddings like the module
    src_mask = (jax.random.uniform(mkey, (B, S)) > 0.2).astype(jnp.float32)

    out = transformer_forward(params, src, src_mask)
    out = jax.block_until_ready(out)

    assert out.shape == (B, S, VOCAB), out.shape
    assert bool(jnp.all(jnp.isfinite(out)))
    print("KERNEL_OK")
</pallas_src>

<mosaic_0001>
module attributes {stable_mosaic.version = 11 : i64} {
  func.func @_transformer_kernel(%arg0: i32, %arg1: memref<1x8x1xi32, #tpu.memory_space<vmem>>, %arg2: memref<1x8x1xf32, #tpu.memory_space<vmem>>, %arg3: memref<128x128xf32, #tpu.memory_space<vmem>>, %arg4: memref<8x128xf32, #tpu.memory_space<vmem>>, %arg5: memref<3x128x384xbf16, #tpu.memory_space<vmem>>, %arg6: memref<3x1x384xf32, #tpu.memory_space<vmem>>, %arg7: memref<3x128x128xbf16, #tpu.memory_space<vmem>>, %arg8: memref<3x1x128xf32, #tpu.memory_space<vmem>>, %arg9: memref<3x1x128xf32, #tpu.memory_space<vmem>>, %arg10: memref<3x1x128xf32, #tpu.memory_space<vmem>>, %arg11: memref<3x128x256xbf16, #tpu.memory_space<vmem>>, %arg12: memref<3x1x256xf32, #tpu.memory_space<vmem>>, %arg13: memref<3x256x128xbf16, #tpu.memory_space<vmem>>, %arg14: memref<3x1x128xf32, #tpu.memory_space<vmem>>, %arg15: memref<3x1x128xf32, #tpu.memory_space<vmem>>, %arg16: memref<3x1x128xf32, #tpu.memory_space<vmem>>, %arg17: memref<128x128xbf16, #tpu.memory_space<vmem>>, %arg18: memref<1x128xf32, #tpu.memory_space<vmem>>, %arg19: memref<1x8x128xf32, #tpu.memory_space<vmem>>) attributes {dimension_semantics = [#tpu.dimension_semantics<parallel>], iteration_bounds = array<i64: 2>, scalar_prefetch = 0 : i64, scratch_operands = 0 : i64, tpu.core_type = #tpu.core_type<tc>, window_params = [{transform_indices = @transform_0, window_bounds = array<i64: 1, 8, 1>}, {transform_indices = @transform_1, window_bounds = array<i64: 1, 8, 1>}, {pipeline_mode = #tpu.pipeline_mode<synchronous>, transform_indices = @transform_2, window_bounds = array<i64: 128, 128>}, {pipeline_mode = #tpu.pipeline_mode<synchronous>, transform_indices = @transform_3, window_bounds = array<i64: 8, 128>}, {pipeline_mode = #tpu.pipeline_mode<synchronous>, transform_indices = @transform_4, window_bounds = array<i64: 3, 128, 384>}, {pipeline_mode = #tpu.pipeline_mode<synchronous>, transform_indices = @transform_5, window_bounds = array<i64: 3, 1, 384>}, {pipeline_mode = #tpu.pipeline_mode<synchronous>, transform_indices = @transform_6, window_bounds = array<i64: 3, 128, 128>}, {pipeline_mode = #tpu.pipeline_mode<synchronous>, transform_indices = @transform_7, window_bounds = array<i64: 3, 1, 128>}, {pipeline_mode = #tpu.pipeline_mode<synchronous>, transform_indices = @transform_8, window_bounds = array<i64: 3, 1, 128>}, {pipeline_mode = #tpu.pipeline_mode<synchronous>, transform_indices = @transform_9, window_bounds = array<i64: 3, 1, 128>}, {pipeline_mode = #tpu.pipeline_mode<synchronous>, transform_indices = @transform_10, window_bounds = array<i64: 3, 128, 256>}, {pipeline_mode = #tpu.pipeline_mode<synchronous>, transform_indices = @transform_11, window_bounds = array<i64: 3, 1, 256>}, {pipeline_mode = #tpu.pipeline_mode<synchronous>, transform_indices = @transform_12, window_bounds = array<i64: 3, 256, 128>}, {pipeline_mode = #tpu.pipeline_mode<synchronous>, transform_indices = @transform_13, window_bounds = array<i64: 3, 1, 128>}, {pipeline_mode = #tpu.pipeline_mode<synchronous>, transform_indices = @transform_14, window_bounds = array<i64: 3, 1, 128>}, {pipeline_mode = #tpu.pipeline_mode<synchronous>, transform_indices = @transform_15, window_bounds = array<i64: 3, 1, 128>}, {pipeline_mode = #tpu.pipeline_mode<synchronous>, transform_indices = @transform_16, window_bounds = array<i64: 128, 128>}, {pipeline_mode = #tpu.pipeline_mode<synchronous>, transform_indices = @transform_17, window_bounds = array<i64: 1, 128>}, {transform_indices = @transform_18, window_bounds = array<i64: 1, 8, 128>}]} {
    %c0 = arith.constant 0 : index
    %c0_0 = arith.constant 0 : index
    %c0_1 = arith.constant 0 : index
    %0 = vector.load %arg1[%c0, %c0_0, %c0_1] : memref<1x8x1xi32, #tpu.memory_space<vmem>>, vector<1x8x1xi32>
    %1 = vector.shape_cast %0 : vector<1x8x1xi32> to vector<8x1xi32>
    %2 = tpu.iota {dimensions = array<i32: 1>} : vector<8x128xi32>
    %3 = vector.broadcast %1 : vector<8x1xi32> to vector<8x128xi32>
    %4 = arith.cmpi eq, %3, %2 : vector<8x128xi32>
    %5 = arith.extui %4 : vector<8x128xi1> to vector<8x128xi32>
    %6 = arith.sitofp %5 : vector<8x128xi32> to vector<8x128xf32>
    %c0_2 = arith.constant 0 : index
    %c0_3 = arith.constant 0 : index
    %7 = vector.load %arg3[%c0_2, %c0_3] : memref<128x128xf32, #tpu.memory_space<vmem>>, vector<128x128xf32>
    %cst = arith.constant dense<0.000000e+00> : vector<8x128xf32>
    %8 = tpu.matmul %6, %7, %cst {dimension_numbers = #tpu.dot_dimension_numbers<[1], [0], [0], [1], [0, 0, 1, 1], [], []>} : vector<8x128xf32>, vector<128x128xf32>, vector<8x128xf32> -> vector<8x128xf32>
    %c0_4 = arith.constant 0 : index
    %c0_5 = arith.constant 0 : index
    %9 = vector.load %arg4[%c0_4, %c0_5] : memref<8x128xf32, #tpu.memory_space<vmem>>, vector<8x128xf32>
    %10 = arith.addf %8, %9 : vector<8x128xf32>
    %c0_6 = arith.constant 0 : index
    %c0_7 = arith.constant 0 : index
    %c0_8 = arith.constant 0 : index
    %11 = vector.load %arg2[%c0_6, %c0_7, %c0_8] : memref<1x8x1xf32, #tpu.memory_space<vmem>>, vector<1x8x1xf32>
    %12 = vector.shape_cast %11 : vector<1x8x1xf32> to vector<8x1xf32>
    %13 = vector.broadcast %12 : vector<8x1xf32> to vector<8x128xf32>
    %14 = arith.mulf %10, %13 : vector<8x128xf32>
    %15 = arith.truncf %14 : vector<8x128xf32> to vector<8x128xbf16>
    %c0_9 = arith.constant 0 : index
    %c0_10 = arith.constant 0 : index
    %c0_11 = arith.constant 0 : index
    %16 = vector.load %arg5[%c0_9, %c0_10, %c0_11] : memref<3x128x384xbf16, #tpu.memory_space<vmem>>, vector<1x128x384xbf16>
    %17 = vector.shape_cast %16 : vector<1x128x384xbf16> to vector<128x384xbf16>
    %cst_12 = arith.constant dense<0.000000e+00> : vector<8x384xf32>
    %18 = tpu.matmul %15, %17, %cst_12 {dimension_numbers = #tpu.dot_dimension_numbers<[1], [0], [0], [1], [0, 0, 1, 1], [], []>} : vector<8x128xbf16>, vector<128x384xbf16>, vector<8x384xf32> -> vector<8x384xf32>
    %c0_13 = arith.constant 0 : index
    %c0_14 = arith.constant 0 : index
    %c0_15 = arith.constant 0 : index
    %19 = vector.load %arg6[%c0_13, %c0_14, %c0_15] : memref<3x1x384xf32, #tpu.memory_space<vmem>>, vector<1x1x384xf32>
    %20 = vector.shape_cast %19 : vector<1x1x384xf32> to vector<1x384xf32>
    %21 = vector.broadcast %20 : vector<1x384xf32> to vector<8x384xf32>
    %22 = arith.addf %18, %21 : vector<8x384xf32>
    %23 = vector.extract_strided_slice %22 {offsets = [0, 0], sizes = [8, 128], strides = [1, 1]} : vector<8x384xf32> to vector<8x128xf32>
    %24 = vector.extract_strided_slice %22 {offsets = [0, 128], sizes = [8, 128], strides = [1, 1]} : vector<8x384xf32> to vector<8x128xf32>
    %25 = vector.extract_strided_slice %22 {offsets = [0, 256], sizes = [8, 128], strides = [1, 1]} : vector<8x384xf32> to vector<8x128xf32>
    %26 = vector.shape_cast %23 : vector<8x128xf32> to vector<8x4x32xf32>
    %27 = tpu.transpose %26, [1, 0, 2] : vector<8x4x32xf32> -> vector<4x8x32xf32>
    %28 = arith.truncf %27 : vector<4x8x32xf32> to vector<4x8x32xbf16>
    %29 = vector.shape_cast %24 : vector<8x128xf32> to vector<8x4x32xf32>
    %30 = tpu.transpose %29, [1, 0, 2] : vector<8x4x32xf32> -> vector<4x8x32xf32>
    %31 = arith.truncf %30 : vector<4x8x32xf32> to vector<4x8x32xbf16>
    %32 = vector.shape_cast %25 : vector<8x128xf32> to vector<8x4x32xf32>
    %33 = tpu.transpose %32, [1, 0, 2] : vector<8x4x32xf32> -> vector<4x8x32xf32>
    %34 = arith.truncf %33 : vector<4x8x32xf32> to vector<4x8x32xbf16>
    "tpu.trace_start"() <{level = 10 : i32, message = "hqd,hkd->hqk"}> : () -> ()
    %cst_16 = arith.constant dense<0.000000e+00> : vector<4x8x8xf32>
    %35 = tpu.matmul %28, %31, %cst_16 {dimension_numbers = #tpu.dot_dimension_numbers<[2], [2], [1], [1], [0, 0, 0, 1, 1, 1], [0], [0]>} : vector<4x8x32xbf16>, vector<4x8x32xbf16>, vector<4x8x8xf32> -> vector<4x8x8xf32>
    "tpu.trace_stop"() : () -> ()
    %cst_17 = arith.constant 0.176776692 : f32
    %36 = vector.broadcast %cst_17 : f32 to vector<4x8x8xf32>
    %37 = arith.mulf %35, %36 : vector<4x8x8xf32>
    %cst_18 = arith.constant dense<0xFF800000> : vector<4x8xf32>
    %38 = vector.multi_reduction <maximumf>, %37, %cst_18 [2] : vector<4x8x8xf32> to vector<4x8xf32>
    %39 = vector.shape_cast %38 : vector<4x8xf32> to vector<4x8x1xf32>
    %40 = vector.broadcast %39 : vector<4x8x1xf32> to vector<4x8x8xf32>
    %41 = arith.subf %37, %40 : vector<4x8x8xf32>
    %42 = math.exp %41 : vector<4x8x8xf32>
    %cst_19 = arith.constant dense<0.000000e+00> : vector<4x8xf32>
    %43 = vector.multi_reduction <add>, %42, %cst_19 [2] : vector<4x8x8xf32> to vector<4x8xf32>
    %44 = vector.shape_cast %43 : vector<4x8xf32> to vector<4x8x1xf32>
    %45 = tpu.reciprocal %44 {approx = true} : vector<4x8x1xf32> -> vector<4x8x1xf32>
    %46 = vector.broadcast %45 : vector<4x8x1xf32> to vector<4x8x8xf32>
    %47 = arith.mulf %42, %46 : vector<4x8x8xf32>
    %48 = arith.truncf %47 : vector<4x8x8xf32> to vector<4x8x8xbf16>
    "tpu.trace_start"() <{level = 10 : i32, message = "hqk,hkd->hqd"}> : () -> ()
    %cst_20 = arith.constant dense<0.000000e+00> : vector<4x8x32xf32>
    %49 = tpu.matmul %48, %34, %cst_20 {dimension_numbers = #tpu.dot_dimension_numbers<[2], [1], [1], [2], [0, 0, 0, 1, 1, 2], [0], [0]>} : vector<4x8x8xbf16>, vector<4x8x32xbf16>, vector<4x8x32xf32> -> vector<4x8x32xf32>
    "tpu.trace_stop"() : () -> ()
    %50 = tpu.transpose %49, [1, 0, 2] : vector<4x8x32xf32> -> vector<8x4x32xf32>
    %51 = vector.shape_cast %50 : vector<8x4x32xf32> to vector<8x128xf32>
    %52 = arith.truncf %51 : vector<8x128xf32> to vector<8x128xbf16>
    %c0_21 = arith.constant 0 : index
    %c0_22 = arith.constant 0 : index
    %c0_23 = arith.constant 0 : index
    %53 = vector.load %arg7[%c0_21, %c0_22, %c0_23] : memref<3x128x128xbf16, #tpu.memory_space<vmem>>, vector<1x128x128xbf16>
    %54 = vector.shape_cast %53 : vector<1x128x128xbf16> to vector<128x128xbf16>
    %cst_24 = arith.constant dense<0.000000e+00> : vector<8x128xf32>
    %55 = tpu.matmul %52, %54, %cst_24 {dimension_numbers = #tpu.dot_dimension_numbers<[1], [0], [0], [1], [0, 0, 1, 1], [], []>} : vector<8x128xbf16>, vector<128x128xbf16>, vector<8x128xf32> -> vector<8x128xf32>
    %c0_25 = arith.constant 0 : index
    %c0_26 = arith.constant 0 : index
    %c0_27 = arith.constant 0 : index
    %56 = vector.load %arg8[%c0_25, %c0_26, %c0_27] : memref<3x1x128xf32, #tpu.memory_space<vmem>>, vector<1x1x128xf32>
    %57 = vector.shape_cast %56 : vector<1x1x128xf32> to vector<1x128xf32>
    %58 = vector.broadcast %57 : vector<1x128xf32> to vector<8x128xf32>
    %59 = arith.addf %55, %58 : vector<8x128xf32>
    %60 = arith.addf %14, %59 : vector<8x128xf32>
    %cst_28 = arith.constant dense<0.000000e+00> : vector<8xf32>
    %61 = vector.multi_reduction <add>, %60, %cst_28 [1] : vector<8x128xf32> to vector<8xf32>
    %62 = vector.shape_cast %61 : vector<8xf32> to vector<8x1xf32>
    %cst_29 = arith.constant 1.280000e+02 : f32
    %63 = vector.broadcast %cst_29 : f32 to vector<8x1xf32>
    %64 = arith.divf %62, %63 : vector<8x1xf32>
    %65 = vector.broadcast %64 : vector<8x1xf32> to vector<8x128xf32>
    %66 = arith.subf %60, %65 : vector<8x128xf32>
    %67 = arith.mulf %66, %66 : vector<8x128xf32>
    %cst_30 = arith.constant dense<0.000000e+00> : vector<8xf32>
    %68 = vector.multi_reduction <add>, %67, %cst_30 [1] : vector<8x128xf32> to vector<8xf32>
    %69 = vector.shape_cast %68 : vector<8xf32> to vector<8x1xf32>
    %cst_31 = arith.constant 1.280000e+02 : f32
    %70 = vector.broadcast %cst_31 : f32 to vector<8x1xf32>
    %71 = arith.divf %69, %70 : vector<8x1xf32>
    %72 = vector.broadcast %64 : vector<8x1xf32> to vector<8x128xf32>
    %73 = arith.subf %60, %72 : vector<8x128xf32>
    %cst_32 = arith.constant 9.99999974E-6 : f32
    %74 = vector.broadcast %cst_32 : f32 to vector<8x1xf32>
    %75 = arith.addf %71, %74 : vector<8x1xf32>
    %76 = math.rsqrt %75 : vector<8x1xf32>
    %77 = vector.broadcast %76 : vector<8x1xf32> to vector<8x128xf32>
    %78 = arith.mulf %73, %77 : vector<8x128xf32>
    %c0_33 = arith.constant 0 : index
    %c0_34 = arith.constant 0 : index
    %c0_35 = arith.constant 0 : index
    %79 = vector.load %arg9[%c0_33, %c0_34, %c0_35] : memref<3x1x128xf32, #tpu.memory_space<vmem>>, vector<1x1x128xf32>
    %80 = vector.shape_cast %79 : vector<1x1x128xf32> to vector<1x128xf32>
    %81 = vector.broadcast %80 : vector<1x128xf32> to vector<8x128xf32>
    %82 = arith.mulf %78, %81 : vector<8x128xf32>
    %c0_36 = arith.constant 0 : index
    %c0_37 = arith.constant 0 : index
    %c0_38 = arith.constant 0 : index
    %83 = vector.load %arg10[%c0_36, %c0_37, %c0_38] : memref<3x1x128xf32, #tpu.memory_space<vmem>>, vector<1x1x128xf32>
    %84 = vector.shape_cast %83 : vector<1x1x128xf32> to vector<1x128xf32>
    %85 = vector.broadcast %84 : vector<1x128xf32> to vector<8x128xf32>
    %86 = arith.addf %82, %85 : vector<8x128xf32>
    %87 = arith.truncf %86 : vector<8x128xf32> to vector<8x128xbf16>
    %c0_39 = arith.constant 0 : index
    %c0_40 = arith.constant 0 : index
    %c0_41 = arith.constant 0 : index
    %88 = vector.load %arg11[%c0_39, %c0_40, %c0_41] : memref<3x128x256xbf16, #tpu.memory_space<vmem>>, vector<1x128x256xbf16>
    %89 = vector.shape_cast %88 : vector<1x128x256xbf16> to vector<128x256xbf16>
    %cst_42 = arith.constant dense<0.000000e+00> : vector<8x256xf32>
    %90 = tpu.matmul %87, %89, %cst_42 {dimension_numbers = #tpu.dot_dimension_numbers<[1], [0], [0], [1], [0, 0, 1, 1], [], []>} : vector<8x128xbf16>, vector<128x256xbf16>, vector<8x256xf32> -> vector<8x256xf32>
    %c0_43 = arith.constant 0 : index
    %c0_44 = arith.constant 0 : index
    %c0_45 = arith.constant 0 : index
    %91 = vector.load %arg12[%c0_43, %c0_44, %c0_45] : memref<3x1x256xf32, #tpu.memory_space<vmem>>, vector<1x1x256xf32>
    %92 = vector.shape_cast %91 : vector<1x1x256xf32> to vector<1x256xf32>
    %93 = vector.broadcast %92 : vector<1x256xf32> to vector<8x256xf32>
    %94 = arith.addf %90, %93 : vector<8x256xf32>
    %cst_46 = arith.constant 0.000000e+00 : f32
    %95 = vector.broadcast %cst_46 : f32 to vector<8x256xf32>
    %96 = arith.maximumf %94, %95 : vector<8x256xf32>
    %97 = arith.truncf %96 : vector<8x256xf32> to vector<8x256xbf16>
    %c0_47 = arith.constant 0 : index
    %c0_48 = arith.constant 0 : index
    %c0_49 = arith.constant 0 : index
    %98 = vector.load %arg13[%c0_47, %c0_48, %c0_49] : memref<3x256x128xbf16, #tpu.memory_space<vmem>>, vector<1x256x128xbf16>
    %99 = vector.shape_cast %98 : vector<1x256x128xbf16> to vector<256x128xbf16>
    %cst_50 = arith.constant dense<0.000000e+00> : vector<8x128xf32>
    %100 = tpu.matmul %97, %99, %cst_50 {dimension_numbers = #tpu.dot_dimension_numbers<[1], [0], [0], [1], [0, 0, 1, 1], [], []>} : vector<8x256xbf16>, vector<256x128xbf16>, vector<8x128xf32> -> vector<8x128xf32>
    %c0_51 = arith.constant 0 : index
    %c0_52 = arith.constant 0 : index
    %c0_53 = arith.constant 0 : index
    %101 = vector.load %arg14[%c0_51, %c0_52, %c0_53] : memref<3x1x128xf32, #tpu.memory_space<vmem>>, vector<1x1x128xf32>
    %102 = vector.shape_cast %101 : vector<1x1x128xf32> to vector<1x128xf32>
    %103 = vector.broadcast %102 : vector<1x128xf32> to vector<8x128xf32>
    %104 = arith.addf %100, %103 : vector<8x128xf32>
    %105 = arith.addf %86, %104 : vector<8x128xf32>
    %cst_54 = arith.constant dense<0.000000e+00> : vector<8xf32>
    %106 = vector.multi_reduction <add>, %105, %cst_54 [1] : vector<8x128xf32> to vector<8xf32>
    %107 = vector.shape_cast %106 : vector<8xf32> to vector<8x1xf32>
    %cst_55 = arith.constant 1.280000e+02 : f32
    %108 = vector.broadcast %cst_55 : f32 to vector<8x1xf32>
    %109 = arith.divf %107, %108 : vector<8x1xf32>
    %110 = vector.broadcast %109 : vector<8x1xf32> to vector<8x128xf32>
    %111 = arith.subf %105, %110 : vector<8x128xf32>
    %112 = arith.mulf %111, %111 : vector<8x128xf32>
    %cst_56 = arith.constant dense<0.000000e+00> : vector<8xf32>
    %113 = vector.multi_reduction <add>, %112, %cst_56 [1] : vector<8x128xf32> to vector<8xf32>
    %114 = vector.shape_cast %113 : vector<8xf32> to vector<8x1xf32>
    %cst_57 = arith.constant 1.280000e+02 : f32
    %115 = vector.broadcast %cst_57 : f32 to vector<8x1xf32>
    %116 = arith.divf %114, %115 : vector<8x1xf32>
    %117 = vector.broadcast %109 : vector<8x1xf32> to vector<8x128xf32>
    %118 = arith.subf %105, %117 : vector<8x128xf32>
    %cst_58 = arith.constant 9.99999974E-6 : f32
    %119 = vector.broadcast %cst_58 : f32 to vector<8x1xf32>
    %120 = arith.addf %116, %119 : vector<8x1xf32>
    %121 = math.rsqrt %120 : vector<8x1xf32>
    %122 = vector.broadcast %121 : vector<8x1xf32> to vector<8x128xf32>
    %123 = arith.mulf %118, %122 : vector<8x128xf32>
    %c0_59 = arith.constant 0 : index
    %c0_60 = arith.constant 0 : index
    %c0_61 = arith.constant 0 : index
    %124 = vector.load %arg15[%c0_59, %c0_60, %c0_61] : memref<3x1x128xf32, #tpu.memory_space<vmem>>, vector<1x1x128xf32>
    %125 = vector.shape_cast %124 : vector<1x1x128xf32> to vector<1x128xf32>
    %126 = vector.broadcast %125 : vector<1x128xf32> to vector<8x128xf32>
    %127 = arith.mulf %123, %126 : vector<8x128xf32>
    %c0_62 = arith.constant 0 : index
    %c0_63 = arith.constant 0 : index
    %c0_64 = arith.constant 0 : index
    %128 = vector.load %arg16[%c0_62, %c0_63, %c0_64] : memref<3x1x128xf32, #tpu.memory_space<vmem>>, vector<1x1x128xf32>
    %129 = vector.shape_cast %128 : vector<1x1x128xf32> to vector<1x128xf32>
    %130 = vector.broadcast %129 : vector<1x128xf32> to vector<8x128xf32>
    %131 = arith.addf %127, %130 : vector<8x128xf32>
    %132 = arith.truncf %131 : vector<8x128xf32> to vector<8x128xbf16>
    %c1 = arith.constant 1 : index
    %c0_65 = arith.constant 0 : index
    %c0_66 = arith.constant 0 : index
    %133 = vector.load %arg5[%c1, %c0_65, %c0_66] : memref<3x128x384xbf16, #tpu.memory_space<vmem>>, vector<1x128x384xbf16>
    %134 = vector.shape_cast %133 : vector<1x128x384xbf16> to vector<128x384xbf16>
    %cst_67 = arith.constant dense<0.000000e+00> : vector<8x384xf32>
    %135 = tpu.matmul %132, %134, %cst_67 {dimension_numbers = #tpu.dot_dimension_numbers<[1], [0], [0], [1], [0, 0, 1, 1], [], []>} : vector<8x128xbf16>, vector<128x384xbf16>, vector<8x384xf32> -> vector<8x384xf32>
    %c1_68 = arith.constant 1 : index
    %c0_69 = arith.constant 0 : index
    %c0_70 = arith.constant 0 : index
    %136 = vector.load %arg6[%c1_68, %c0_69, %c0_70] : memref<3x1x384xf32, #tpu.memory_space<vmem>>, vector<1x1x384xf32>
    %137 = vector.shape_cast %136 : vector<1x1x384xf32> to vector<1x384xf32>
    %138 = vector.broadcast %137 : vector<1x384xf32> to vector<8x384xf32>
    %139 = arith.addf %135, %138 : vector<8x384xf32>
    %140 = vector.extract_strided_slice %139 {offsets = [0, 0], sizes = [8, 128], strides = [1, 1]} : vector<8x384xf32> to vector<8x128xf32>
    %141 = vector.extract_strided_slice %139 {offsets = [0, 128], sizes = [8, 128], strides = [1, 1]} : vector<8x384xf32> to vector<8x128xf32>
    %142 = vector.extract_strided_slice %139 {offsets = [0, 256], sizes = [8, 128], strides = [1, 1]} : vector<8x384xf32> to vector<8x128xf32>
    %143 = vector.shape_cast %140 : vector<8x128xf32> to vector<8x4x32xf32>
    %144 = tpu.transpose %143, [1, 0, 2] : vector<8x4x32xf32> -> vector<4x8x32xf32>
    %145 = arith.truncf %144 : vector<4x8x32xf32> to vector<4x8x32xbf16>
    %146 = vector.shape_cast %141 : vector<8x128xf32> to vector<8x4x32xf32>
    %147 = tpu.transpose %146, [1, 0, 2] : vector<8x4x32xf32> -> vector<4x8x32xf32>
    %148 = arith.truncf %147 : vector<4x8x32xf32> to vector<4x8x32xbf16>
    %149 = vector.shape_cast %142 : vector<8x128xf32> to vector<8x4x32xf32>
    %150 = tpu.transpose %149, [1, 0, 2] : vector<8x4x32xf32> -> vector<4x8x32xf32>
    %151 = arith.truncf %150 : vector<4x8x32xf32> to vector<4x8x32xbf16>
    "tpu.trace_start"() <{level = 10 : i32, message = "hqd,hkd->hqk"}> : () -> ()
    %cst_71 = arith.constant dense<0.000000e+00> : vector<4x8x8xf32>
    %152 = tpu.matmul %145, %148, %cst_71 {dimension_numbers = #tpu.dot_dimension_numbers<[2], [2], [1], [1], [0, 0, 0, 1, 1, 1], [0], [0]>} : vector<4x8x32xbf16>, vector<4x8x32xbf16>, vector<4x8x8xf32> -> vector<4x8x8xf32>
    "tpu.trace_stop"() : () -> ()
    %cst_72 = arith.constant 0.176776692 : f32
    %153 = vector.broadcast %cst_72 : f32 to vector<4x8x8xf32>
    %154 = arith.mulf %152, %153 : vector<4x8x8xf32>
    %cst_73 = arith.constant dense<0xFF800000> : vector<4x8xf32>
    %155 = vector.multi_reduction <maximumf>, %154, %cst_73 [2] : vector<4x8x8xf32> to vector<4x8xf32>
    %156 = vector.shape_cast %155 : vector<4x8xf32> to vector<4x8x1xf32>
    %157 = vector.broadcast %156 : vector<4x8x1xf32> to vector<4x8x8xf32>
    %158 = arith.subf %154, %157 : vector<4x8x8xf32>
    %159 = math.exp %158 : vector<4x8x8xf32>
    %cst_74 = arith.constant dense<0.000000e+00> : vector<4x8xf32>
    %160 = vector.multi_reduction <add>, %159, %cst_74 [2] : vector<4x8x8xf32> to vector<4x8xf32>
    %161 = vector.shape_cast %160 : vector<4x8xf32> to vector<4x8x1xf32>
    %162 = tpu.reciprocal %161 {approx = true} : vector<4x8x1xf32> -> vector<4x8x1xf32>
    %163 = vector.broadcast %162 : vector<4x8x1xf32> to vector<4x8x8xf32>
    %164 = arith.mulf %159, %163 : vector<4x8x8xf32>
    %165 = arith.truncf %164 : vector<4x8x8xf32> to vector<4x8x8xbf16>
    "tpu.trace_start"() <{level = 10 : i32, message = "hqk,hkd->hqd"}> : () -> ()
    %cst_75 = arith.constant dense<0.000000e+00> : vector<4x8x32xf32>
    %166 = tpu.matmul %165, %151, %cst_75 {dimension_numbers = #tpu.dot_dimension_numbers<[2], [1], [1], [2], [0, 0, 0, 1, 1, 2], [0], [0]>} : vector<4x8x8xbf16>, vector<4x8x32xbf16>, vector<4x8x32xf32> -> vector<4x8x32xf32>
    "tpu.trace_stop"() : () -> ()
    %167 = tpu.transpose %166, [1, 0, 2] : vector<4x8x32xf32> -> vector<8x4x32xf32>
    %168 = vector.shape_cast %167 : vector<8x4x32xf32> to vector<8x128xf32>
    %169 = arith.truncf %168 : vector<8x128xf32> to vector<8x128xbf16>
    %c1_76 = arith.constant 1 : index
    %c0_77 = arith.constant 0 : index
    %c0_78 = arith.constant 0 : index
    %170 = vector.load %arg7[%c1_76, %c0_77, %c0_78] : memref<3x128x128xbf16, #tpu.memory_space<vmem>>, vector<1x128x128xbf16>
    %171 = vector.shape_cast %170 : vector<1x128x128xbf16> to vector<128x128xbf16>
    %cst_79 = arith.constant dense<0.000000e+00> : vector<8x128xf32>
    %172 = tpu.matmul %169, %171, %cst_79 {dimension_numbers = #tpu.dot_dimension_numbers<[1], [0], [0], [1], [0, 0, 1, 1], [], []>} : vector<8x128xbf16>, vector<128x128xbf16>, vector<8x128xf32> -> vector<8x128xf32>
    %c1_80 = arith.constant 1 : index
    %c0_81 = arith.constant 0 : index
    %c0_82 = arith.constant 0 : index
    %173 = vector.load %arg8[%c1_80, %c0_81, %c0_82] : memref<3x1x128xf32, #tpu.memory_space<vmem>>, vector<1x1x128xf32>
    %174 = vector.shape_cast %173 : vector<1x1x128xf32> to vector<1x128xf32>
    %175 = vector.broadcast %174 : vector<1x128xf32> to vector<8x128xf32>
    %176 = arith.addf %172, %175 : vector<8x128xf32>
    %177 = arith.addf %131, %176 : vector<8x128xf32>
    %cst_83 = arith.constant dense<0.000000e+00> : vector<8xf32>
    %178 = vector.multi_reduction <add>, %177, %cst_83 [1] : vector<8x128xf32> to vector<8xf32>
    %179 = vector.shape_cast %178 : vector<8xf32> to vector<8x1xf32>
    %cst_84 = arith.constant 1.280000e+02 : f32
    %180 = vector.broadcast %cst_84 : f32 to vector<8x1xf32>
    %181 = arith.divf %179, %180 : vector<8x1xf32>
    %182 = vector.broadcast %181 : vector<8x1xf32> to vector<8x128xf32>
    %183 = arith.subf %177, %182 : vector<8x128xf32>
    %184 = arith.mulf %183, %183 : vector<8x128xf32>
    %cst_85 = arith.constant dense<0.000000e+00> : vector<8xf32>
    %185 = vector.multi_reduction <add>, %184, %cst_85 [1] : vector<8x128xf32> to vector<8xf32>
    %186 = vector.shape_cast %185 : vector<8xf32> to vector<8x1xf32>
    %cst_86 = arith.constant 1.280000e+02 : f32
    %187 = vector.broadcast %cst_86 : f32 to vector<8x1xf32>
    %188 = arith.divf %186, %187 : vector<8x1xf32>
    %189 = vector.broadcast %181 : vector<8x1xf32> to vector<8x128xf32>
    %190 = arith.subf %177, %189 : vector<8x128xf32>
    %cst_87 = arith.constant 9.99999974E-6 : f32
    %191 = vector.broadcast %cst_87 : f32 to vector<8x1xf32>
    %192 = arith.addf %188, %191 : vector<8x1xf32>
    %193 = math.rsqrt %192 : vector<8x1xf32>
    %194 = vector.broadcast %193 : vector<8x1xf32> to vector<8x128xf32>
    %195 = arith.mulf %190, %194 : vector<8x128xf32>
    %c1_88 = arith.constant 1 : index
    %c0_89 = arith.constant 0 : index
    %c0_90 = arith.constant 0 : index
    %196 = vector.load %arg9[%c1_88, %c0_89, %c0_90] : memref<3x1x128xf32, #tpu.memory_space<vmem>>, vector<1x1x128xf32>
    %197 = vector.shape_cast %196 : vector<1x1x128xf32> to vector<1x128xf32>
    %198 = vector.broadcast %197 : vector<1x128xf32> to vector<8x128xf32>
    %199 = arith.mulf %195, %198 : vector<8x128xf32>
    %c1_91 = arith.constant 1 : index
    %c0_92 = arith.constant 0 : index
    %c0_93 = arith.constant 0 : index
    %200 = vector.load %arg10[%c1_91, %c0_92, %c0_93] : memref<3x1x128xf32, #tpu.memory_space<vmem>>, vector<1x1x128xf32>
    %201 = vector.shape_cast %200 : vector<1x1x128xf32> to vector<1x128xf32>
    %202 = vector.broadcast %201 : vector<1x128xf32> to vector<8x128xf32>
    %203 = arith.addf %199, %202 : vector<8x128xf32>
    %204 = arith.truncf %203 : vector<8x128xf32> to vector<8x128xbf16>
    %c1_94 = arith.constant 1 : index
    %c0_95 = arith.constant 0 : index
    %c0_96 = arith.constant 0 : index
    %205 = vector.load %arg11[%c1_94, %c0_95, %c0_96] : memref<3x128x256xbf16, #tpu.memory_space<vmem>>, vector<1x128x256xbf16>
    %206 = vector.shape_cast %205 : vector<1x128x256xbf16> to vector<128x256xbf16>
    %cst_97 = arith.constant dense<0.000000e+00> : vector<8x256xf32>
    %207 = tpu.matmul %204, %206, %cst_97 {dimension_numbers = #tpu.dot_dimension_numbers<[1], [0], [0], [1], [0, 0, 1, 1], [], []>} : vector<8x128xbf16>, vector<128x256xbf16>, vector<8x256xf32> -> vector<8x256xf32>
    %c1_98 = arith.constant 1 : index
    %c0_99 = arith.constant 0 : index
    %c0_100 = arith.constant 0 : index
    %208 = vector.load %arg12[%c1_98, %c0_99, %c0_100] : memref<3x1x256xf32, #tpu.memory_space<vmem>>, vector<1x1x256xf32>
    %209 = vector.shape_cast %208 : vector<1x1x256xf32> to vector<1x256xf32>
    %210 = vector.broadcast %209 : vector<1x256xf32> to vector<8x256xf32>
    %211 = arith.addf %207, %210 : vector<8x256xf32>
    %cst_101 = arith.constant 0.000000e+00 : f32
    %212 = vector.broadcast %cst_101 : f32 to vector<8x256xf32>
    %213 = arith.maximumf %211, %212 : vector<8x256xf32>
    %214 = arith.truncf %213 : vector<8x256xf32> to vector<8x256xbf16>
    %c1_102 = arith.constant 1 : index
    %c0_103 = arith.constant 0 : index
    %c0_104 = arith.constant 0 : index
    %215 = vector.load %arg13[%c1_102, %c0_103, %c0_104] : memref<3x256x128xbf16, #tpu.memory_space<vmem>>, vector<1x256x128xbf16>
    %216 = vector.shape_cast %215 : vector<1x256x128xbf16> to vector<256x128xbf16>
    %cst_105 = arith.constant dense<0.000000e+00> : vector<8x128xf32>
    %217 = tpu.matmul %214, %216, %cst_105 {dimension_numbers = #tpu.dot_dimension_numbers<[1], [0], [0], [1], [0, 0, 1, 1], [], []>} : vector<8x256xbf16>, vector<256x128xbf16>, vector<8x128xf32> -> vector<8x128xf32>
    %c1_106 = arith.constant 1 : index
    %c0_107 = arith.constant 0 : index
    %c0_108 = arith.constant 0 : index
    %218 = vector.load %arg14[%c1_106, %c0_107, %c0_108] : memref<3x1x128xf32, #tpu.memory_space<vmem>>, vector<1x1x128xf32>
    %219 = vector.shape_cast %218 : vector<1x1x128xf32> to vector<1x128xf32>
    %220 = vector.broadcast %219 : vector<1x128xf32> to vector<8x128xf32>
    %221 = arith.addf %217, %220 : vector<8x128xf32>
    %222 = arith.addf %203, %221 : vector<8x128xf32>
    %cst_109 = arith.constant dense<0.000000e+00> : vector<8xf32>
    %223 = vector.multi_reduction <add>, %222, %cst_109 [1] : vector<8x128xf32> to vector<8xf32>
    %224 = vector.shape_cast %223 : vector<8xf32> to vector<8x1xf32>
    %cst_110 = arith.constant 1.280000e+02 : f32
    %225 = vector.broadcast %cst_110 : f32 to vector<8x1xf32>
    %226 = arith.divf %224, %225 : vector<8x1xf32>
    %227 = vector.broadcast %226 : vector<8x1xf32> to vector<8x128xf32>
    %228 = arith.subf %222, %227 : vector<8x128xf32>
    %229 = arith.mulf %228, %228 : vector<8x128xf32>
    %cst_111 = arith.constant dense<0.000000e+00> : vector<8xf32>
    %230 = vector.multi_reduction <add>, %229, %cst_111 [1] : vector<8x128xf32> to vector<8xf32>
    %231 = vector.shape_cast %230 : vector<8xf32> to vector<8x1xf32>
    %cst_112 = arith.constant 1.280000e+02 : f32
    %232 = vector.broadcast %cst_112 : f32 to vector<8x1xf32>
    %233 = arith.divf %231, %232 : vector<8x1xf32>
    %234 = vector.broadcast %226 : vector<8x1xf32> to vector<8x128xf32>
    %235 = arith.subf %222, %234 : vector<8x128xf32>
    %cst_113 = arith.constant 9.99999974E-6 : f32
    %236 = vector.broadcast %cst_113 : f32 to vector<8x1xf32>
    %237 = arith.addf %233, %236 : vector<8x1xf32>
    %238 = math.rsqrt %237 : vector<8x1xf32>
    %239 = vector.broadcast %238 : vector<8x1xf32> to vector<8x128xf32>
    %240 = arith.mulf %235, %239 : vector<8x128xf32>
    %c1_114 = arith.constant 1 : index
    %c0_115 = arith.constant 0 : index
    %c0_116 = arith.constant 0 : index
    %241 = vector.load %arg15[%c1_114, %c0_115, %c0_116] : memref<3x1x128xf32, #tpu.memory_space<vmem>>, vector<1x1x128xf32>
    %242 = vector.shape_cast %241 : vector<1x1x128xf32> to vector<1x128xf32>
    %243 = vector.broadcast %242 : vector<1x128xf32> to vector<8x128xf32>
    %244 = arith.mulf %240, %243 : vector<8x128xf32>
    %c1_117 = arith.constant 1 : index
    %c0_118 = arith.constant 0 : index
    %c0_119 = arith.constant 0 : index
    %245 = vector.load %arg16[%c1_117, %c0_118, %c0_119] : memref<3x1x128xf32, #tpu.memory_space<vmem>>, vector<1x1x128xf32>
    %246 = vector.shape_cast %245 : vector<1x1x128xf32> to vector<1x128xf32>
    %247 = vector.broadcast %246 : vector<1x128xf32> to vector<8x128xf32>
    %248 = arith.addf %244, %247 : vector<8x128xf32>
    %249 = arith.truncf %248 : vector<8x128xf32> to vector<8x128xbf16>
    %c2 = arith.constant 2 : index
    %c0_120 = arith.constant 0 : index
    %c0_121 = arith.constant 0 : index
    %250 = vector.load %arg5[%c2, %c0_120, %c0_121] : memref<3x128x384xbf16, #tpu.memory_space<vmem>>, vector<1x128x384xbf16>
    %251 = vector.shape_cast %250 : vector<1x128x384xbf16> to vector<128x384xbf16>
    %cst_122 = arith.constant dense<0.000000e+00> : vector<8x384xf32>
    %252 = tpu.matmul %249, %251, %cst_122 {dimension_numbers = #tpu.dot_dimension_numbers<[1], [0], [0], [1], [0, 0, 1, 1], [], []>} : vector<8x128xbf16>, vector<128x384xbf16>, vector<8x384xf32> -> vector<8x384xf32>
    %c2_123 = arith.constant 2 : index
    %c0_124 = arith.constant 0 : index
    %c0_125 = arith.constant 0 : index
    %253 = vector.load %arg6[%c2_123, %c0_124, %c0_125] : memref<3x1x384xf32, #tpu.memory_space<vmem>>, vector<1x1x384xf32>
    %254 = vector.shape_cast %253 : vector<1x1x384xf32> to vector<1x384xf32>
    %255 = vector.broadcast %254 : vector<1x384xf32> to vector<8x384xf32>
    %256 = arith.addf %252, %255 : vector<8x384xf32>
    %257 = vector.extract_strided_slice %256 {offsets = [0, 0], sizes = [8, 128], strides = [1, 1]} : vector<8x384xf32> to vector<8x128xf32>
    %258 = vector.extract_strided_slice %256 {offsets = [0, 128], sizes = [8, 128], strides = [1, 1]} : vector<8x384xf32> to vector<8x128xf32>
    %259 = vector.extract_strided_slice %256 {offsets = [0, 256], sizes = [8, 128], strides = [1, 1]} : vector<8x384xf32> to vector<8x128xf32>
    %260 = vector.shape_cast %257 : vector<8x128xf32> to vector<8x4x32xf32>
    %261 = tpu.transpose %260, [1, 0, 2] : vector<8x4x32xf32> -> vector<4x8x32xf32>
    %262 = arith.truncf %261 : vector<4x8x32xf32> to vector<4x8x32xbf16>
    %263 = vector.shape_cast %258 : vector<8x128xf32> to vector<8x4x32xf32>
    %264 = tpu.transpose %263, [1, 0, 2] : vector<8x4x32xf32> -> vector<4x8x32xf32>
    %265 = arith.truncf %264 : vector<4x8x32xf32> to vector<4x8x32xbf16>
    %266 = vector.shape_cast %259 : vector<8x128xf32> to vector<8x4x32xf32>
    %267 = tpu.transpose %266, [1, 0, 2] : vector<8x4x32xf32> -> vector<4x8x32xf32>
    %268 = arith.truncf %267 : vector<4x8x32xf32> to vector<4x8x32xbf16>
    "tpu.trace_start"() <{level = 10 : i32, message = "hqd,hkd->hqk"}> : () -> ()
    %cst_126 = arith.constant dense<0.000000e+00> : vector<4x8x8xf32>
    %269 = tpu.matmul %262, %265, %cst_126 {dimension_numbers = #tpu.dot_dimension_numbers<[2], [2], [1], [1], [0, 0, 0, 1, 1, 1], [0], [0]>} : vector<4x8x32xbf16>, vector<4x8x32xbf16>, vector<4x8x8xf32> -> vector<4x8x8xf32>
    "tpu.trace_stop"() : () -> ()
    %cst_127 = arith.constant 0.176776692 : f32
    %270 = vector.broadcast %cst_127 : f32 to vector<4x8x8xf32>
    %271 = arith.mulf %269, %270 : vector<4x8x8xf32>
    %cst_128 = arith.constant dense<0xFF800000> : vector<4x8xf32>
    %272 = vector.multi_reduction <maximumf>, %271, %cst_128 [2] : vector<4x8x8xf32> to vector<4x8xf32>
    %273 = vector.shape_cast %272 : vector<4x8xf32> to vector<4x8x1xf32>
    %274 = vector.broadcast %273 : vector<4x8x1xf32> to vector<4x8x8xf32>
    %275 = arith.subf %271, %274 : vector<4x8x8xf32>
    %276 = math.exp %275 : vector<4x8x8xf32>
    %cst_129 = arith.constant dense<0.000000e+00> : vector<4x8xf32>
    %277 = vector.multi_reduction <add>, %276, %cst_129 [2] : vector<4x8x8xf32> to vector<4x8xf32>
    %278 = vector.shape_cast %277 : vector<4x8xf32> to vector<4x8x1xf32>
    %279 = tpu.reciprocal %278 {approx = true} : vector<4x8x1xf32> -> vector<4x8x1xf32>
    %280 = vector.broadcast %279 : vector<4x8x1xf32> to vector<4x8x8xf32>
    %281 = arith.mulf %276, %280 : vector<4x8x8xf32>
    %282 = arith.truncf %281 : vector<4x8x8xf32> to vector<4x8x8xbf16>
    "tpu.trace_start"() <{level = 10 : i32, message = "hqk,hkd->hqd"}> : () -> ()
    %cst_130 = arith.constant dense<0.000000e+00> : vector<4x8x32xf32>
    %283 = tpu.matmul %282, %268, %cst_130 {dimension_numbers = #tpu.dot_dimension_numbers<[2], [1], [1], [2], [0, 0, 0, 1, 1, 2], [0], [0]>} : vector<4x8x8xbf16>, vector<4x8x32xbf16>, vector<4x8x32xf32> -> vector<4x8x32xf32>
    "tpu.trace_stop"() : () -> ()
    %284 = tpu.transpose %283, [1, 0, 2] : vector<4x8x32xf32> -> vector<8x4x32xf32>
    %285 = vector.shape_cast %284 : vector<8x4x32xf32> to vector<8x128xf32>
    %286 = arith.truncf %285 : vector<8x128xf32> to vector<8x128xbf16>
    %c2_131 = arith.constant 2 : index
    %c0_132 = arith.constant 0 : index
    %c0_133 = arith.constant 0 : index
    %287 = vector.load %arg7[%c2_131, %c0_132, %c0_133] : memref<3x128x128xbf16, #tpu.memory_space<vmem>>, vector<1x128x128xbf16>
    %288 = vector.shape_cast %287 : vector<1x128x128xbf16> to vector<128x128xbf16>
    %cst_134 = arith.constant dense<0.000000e+00> : vector<8x128xf32>
    %289 = tpu.matmul %286, %288, %cst_134 {dimension_numbers = #tpu.dot_dimension_numbers<[1], [0], [0], [1], [0, 0, 1, 1], [], []>} : vector<8x128xbf16>, vector<128x128xbf16>, vector<8x128xf32> -> vector<8x128xf32>
    %c2_135 = arith.constant 2 : index
    %c0_136 = arith.constant 0 : index
    %c0_137 = arith.constant 0 : index
    %290 = vector.load %arg8[%c2_135, %c0_136, %c0_137] : memref<3x1x128xf32, #tpu.memory_space<vmem>>, vector<1x1x128xf32>
    %291 = vector.shape_cast %290 : vector<1x1x128xf32> to vector<1x128xf32>
    %292 = vector.broadcast %291 : vector<1x128xf32> to vector<8x128xf32>
    %293 = arith.addf %289, %292 : vector<8x128xf32>
    %294 = arith.addf %248, %293 : vector<8x128xf32>
    %cst_138 = arith.constant dense<0.000000e+00> : vector<8xf32>
    %295 = vector.multi_reduction <add>, %294, %cst_138 [1] : vector<8x128xf32> to vector<8xf32>
    %296 = vector.shape_cast %295 : vector<8xf32> to vector<8x1xf32>
    %cst_139 = arith.constant 1.280000e+02 : f32
    %297 = vector.broadcast %cst_139 : f32 to vector<8x1xf32>
    %298 = arith.divf %296, %297 : vector<8x1xf32>
    %299 = vector.broadcast %298 : vector<8x1xf32> to vector<8x128xf32>
    %300 = arith.subf %294, %299 : vector<8x128xf32>
    %301 = arith.mulf %300, %300 : vector<8x128xf32>
    %cst_140 = arith.constant dense<0.000000e+00> : vector<8xf32>
    %302 = vector.multi_reduction <add>, %301, %cst_140 [1] : vector<8x128xf32> to vector<8xf32>
    %303 = vector.shape_cast %302 : vector<8xf32> to vector<8x1xf32>
    %cst_141 = arith.constant 1.280000e+02 : f32
    %304 = vector.broadcast %cst_141 : f32 to vector<8x1xf32>
    %305 = arith.divf %303, %304 : vector<8x1xf32>
    %306 = vector.broadcast %298 : vector<8x1xf32> to vector<8x128xf32>
    %307 = arith.subf %294, %306 : vector<8x128xf32>
    %cst_142 = arith.constant 9.99999974E-6 : f32
    %308 = vector.broadcast %cst_142 : f32 to vector<8x1xf32>
    %309 = arith.addf %305, %308 : vector<8x1xf32>
    %310 = math.rsqrt %309 : vector<8x1xf32>
    %311 = vector.broadcast %310 : vector<8x1xf32> to vector<8x128xf32>
    %312 = arith.mulf %307, %311 : vector<8x128xf32>
    %c2_143 = arith.constant 2 : index
    %c0_144 = arith.constant 0 : index
    %c0_145 = arith.constant 0 : index
    %313 = vector.load %arg9[%c2_143, %c0_144, %c0_145] : memref<3x1x128xf32, #tpu.memory_space<vmem>>, vector<1x1x128xf32>
    %314 = vector.shape_cast %313 : vector<1x1x128xf32> to vector<1x128xf32>
    %315 = vector.broadcast %314 : vector<1x128xf32> to vector<8x128xf32>
    %316 = arith.mulf %312, %315 : vector<8x128xf32>
    %c2_146 = arith.constant 2 : index
    %c0_147 = arith.constant 0 : index
    %c0_148 = arith.constant 0 : index
    %317 = vector.load %arg10[%c2_146, %c0_147, %c0_148] : memref<3x1x128xf32, #tpu.memory_space<vmem>>, vector<1x1x128xf32>
    %318 = vector.shape_cast %317 : vector<1x1x128xf32> to vector<1x128xf32>
    %319 = vector.broadcast %318 : vector<1x128xf32> to vector<8x128xf32>
    %320 = arith.addf %316, %319 : vector<8x128xf32>
    %321 = arith.truncf %320 : vector<8x128xf32> to vector<8x128xbf16>
    %c2_149 = arith.constant 2 : index
    %c0_150 = arith.constant 0 : index
    %c0_151 = arith.constant 0 : index
    %322 = vector.load %arg11[%c2_149, %c0_150, %c0_151] : memref<3x128x256xbf16, #tpu.memory_space<vmem>>, vector<1x128x256xbf16>
    %323 = vector.shape_cast %322 : vector<1x128x256xbf16> to vector<128x256xbf16>
    %cst_152 = arith.constant dense<0.000000e+00> : vector<8x256xf32>
    %324 = tpu.matmul %321, %323, %cst_152 {dimension_numbers = #tpu.dot_dimension_numbers<[1], [0], [0], [1], [0, 0, 1, 1], [], []>} : vector<8x128xbf16>, vector<128x256xbf16>, vector<8x256xf32> -> vector<8x256xf32>
    %c2_153 = arith.constant 2 : index
    %c0_154 = arith.constant 0 : index
    %c0_155 = arith.constant 0 : index
    %325 = vector.load %arg12[%c2_153, %c0_154, %c0_155] : memref<3x1x256xf32, #tpu.memory_space<vmem>>, vector<1x1x256xf32>
    %326 = vector.shape_cast %325 : vector<1x1x256xf32> to vector<1x256xf32>
    %327 = vector.broadcast %326 : vector<1x256xf32> to vector<8x256xf32>
    %328 = arith.addf %324, %327 : vector<8x256xf32>
    %cst_156 = arith.constant 0.000000e+00 : f32
    %329 = vector.broadcast %cst_156 : f32 to vector<8x256xf32>
    %330 = arith.maximumf %328, %329 : vector<8x256xf32>
    %331 = arith.truncf %330 : vector<8x256xf32> to vector<8x256xbf16>
    %c2_157 = arith.constant 2 : index
    %c0_158 = arith.constant 0 : index
    %c0_159 = arith.constant 0 : index
    %332 = vector.load %arg13[%c2_157, %c0_158, %c0_159] : memref<3x256x128xbf16, #tpu.memory_space<vmem>>, vector<1x256x128xbf16>
    %333 = vector.shape_cast %332 : vector<1x256x128xbf16> to vector<256x128xbf16>
    %cst_160 = arith.constant dense<0.000000e+00> : vector<8x128xf32>
    %334 = tpu.matmul %331, %333, %cst_160 {dimension_numbers = #tpu.dot_dimension_numbers<[1], [0], [0], [1], [0, 0, 1, 1], [], []>} : vector<8x256xbf16>, vector<256x128xbf16>, vector<8x128xf32> -> vector<8x128xf32>
    %c2_161 = arith.constant 2 : index
    %c0_162 = arith.constant 0 : index
    %c0_163 = arith.constant 0 : index
    %335 = vector.load %arg14[%c2_161, %c0_162, %c0_163] : memref<3x1x128xf32, #tpu.memory_space<vmem>>, vector<1x1x128xf32>
    %336 = vector.shape_cast %335 : vector<1x1x128xf32> to vector<1x128xf32>
    %337 = vector.broadcast %336 : vector<1x128xf32> to vector<8x128xf32>
    %338 = arith.addf %334, %337 : vector<8x128xf32>
    %339 = arith.addf %320, %338 : vector<8x128xf32>
    %cst_164 = arith.constant dense<0.000000e+00> : vector<8xf32>
    %340 = vector.multi_reduction <add>, %339, %cst_164 [1] : vector<8x128xf32> to vector<8xf32>
    %341 = vector.shape_cast %340 : vector<8xf32> to vector<8x1xf32>
    %cst_165 = arith.constant 1.280000e+02 : f32
    %342 = vector.broadcast %cst_165 : f32 to vector<8x1xf32>
    %343 = arith.divf %341, %342 : vector<8x1xf32>
    %344 = vector.broadcast %343 : vector<8x1xf32> to vector<8x128xf32>
    %345 = arith.subf %339, %344 : vector<8x128xf32>
    %346 = arith.mulf %345, %345 : vector<8x128xf32>
    %cst_166 = arith.constant dense<0.000000e+00> : vector<8xf32>
    %347 = vector.multi_reduction <add>, %346, %cst_166 [1] : vector<8x128xf32> to vector<8xf32>
    %348 = vector.shape_cast %347 : vector<8xf32> to vector<8x1xf32>
    %cst_167 = arith.constant 1.280000e+02 : f32
    %349 = vector.broadcast %cst_167 : f32 to vector<8x1xf32>
    %350 = arith.divf %348, %349 : vector<8x1xf32>
    %351 = vector.broadcast %343 : vector<8x1xf32> to vector<8x128xf32>
    %352 = arith.subf %339, %351 : vector<8x128xf32>
    %cst_168 = arith.constant 9.99999974E-6 : f32
    %353 = vector.broadcast %cst_168 : f32 to vector<8x1xf32>
    %354 = arith.addf %350, %353 : vector<8x1xf32>
    %355 = math.rsqrt %354 : vector<8x1xf32>
    %356 = vector.broadcast %355 : vector<8x1xf32> to vector<8x128xf32>
    %357 = arith.mulf %352, %356 : vector<8x128xf32>
    %c2_169 = arith.constant 2 : index
    %c0_170 = arith.constant 0 : index
    %c0_171 = arith.constant 0 : index
    %358 = vector.load %arg15[%c2_169, %c0_170, %c0_171] : memref<3x1x128xf32, #tpu.memory_space<vmem>>, vector<1x1x128xf32>
    %359 = vector.shape_cast %358 : vector<1x1x128xf32> to vector<1x128xf32>
    %360 = vector.broadcast %359 : vector<1x128xf32> to vector<8x128xf32>
    %361 = arith.mulf %357, %360 : vector<8x128xf32>
    %c2_172 = arith.constant 2 : index
    %c0_173 = arith.constant 0 : index
    %c0_174 = arith.constant 0 : index
    %362 = vector.load %arg16[%c2_172, %c0_173, %c0_174] : memref<3x1x128xf32, #tpu.memory_space<vmem>>, vector<1x1x128xf32>
    %363 = vector.shape_cast %362 : vector<1x1x128xf32> to vector<1x128xf32>
    %364 = vector.broadcast %363 : vector<1x128xf32> to vector<8x128xf32>
    %365 = arith.addf %361, %364 : vector<8x128xf32>
    %366 = arith.truncf %365 : vector<8x128xf32> to vector<8x128xbf16>
    %c0_175 = arith.constant 0 : index
    %c0_176 = arith.constant 0 : index
    %367 = vector.load %arg17[%c0_175, %c0_176] : memref<128x128xbf16, #tpu.memory_space<vmem>>, vector<128x128xbf16>
    %cst_177 = arith.constant dense<0.000000e+00> : vector<8x128xf32>
    %368 = tpu.matmul %366, %367, %cst_177 {dimension_numbers = #tpu.dot_dimension_numbers<[1], [0], [0], [1], [0, 0, 1, 1], [], []>} : vector<8x128xbf16>, vector<128x128xbf16>, vector<8x128xf32> -> vector<8x128xf32>
    %c0_178 = arith.constant 0 : index
    %c0_179 = arith.constant 0 : index
    %369 = vector.load %arg18[%c0_178, %c0_179] : memref<1x128xf32, #tpu.memory_space<vmem>>, vector<1x128xf32>
    %370 = vector.broadcast %369 : vector<1x128xf32> to vector<8x128xf32>
    %371 = arith.addf %368, %370 : vector<8x128xf32>
    %c0_180 = arith.constant 0 : index
    %c0_181 = arith.constant 0 : index
    %c0_182 = arith.constant 0 : index
    %372 = vector.load %arg19[%c0_180, %c0_181, %c0_182] : memref<1x8x128xf32, #tpu.memory_space<vmem>>, vector<1x8x128xf32>
    %373 = vector.shape_cast %372 : vector<1x8x128xf32> to vector<8x128xf32>
    %374 = vector.shape_cast %371 : vector<8x128xf32> to vector<1x8x128xf32>
    tpu.vector_store %arg19[%c0_180, %c0_181, %c0_182], %374 {strides = array<i32>} : memref<1x8x128xf32, #tpu.memory_space<vmem>>, vector<1x8x128xf32>,
    return
  }
  func.func @transform_0(%arg0: i32) -> (i32, i32, i32) {
    %c0_i32 = arith.constant 0 : i32
    %c0_i32_0 = arith.constant 0 : i32
    %c0_i32_1 = arith.constant 0 : i32
    return %arg0, %c0_i32, %c0_i32_0 : i32, i32, i32
  }
  func.func @transform_1(%arg0: i32) -> (i32, i32, i32) {
    %c0_i32 = arith.constant 0 : i32
    %c0_i32_0 = arith.constant 0 : i32
    %c0_i32_1 = arith.constant 0 : i32
    return %arg0, %c0_i32, %c0_i32_0 : i32, i32, i32
  }
  func.func @transform_2(%arg0: i32) -> (i32, i32) {
    %c0_i32 = arith.constant 0 : i32
    %c0_i32_0 = arith.constant 0 : i32
    %c0_i32_1 = arith.constant 0 : i32
    return %c0_i32, %c0_i32_0 : i32, i32
  }
  func.func @transform_3(%arg0: i32) -> (i32, i32) {
    %c0_i32 = arith.constant 0 : i32
    %c0_i32_0 = arith.constant 0 : i32
    %c0_i32_1 = arith.constant 0 : i32
    return %c0_i32, %c0_i32_0 : i32, i32
  }
  func.func @transform_4(%arg0: i32) -> (i32, i32, i32) {
    %c0_i32 = arith.constant 0 : i32
    %c0_i32_0 = arith.constant 0 : i32
    %c0_i32_1 = arith.constant 0 : i32
    %c0_i32_2 = arith.constant 0 : i32
    return %c0_i32, %c0_i32_0, %c0_i32_1 : i32, i32, i32
  }
  func.func @transform_5(%arg0: i32) -> (i32, i32, i32) {
    %c0_i32 = arith.constant 0 : i32
    %c0_i32_0 = arith.constant 0 : i32
    %c0_i32_1 = arith.constant 0 : i32
    %c0_i32_2 = arith.constant 0 : i32
    return %c0_i32, %c0_i32_0, %c0_i32_1 : i32, i32, i32
  }
  func.func @transform_6(%arg0: i32) -> (i32, i32, i32) {
    %c0_i32 = arith.constant 0 : i32
    %c0_i32_0 = arith.constant 0 : i32
    %c0_i32_1 = arith.constant 0 : i32
    %c0_i32_2 = arith.constant 0 : i32
    return %c0_i32, %c0_i32_0, %c0_i32_1 : i32, i32, i32
  }
  func.func @transform_7(%arg0: i32) -> (i32, i32, i32) {
    %c0_i32 = arith.constant 0 : i32
    %c0_i32_0 = arith.constant 0 : i32
    %c0_i32_1 = arith.constant 0 : i32
    %c0_i32_2 = arith.constant 0 : i32
    return %c0_i32, %c0_i32_0, %c0_i32_1 : i32, i32, i32
  }
  func.func @transform_8(%arg0: i32) -> (i32, i32, i32) {
    %c0_i32 = arith.constant 0 : i32
    %c0_i32_0 = arith.constant 0 : i32
    %c0_i32_1 = arith.constant 0 : i32
    %c0_i32_2 = arith.constant 0 : i32
    return %c0_i32, %c0_i32_0, %c0_i32_1 : i32, i32, i32
  }
  func.func @transform_9(%arg0: i32) -> (i32, i32, i32) {
    %c0_i32 = arith.constant 0 : i32
    %c0_i32_0 = arith.constant 0 : i32
    %c0_i32_1 = arith.constant 0 : i32
    %c0_i32_2 = arith.constant 0 : i32
    return %c0_i32, %c0_i32_0, %c0_i32_1 : i32, i32, i32
  }
  func.func @transform_10(%arg0: i32) -> (i32, i32, i32) {
    %c0_i32 = arith.constant 0 : i32
    %c0_i32_0 = arith.constant 0 : i32
    %c0_i32_1 = arith.constant 0 : i32
    %c0_i32_2 = arith.constant 0 : i32
    return %c0_i32, %c0_i32_0, %c0_i32_1 : i32, i32, i32
  }
  func.func @transform_11(%arg0: i32) -> (i32, i32, i32) {
    %c0_i32 = arith.constant 0 : i32
    %c0_i32_0 = arith.constant 0 : i32
    %c0_i32_1 = arith.constant 0 : i32
    %c0_i32_2 = arith.constant 0 : i32
    return %c0_i32, %c0_i32_0, %c0_i32_1 : i32, i32, i32
  }
  func.func @transform_12(%arg0: i32) -> (i32, i32, i32) {
    %c0_i32 = arith.constant 0 : i32
    %c0_i32_0 = arith.constant 0 : i32
    %c0_i32_1 = arith.constant 0 : i32
    %c0_i32_2 = arith.constant 0 : i32
    return %c0_i32, %c0_i32_0, %c0_i32_1 : i32, i32, i32
  }
  func.func @transform_13(%arg0: i32) -> (i32, i32, i32) {
    %c0_i32 = arith.constant 0 : i32
    %c0_i32_0 = arith.constant 0 : i32
    %c0_i32_1 = arith.constant 0 : i32
    %c0_i32_2 = arith.constant 0 : i32
    return %c0_i32, %c0_i32_0, %c0_i32_1 : i32, i32, i32
  }
  func.func @transform_14(%arg0: i32) -> (i32, i32, i32) {
    %c0_i32 = arith.constant 0 : i32
    %c0_i32_0 = arith.constant 0 : i32
    %c0_i32_1 = arith.constant 0 : i32
    %c0_i32_2 = arith.constant 0 : i32
    return %c0_i32, %c0_i32_0, %c0_i32_1 : i32, i32, i32
  }
  func.func @transform_15(%arg0: i32) -> (i32, i32, i32) {
    %c0_i32 = arith.constant 0 : i32
    %c0_i32_0 = arith.constant 0 : i32
    %c0_i32_1 = arith.constant 0 : i32
    %c0_i32_2 = arith.constant 0 : i32
    return %c0_i32, %c0_i32_0, %c0_i32_1 : i32, i32, i32
  }
  func.func @transform_16(%arg0: i32) -> (i32, i32) {
    %c0_i32 = arith.constant 0 : i32
    %c0_i32_0 = arith.constant 0 : i32
    %c0_i32_1 = arith.constant 0 : i32
    return %c0_i32, %c0_i32_0 : i32, i32
  }
  func.func @transform_17(%arg0: i32) -> (i32, i32) {
    %c0_i32 = arith.constant 0 : i32
    %c0_i32_0 = arith.constant 0 : i32
    %c0_i32_1 = arith.constant 0 : i32
    return %c0_i32, %c0_i32_0 : i32, i32
  }
  func.func @transform_18(%arg0: i32) -> (i32, i32, i32) {
    %c0_i32 = arith.constant 0 : i32
    %c0_i32_0 = arith.constant 0 : i32
    %c0_i32_1 = arith.constant 0 : i32
    return %arg0, %c0_i32, %c0_i32_0 : i32, i32, i32
  }
}

</mosaic_0001>

<bundles_post_ra>
// kernel: tpu_custom_call.1
= control target key start
LH: loop header
LB: loop body
LE: loop exit
PB: predicated region body
PF: predicated region fallthrough
CT: control target
= control target key end

     0   :  { %s9132_s0 = inlined_call_operand.vmem [shape: s32[2,8,1], index: 0, kind: input, shape index: {}]   ;;  %s9133_s1 = inlined_call_operand.vmem [shape: f32[2,8,1], index: 1, kind: input, shape index: {}]   ;;  %s9134_s2 = inlined_call_operand.hbm [shape: f32[128,128], index: 2, kind: input, shape index: {}]   ;;  %s9135_s3 = inlined_call_operand.vmem [shape: f32[8,128], index: 3, kind: input, shape index: {}]   ;;  %s9136_s4 = inlined_call_operand.hbm [shape: bf16[3,128,384], index: 4, kind: input, shape index: {}]   ;;  %s9137_s5 = inlined_call_operand.vmem [shape: f32[3,1,384], index: 5, kind: input, shape index: {}]   ;;  %s9138_s6 = inlined_call_operand.hbm [shape: bf16[3,128,128], index: 6, kind: input, shape index: {}]   ;;  %s9139_s7 = inlined_call_operand.vmem [shape: f32[3,1,128], index: 7, kind: input, shape index: {}]   ;;  %s9140_s8 = inlined_call_operand.vmem [shape: f32[3,1,128], index: 8, kind: input, shape index: {}]   ;;  %s9141_s9 = inlined_call_operand.vmem [shape: f32[3,1,128], index: 9, kind: input, shape index: {}]   ;;  %s9142_s10 = inlined_call_operand.hbm [shape: bf16[3,128,256], index: 10, kind: input, shape index: {}]   ;;  %s9143_s11 = inlined_call_operand.vmem [shape: f32[3,1,256], index: 11, kind: input, shape index: {}]   ;;  %s9144_s12 = inlined_call_operand.hbm [shape: bf16[3,256,128], index: 12, kind: input, shape index: {}]   ;;  %s9145_s13 = inlined_call_operand.hbm [shape: f32[3,1,128], index: 13, kind: input, shape index: {}]   ;;  %s9146_s14 = inlined_call_operand.hbm [shape: f32[3,1,128], index: 14, kind: input, shape index: {}]   ;;  %s9147_s15 = inlined_call_operand.hbm [shape: f32[3,1,128], index: 15, kind: input, shape index: {}]   ;;  %s9148_s16 = inlined_call_operand.vmem [shape: bf16[128,128], index: 16, kind: input, shape index: {}]   ;;  %s9149_s17 = inlined_call_operand.vmem [shape: f32[1,128], index: 17, kind: input, shape index: {}]   ;;  %s9150_s18 = inlined_call_operand.hbm [shape: f32[2,8,128], index: 18, kind: output, shape index: {}]  }
   0x1   :  { %9172 = sst [smem:[#allocation31_spill]] %s9132_s0 }
   0x2   :  { %9173 = sst [smem:[#allocation32_spill]] %s9133_s1 }
   0x3   :  { %9174 = sst [smem:[#allocation33_spill]] %s9134_s2 }
   0x4   :  { %9175 = sst [smem:[#allocation34_spill]] %s9136_s4 }
   0x5   :  { %9176 = sst [smem:[#allocation35_spill]] %s9141_s9 }
   0x6   :  { %9177 = sst [smem:[#allocation36_spill]] %s9142_s10 }
   0x7   :  { %9178 = sst [smem:[#allocation37_spill]] %s9143_s11 }
   0x8   :  { %9179 = sst [smem:[#allocation38_spill]] %s9148_s16 }
   0x9   :  { %9180 = sst [smem:[#allocation39_spill]] %s9149_s17 }
   0xa   :  { %9181 = sst [smem:[#allocation40_spill]] %s9150_s18 }
   0xb   :  { %23 = vsyncpa [#allocation3], 0 }
   0xc   :  { %24 = vsyncpa [#allocation6], 0 }
   0xd   :  { %25 = vsyncpa [#allocation9], 0 }
   0xe   :  { %26 = vsyncpa [#allocation12], 0 }
   0xf   :  { %27 = vsyncpa [#allocation15], 0 }
  0x10   :  { %28 = vsyncpa [#allocation4], 0 }
  0x11   :  { %30 = vsyncpa [#allocation4 + $0x1], 0  ;;  %s8167_s27 = smov 0   ;;  %s8169_s28 = smov 0  }
  0x12   :  { %s8171_s29 = smov 0   ;;  %s8173_s30 = smov 0  }
  0x13 LB: > { %9182 = sst [smem:[#allocation23_spill]] %s8031_s27  ;;  %s8188_s0 = sadd.s32 4294967295, %s8043_s30   ;;  %s8043_s30 = sphi %s8173_s30, %s9229_s30   ;;  %s8039_s29 = sphi %s8171_s29, %s9232_s29   ;;  %s8035_s28 = sphi %s8169_s28, %s9231_s28   ;;  %s8031_s27 = sphi %s8167_s27, %s9230_s27  }
  0x14   : > { %9183 = sst [smem:[#allocation24_spill]] %s8035_s28  ;;  %s6447_s19 = sadd.s32 4294967294, %s8043_s30  }
  0x15   : > { %9184 = sst [smem:[#allocation25_spill]] %s8039_s29  ;;  %s8192_s1 = sadd.s32 1, %s8043_s30  }
  0x16   : > { %9185 = sst [smem:[#allocation26_spill]] %s8043_s30  ;;  %s431_s20 = sadd.s32 1, %s8039_s29 }
  0x17   : > { %9186 = sst [smem:[#allocation27_spill]] %s8192_s1  ;;  %s428_s21 = ssub.s32 %s8043_s30, %s8192_s1 }
  0x18   : > { %p441_p0 = scmp.ne.s32.totalorder %s8039_s29, %s8035_s28  ;;  %p429_p1 = scmp.eq.s32.totalorder %s428_s21, 0 }
  0x19   : > { %p442_p2 = scmp.eq.s32.totalorder %s8188_s0, 1  ;;  %p447_p3 = scmp.ne.s32.totalorder %s8035_s28, %s8031_s27 }
  0x1a   : > { %p448_p4 = scmp.eq.s32.totalorder %s6447_s19, 1  ;;  %p6448_p7 = scmp.ge.s32.totalorder %s8043_s30, 1 }
  0x1b   : > { %s8203_s22 = scalar_select %p429_p1, %s8039_s29, %s431_s20  }
  0x1c   : > { %p8205_p5 = por %p442_p2, %p441_p0  ;;  %p8209_p6 = por %p448_p4, %p447_p3 }
  0x1d   : > { %9187 = sst [smem:[#allocation28_spill]] %s8203_s22  ;;  %p455_p8 = scmp.lt.s32.totalorder %s8043_s30, 3 }
  0x1e   : > { %s9188_s2 = scalar_select %p8205_p5, 1, 0 }
  0x1f   : > { %s9190_s23 = scalar_select %p8209_p6, 1, 0 }
  0x20   : > { %9189 = sst [smem:[#allocation29_spill]] %s9188_s2  ;;  %p9159_p9 = scmp.eq.s32.totalorder %s8188_s0, 0 }
  0x21   : > { %9191 = sst [smem:[#allocation30_spill]] %s9190_s23  ;;  %p8216_p10 = pnand %p6448_p7, %p455_p8 }
  0x22   : > { %s8045_s25 = smov [#allocation5]   ;;  %s8046_s20 = smov [#allocation8]  }
  0x23   : > { %s9192_s24 = scalar_select %p8216_p10, 1, 0 }
  0x24   : > { %s483_s26 = sshll.u32 %s8045_s25, 4  ;;  %p7324_p11 = pneg %p8216_p10  ;;  %s484_s26 = int_to_ptr.vmem [resolvable:$true] %s483_s26 }
  0x25   : > { %s521_s21 = sshll.u32 %s8046_s20, 4  ;;  %s9194_s4 = sld [smem:[#allocation34_spill]]  ;;  %s522_s21 = int_to_ptr.vmem [resolvable:$true] %s521_s21 }
  0x26   : > { %p8224_p12 = pnand %p9159_p9, %p7324_p11 }
  0x28   : > { %p8236_p0 = pneg %p8224_p12 }
  0x2b   : > { %s7737_s1 = scalar_lea.hbm %s9194_s4, 9216 }
  0x2c   : > { %p7738_p13 = scmp.ne.s32.totalorder %s9194_s4, %s7737_s1  ;;  %p7744_p3 = scmp.lt.u32.totalorder %s7737_s1, %s9194_s4 }
  0x2e   : > { %p7740_p1 = pnand %p8236_p0, %p7738_p13 }
  0x30   : > { %p7741_p2 = pneg %p7740_p1 }
  0x32   : > { %p7746_p4 = pnand %p7744_p3, %p7741_p2 }
  0x34   : > { %7749 = shalt.err (!%p7746_p4)
}
  0x35   : > { %s7750_s29 = scalar_lea.vmem %s484_s26, 9216  ;;  %p7758_p9 = scmp.lt.s32.totalorder %s484_s26, %s484_s26 }
  0x36   : > { %p7751_p7 = scmp.ne.s32.totalorder %s484_s26, %s7750_s29  ;;  %p7759_p6 = scmp.lt.s32.totalorder %s7750_s29, %s7750_s29 }
  0x38   : > { %p7753_p8 = pnand %p7751_p7, %p8236_p0  ;;  %p7760_p5 = por %p7759_p6, %p7758_p9 }
  0x3a   : > { %p7754_p11 = pneg %p7753_p8 }
  0x3c   : > { %p7761_p10 = pnand %p7760_p5, %p7754_p11 }
  0x3e   : > { %7764 = shalt.err (!%p7761_p10)
}
  0x3f   : > { %s8047_s27 = smov 192   ;;  %s8048_s22 = smov 12  }
  0x40   : > { %7330 = dma.hbm_to_vmem [thread:$0]  (!%p8224_p12), %s9194_s4, 9216, %s484_s26, [#allocation6], %s8047_s27, %s8047_s27, %s8048_s22  }
  0x41   : > { %s8049_s1 = smov [#allocation11]   ;;  %s9196_s10 = sld [smem:[#allocation36_spill]] }
  0x42   : > { %s550_s23 = sshll.u32 %s8049_s1, 4  ;;  %s551_s23 = int_to_ptr.vmem [resolvable:$true] %s550_s23 }
  0x47   : > { %s7765_s17 = scalar_lea.hbm %s9196_s10, 6144 }
  0x48   : > { %p7766_p5 = scmp.ne.s32.totalorder %s9196_s10, %s7765_s17  ;;  %p7772_p10 = scmp.lt.u32.totalorder %s7765_s17, %s9196_s10 }
  0x4a   : > { %p7768_p6 = pnand %p7766_p5, %p8236_p0 }
  0x4c   : > { %p7769_p9 = pneg %p7768_p6 }
  0x4e   : > { %p7774_p13 = pnand %p7772_p10, %p7769_p9 }
  0x50   : > { %7777 = shalt.err (!%p7774_p13)
}
  0x51   : > { %s7778_s26 = scalar_lea.vmem %s522_s21, 6144  ;;  %p7786_p4 = scmp.lt.s32.totalorder %s522_s21, %s522_s21 }
  0x52   : > { %p7779_p1 = scmp.ne.s32.totalorder %s522_s21, %s7778_s26  ;;  %p7787_p7 = scmp.lt.s32.totalorder %s7778_s26, %s7778_s26 }
  0x54   : > { %p7781_p2 = pnand %p7779_p1, %p8236_p0  ;;  %p7788_p8 = por %p7787_p7, %p7786_p4 }
  0x56   : > { %p7782_p3 = pneg %p7781_p2 }
  0x58   : > { %p7789_p11 = pnand %p7788_p8, %p7782_p3 }
  0x5a   : > { %7792 = shalt.err (!%p7789_p11)
}
  0x5b   : > { %s9167_s28 = smov 128   ;;  %s9168_s2 = smov 8  }
  0x5c   : > { %7336 = dma.hbm_to_vmem [thread:$0]  (!%p8224_p12), %s9196_s10, 6144, %s522_s21, [#allocation9], %s9167_s28, %s9167_s28, %s9168_s2  }
  0x5d   : > { %s7793_s22 = scalar_lea.hbm %s9145_s13, 48 }
  0x5e   : > { %p7794_p5 = scmp.ne.s32.totalorder %s9145_s13, %s7793_s22  ;;  %p7800_p10 = scmp.lt.u32.totalorder %s7793_s22, %s9145_s13 }
  0x60   : > { %p7796_p6 = pnand %p7794_p5, %p8236_p0 }
  0x62   : > { %p7797_p9 = pneg %p7796_p6 }
  0x64   : > { %p7802_p13 = pnand %p7800_p10, %p7797_p9 }
  0x66   : > { %7805 = shalt.err (!%p7802_p13)
}
  0x67   : > { %s7806_s29 = scalar_lea.vmem %s551_s23, 48  ;;  %s7813_s21 = scalar_lea.vmem %s551_s23, 64 }
  0x68   : > { %p7807_p1 = scmp.ne.s32.totalorder %s551_s23, %s7806_s29  ;;  %p7814_p4 = scmp.lt.s32.totalorder %s551_s23, %s551_s23 }
  0x69   : > { %p7815_p7 = scmp.lt.s32.totalorder %s7813_s21, %s7806_s29 }
  0x6a   : > { %p7809_p2 = pnand %p7807_p1, %p8236_p0 }
  0x6b   : > { %p7816_p8 = por %p7815_p7, %p7814_p4 }
  0x6c   : > { %p7810_p3 = pneg %p7809_p2 }
  0x6e   : > { %p7817_p11 = pnand %p7816_p8, %p7810_p3 }
  0x70   : > { %7820 = shalt.err (!%p7817_p11)
}
  0x71   : > { %s9170_s26 = smov 16   ;;  %s8053_s11 = smov 1  }
  0x72   : > { %7342 = dma.hbm_to_vmem [thread:$0]  (!%p8224_p12), %s9145_s13, 48, %s551_s23, [#allocation12], %s9170_s26, %s9170_s26, %s8053_s11  }
  0x73   : > { %s8054_s27 = smov [#allocation2]   ;;  %s8055_s18 = smov [#allocation7]  }
  0x74   : > { %s467_s22 = sshll.u32 %s8054_s27, 4  ;;  %s499_s30 = sshll.u32 %s8055_s18, 4  ;;  %s468_s22 = int_to_ptr.vmem [resolvable:$true] %s467_s22  ;;  %s500_s30 = int_to_ptr.vmem [resolvable:$true] %s499_s30 }
  0x75   : > { %s9197_s29 = sld [smem:[#allocation33_spill]] }
  0x7b   : > { %s9198_s21 = smov %s9197_s29  ;;  %s7821_s28 = scalar_lea.hbm %s9197_s29, 2048 }
  0x7c   : > { %p7822_p5 = scmp.ne.s32.totalorder %s9198_s21, %s7821_s28  ;;  %p7828_p10 = scmp.lt.u32.totalorder %s7821_s28, %s9198_s21 }
  0x7e   : > { %p7824_p6 = pnand %p7822_p5, %p8236_p0 }
  0x80   : > { %p7825_p9 = pneg %p7824_p6 }
  0x82   : > { %p7830_p13 = pnand %p7828_p10, %p7825_p9 }
  0x84   : > { %7833 = shalt.err (!%p7830_p13)
}
  0x85   : > { %s7834_s23 = scalar_lea.vmem %s468_s22, 2048  ;;  %p7842_p4 = scmp.lt.s32.totalorder %s468_s22, %s468_s22 }
  0x86   : > { %p7835_p1 = scmp.ne.s32.totalorder %s468_s22, %s7834_s23  ;;  %p7843_p7 = scmp.lt.s32.totalorder %s7834_s23, %s7834_s23 }
  0x88   : > { %p7837_p2 = pnand %p7835_p1, %p8236_p0  ;;  %p7844_p8 = por %p7843_p7, %p7842_p4 }
  0x8a   : > { %p7838_p3 = pneg %p7837_p2 }
  0x8c   : > { %p7845_p11 = pnand %p7844_p8, %p7838_p3 }
  0x8e   : > { %7848 = shalt.err (!%p7845_p11)
}
  0x8f   : > { %s9199_s4 = smov 8   ;;  %s9200_s2 = smov 128  }
  0x90   : > { %7327 = dma.hbm_to_vmem [thread:$0]  (!%p8224_p12), %s9198_s21, 2048, %s468_s22, [#allocation3], %s9200_s2, %s9200_s2, %s9199_s4  }
  0x91   : > { %s7849_s17 = scalar_lea.hbm %s9138_s6, 3072 }
  0x92   : > { %p7850_p5 = scmp.ne.s32.totalorder %s9138_s6, %s7849_s17  ;;  %p7856_p10 = scmp.lt.u32.totalorder %s7849_s17, %s9138_s6 }
  0x94   : > { %p7852_p6 = pnand %p7850_p5, %p8236_p0 }
  0x96   : > { %p7853_p9 = pneg %p7852_p6 }
  0x98   : > { %p7858_p13 = pnand %p7856_p10, %p7853_p9 }
  0x9a   : > { %7861 = shalt.err (!%p7858_p13)
}
  0x9b   : > { %s7862_s29 = scalar_lea.vmem %s500_s30, 3072  ;;  %p7870_p4 = scmp.lt.s32.totalorder %s500_s30, %s500_s30 }
  0x9c   : > { %p7863_p1 = scmp.ne.s32.totalorder %s500_s30, %s7862_s29  ;;  %p7871_p7 = scmp.lt.s32.totalorder %s7862_s29, %s7862_s29 }
  0x9e   : > { %p7865_p2 = pnand %p7863_p1, %p8236_p0  ;;  %p7872_p8 = por %p7871_p7, %p7870_p4 }
  0xa0   : > { %p7866_p3 = pneg %p7865_p2 }
  0xa2   : > { %p7873_p11 = pnand %p7872_p8, %p7866_p3 }
  0xa4   : > { %7876 = shalt.err (!%p7873_p11)
}
  0xa5   : > { %s8056_s22 = smov 64   ;;  %s8057_s23 = smov 4  }
  0xa6   : > { %7333 = dma.hbm_to_vmem [thread:$0]  (!%p8224_p12), %s9138_s6, 3072, %s500_s30, [#allocation6], %s8056_s22, %s8056_s22, %s8057_s23  }
  0xa7   : > { %s8058_s9 = smov [#allocation10]   ;;  %s8059_s28 = smov [#allocation13]  }
  0xa8   : > { %s537_s10 = sshll.u32 %s8058_s9, 4  ;;  %s563_s16 = sshll.u32 %s8059_s28, 4  ;;  %s538_s10 = int_to_ptr.vmem [resolvable:$true] %s537_s10  ;;  %s564_s16 = int_to_ptr.vmem [resolvable:$true] %s563_s16 }
  0xa9   : > { %s7877_s18 = scalar_lea.hbm %s9144_s12, 6144 }
  0xaa   : > { %p7878_p5 = scmp.ne.s32.totalorder %s9144_s12, %s7877_s18  ;;  %p7884_p10 = scmp.lt.u32.totalorder %s7877_s18, %s9144_s12 }
  0xac   : > { %p7880_p6 = pnand %p7878_p5, %p8236_p0 }
  0xae   : > { %p7881_p9 = pneg %p7880_p6 }
  0xb0   : > { %p7886_p13 = pnand %p7884_p10, %p7881_p9 }
  0xb2   : > { %7889 = shalt.err (!%p7886_p13)
}
  0xb3   : > { %s7890_s30 = scalar_lea.vmem %s538_s10, 6144  ;;  %p7898_p4 = scmp.lt.s32.totalorder %s538_s10, %s538_s10 }
  0xb4   : > { %p7891_p1 = scmp.ne.s32.totalorder %s538_s10, %s7890_s30  ;;  %p7899_p7 = scmp.lt.s32.totalorder %s7890_s30, %s7890_s30 }
  0xb6   : > { %p7893_p2 = pnand %p7891_p1, %p8236_p0  ;;  %p7900_p8 = por %p7899_p7, %p7898_p4 }
  0xb8   : > { %p7894_p3 = pneg %p7893_p2 }
  0xba   : > { %p7901_p11 = pnand %p7900_p8, %p7894_p3 }
  0xbc   : > { %7904 = shalt.err (!%p7901_p11)
}
  0xbd   : > { %7339 = dma.hbm_to_vmem [thread:$0]  (!%p8224_p12), %s9144_s12, 6144, %s538_s10, [#allocation9], %s8056_s22, %s8056_s22, %s8057_s23  }
  0xbe   : > { %s7905_s28 = scalar_lea.hbm %s9146_s14, 48 }
  0xbf   : > { %p7906_p5 = scmp.ne.s32.totalorder %s9146_s14, %s7905_s28  ;;  %p7912_p10 = scmp.lt.u32.totalorder %s7905_s28, %s9146_s14 }
  0xc1   : > { %p7908_p6 = pnand %p7906_p5, %p8236_p0 }
  0xc3   : > { %p7909_p9 = pneg %p7908_p6 }
  0xc5   : > { %p7914_p13 = pnand %p7912_p10, %p7909_p9 }
  0xc7   : > { %7917 = shalt.err (!%p7914_p13)
}
  0xc8   : > { %s7918_s20 = scalar_lea.vmem %s564_s16, 48  ;;  %s7925_s22 = scalar_lea.vmem %s564_s16, 64 }
  0xc9   : > { %p7919_p1 = scmp.ne.s32.totalorder %s564_s16, %s7918_s20  ;;  %p7926_p4 = scmp.lt.s32.totalorder %s564_s16, %s564_s16 }
  0xca   : > { %p7927_p7 = scmp.lt.s32.totalorder %s7925_s22, %s7918_s20 }
  0xcb   : > { %p7921_p2 = pnand %p7919_p1, %p8236_p0 }
  0xcc   : > { %p7928_p8 = por %p7927_p7, %p7926_p4 }
  0xcd   : > { %p7922_p3 = pneg %p7921_p2 }
  0xcf   : > { %p7929_p11 = pnand %p7928_p8, %p7922_p3 }
  0xd1   : > { %7932 = shalt.err (!%p7929_p11)
}
  0xd2   : > { %s9201_s23 = smov 16   ;;  %s8060_s30 = smov [#allocation14]  }
  0xd3   : > { %7345 = dma.hbm_to_vmem [thread:$0]  (!%p8224_p12), %s9146_s14, 48, %s564_s16, [#allocation12], %s9201_s23, %s9201_s23, %s8053_s11  }
  0xd4   : > { %s576_s4 = sshll.u32 %s8060_s30, 4  ;;  %s7933_s9 = scalar_lea.hbm %s9147_s15, 48  ;;  %s577_s4 = int_to_ptr.vmem [resolvable:$true] %s576_s4 }
  0xd5   : > { %p7934_p5 = scmp.ne.s32.totalorder %s9147_s15, %s7933_s9  ;;  %p7940_p10 = scmp.lt.u32.totalorder %s7933_s9, %s9147_s15 }
  0xd7   : > { %p7936_p6 = pnand %p7934_p5, %p8236_p0 }
  0xd9   : > { %p7937_p9 = pneg %p7936_p6 }
  0xdb   : > { %p7942_p13 = pnand %p7940_p10, %p7937_p9 }
  0xdd   : > { %7945 = shalt.err (!%p7942_p13)
}
  0xde   : > { %s7946_s16 = scalar_lea.vmem %s577_s4, 48  ;;  %s7953_s1 = scalar_lea.vmem %s577_s4, 64 }
  0xdf   : > { %p7947_p1 = scmp.ne.s32.totalorder %s577_s4, %s7946_s16  ;;  %p7954_p4 = scmp.lt.s32.totalorder %s577_s4, %s577_s4 }
  0xe0   : > { %p7955_p7 = scmp.lt.s32.totalorder %s7953_s1, %s7946_s16 }
  0xe1   : > { %p7949_p2 = pnand %p7947_p1, %p8236_p0 }
  0xe2   : > { %p7956_p8 = por %p7955_p7, %p7954_p4 }
  0xe3   : > { %p7950_p3 = pneg %p7949_p2 }
  0xe5   : > { %p7957_p11 = pnand %p7956_p8, %p7950_p3 }
  0xe7   : > { %7960 = shalt.err (!%p7957_p11)
}
  0xe8   : > { %7348 = dma.hbm_to_vmem [thread:$0]  (!%p8224_p12), %s9147_s15, 48, %s577_s4, [#allocation15], %s9201_s23, %s9201_s23, %s8053_s11  }
  0xe9   : > { %p9202_p5 = scmp.ne.s32.totalorder %s9192_s24, 0 }
  0xea   : > { %p9203_p0 = scmp.eq.s32.totalorder (!%p9202_p5), %s8188_s0, 0 }
  0xeb   : > { %612 = sbr.rel (%p9202_p5) target bundleno = 8599 (0x2197), region = 92 }
  0xf2   : > { %8006 = dma.done.wait (%p9203_p0), [#allocation3], 2048   ;;  %p9204_p6 = pmov %p9203_p0 }
  0xf3   : > { %p9205_p9 = pmov %p9203_p0 }
  0xf4   : > { %8008 = vsyncadd (%p9204_p6), [#allocation3], 4294965248 }
  0xf5   : > { %8010 = dma.done.wait (%p9205_p9), [#allocation6], 12288   ;;  %p9206_p10 = pmov %p9203_p0 }
  0xf6   : > { %p9207_p13 = pmov %p9203_p0 }
  0xf7   : > { %8012 = vsyncadd (%p9206_p10), [#allocation6], 4294955008 }
  0xf8   : > { %8014 = dma.done.wait (%p9207_p13), [#allocation9], 12288   ;;  %p9208_p12 = pmov %p9203_p0 }
  0xf9   : > { %p9209_p1 = pmov %p9203_p0 }
  0xfa   : > { %8016 = vsyncadd (%p9208_p12), [#allocation9], 4294955008 }
  0xfb   : > { %8018 = dma.done.wait (%p9209_p1), [#allocation12], 96   ;;  %p9210_p2 = pmov %p9203_p0 }
  0xfc   : > { %p9211_p3 = pmov %p9203_p0 }
  0xfd   : > { %8020 = vsyncadd (%p9210_p2), [#allocation12], 4294967200 }
  0xfe   : > { %8022 = dma.done.wait (%p9211_p3), [#allocation15], 48   ;;  %p9212_p4 = pmov %p9203_p0 }
  0xff   : > { %p697_p7 = scmp.lt.s32.totalorder %s8188_s0, 1  ;;  %v8061_v0 = vmov 0   ;;  %v8062_v1 = vmov 0.0|0.0   ;;  %s9213_s23 = sld [smem:[#allocation31_spill]]  ;;  %v715_v3 = vld [vmem:[#allocation2] sm:$0xff]  ;;  %v716_v4 = vld [vmem:[#allocation2 + $0x8] sm:$0xff]  ;;  %v707_v42 = vlaneseq }
 0x100   : > { %8024 = vsyncadd (%p9212_p4), [#allocation15], 4294967248  ;;  %7428 = vset.pattern.permute.xlu0 %v8061_v0  ;;  %7266 = vmatprep.subr.bf16.mxu0 %v8062_v1  ;;  %s9214_s4 = sld [smem:[#allocation32_spill]]  ;;  %v717_v5 = vld [vmem:[#allocation2 + $0x10] sm:$0xff]  ;;  %v718_v6 = vld [vmem:[#allocation2 + $0x18] sm:$0xff]  ;;  %vm8063_vm0 = vmmov 0   ;;  %v7267_v9 = vpack.c.bf16 %v716_v4, %v715_v3 }
 0x101   : > { %s698_s24 = scalar_select %p697_p7, %s8188_s0, 1  ;;  %1019 = vmatprep.mubr.bf16.mxu1 %v8061_v0  ;;  %v8064_v7 = vmov 0.0   ;;  %v7270_v10 = vpack.c.bf16 %v718_v6, %v717_v5  ;;  %v719_v11 = vld [vmem:[#allocation2 + $0x20] sm:$0xff]  ;;  %v720_v12 = vld [vmem:[#allocation2 + $0x28] sm:$0xff]  ;;  %v721_v14 = vld [vmem:[#allocation2 + $0x30] sm:$0xff]  ;;  %v708_v43 = vand.u32 127, %v707_v42 }
 0x102   : > { %6979 = vmatprep.mubr.msk.f32.mxu0 %vm8063_vm0, %v8064_v7  ;;  %7268 = vmatpush3.bf16.msra.mxu0 %v7267_v9  ;;  %v7429_v13 = vld [vmem:[#allocation5 + $0x4] ss:$12 sps:$4 sm:$0xff]   ;;  %v7431_v15 = vld [vmem:[#allocation5] ss:$12 sps:$4 sm:$0xff]   ;;  %v7273_v16 = vpack.c.bf16 %v720_v12, %v719_v11  ;;  %v722_v17 = vld [vmem:[#allocation2 + $0x38] sm:$0xff]  ;;  %v8065_v46 = vmov 1.0  }
 0x103   : > { %s6468_s19 = sshll.u32 %s698_s24, 3  ;;  %7269 = vmatprep.subr.bf16.mxu0 %v8062_v1  ;;  %987 = vmatprep.subr.bf16.mxu1 %v7429_v13  ;;  %v7433_v18 = vld [vmem:[#allocation5 + $0x1c] ss:$12 sps:$4 sm:$0xff]   ;;  %v7435_v19 = vld [vmem:[#allocation5 + $0x18] ss:$12 sps:$4 sm:$0xff]   ;;  %v7276_v22 = vpack.c.bf16 %v722_v17, %v721_v14  ;;  %v725_v26 = vld [vmem:[#allocation2 + $0x50] sm:$0xff] }
 0x104   : > { %988 = vmatpush1.bf16.msra.mxu1 %v7431_v15  ;;  %v723_v20 = vld [vmem:[#allocation2 + $0x40] sm:$0xff]  ;;  %v724_v23 = vld [vmem:[#allocation2 + $0x48] sm:$0xff]  ;;  %v7439_v24 = vld [vmem:[#allocation5 + $0x30] ss:$12 sps:$4 sm:$0xff]   ;;  %s8066_s27 = smov 32   ;;  %s8067_s18 = smov 96  }
 0x105   : > { %s700_s10 = scalar_lea.vmem %s9213_s23, %s6468_s19  ;;  %989 = vmatprep.subr.bf16.mxu1 %v7433_v18  ;;  %v7437_v21 = vld [vmem:[#allocation5 + $0x34] ss:$12 sps:$4 sm:$0xff]   ;;  %v7441_v25 = vld [vmem:[#allocation5 + $0x4c] ss:$12 sps:$4 sm:$0xff]   ;;  %v7279_v27 = vpack.c.bf16 %v724_v23, %v723_v20  ;;  %v7445_v30 = vld [vmem:[#allocation5 + $0x64] ss:$12 sps:$4 sm:$0xff]  }
 0x106   : > { %s704_s2 = scalar_lea.vmem %s9214_s4, %s6468_s19  ;;  %v706_v2 = vld [vmem:[%s700_s10] sm:$0xff]  ;;  %7271 = vmatpush3.bf16.msra.mxu0 %v7270_v10  ;;  %v726_v28 = vld [vmem:[#allocation2 + $0x58] sm:$0xff]  ;;  %v727_v31 = vld [vmem:[#allocation2 + $0x60] sm:$0xff]  ;;  %s8068_s16 = smov 64   ;;  %v8069_v18 = vmov 1983009808  }
 0x107   : > { %710 = vperm.xlu0 %7428, %v706_v2   ;;  %v802_v8 = vld [vmem:[%s704_s2] sm:$0xff]  ;;  %7272 = vmatprep.subr.bf16.mxu0 %v8062_v1  ;;  %v728_v32 = vld [vmem:[#allocation2 + $0x68] sm:$0xff]  ;;  %v7282_v33 = vpack.c.bf16 %v726_v28, %v725_v26  ;;  %v730_v37 = vld [vmem:[#allocation2 + $0x78] sm:$0xff]  ;;  %v8070_v20 = vmov 1934713408   ;;  %vm1518_vm2 = vcmask 261120  }
 0x108   : > { %990 = vmatpush1.bf16.msra.mxu1 %v7435_v19  ;;  %v7443_v29 = vld [vmem:[#allocation5 + $0x48] ss:$12 sps:$4 sm:$0xff]   ;;  %v7447_v34 = vld [vmem:[#allocation5 + $0x60] ss:$12 sps:$4 sm:$0xff]   ;;  %v7451_v38 = vld [vmem:[#allocation5 + $0x78] ss:$12 sps:$4 sm:$0xff]   ;;  %v7285_v39 = vpack.c.bf16 %v728_v32, %v727_v31  ;;  %v1081_v19 = vunpack.c.l.s4 %v8069_v18 }
 0x109   : > { %991 = vmatprep.subr.bf16.mxu1 %v7437_v21  ;;  %v7449_v35 = vld [vmem:[#allocation5 + $0x7c] ss:$12 sps:$4 sm:$0xff]   ;;  %v729_v36 = vld [vmem:[#allocation2 + $0x70] sm:$0xff]  ;;  %v7436_v47 = vld [vmem:[#allocation5 + $0x20] ss:$12 sps:$4 sm:$0xff]   ;;  %v1113_v21 = vunpack.c.l.s4 %v8070_v20  ;;  %vm1707_vm3 = vcmask 64512  }
 0x10a   : > { %7274 = vmatpush3.bf16.msra.mxu0 %v7273_v16  ;;  %v7453_v40 = vld [vmem:[#allocation5 + $0x94] ss:$12 sps:$4 sm:$0xff]   ;;  %v7288_v41 = vpack.c.bf16 %v730_v37, %v729_v36  ;;  %v7440_v48 = vld [vmem:[#allocation5 + $0x38] ss:$12 sps:$4 sm:$0xff]   ;;  %v7444_v49 = vld [vmem:[#allocation5 + $0x50] ss:$12 sps:$4 sm:$0xff]  }
 0x10b   : > { %805 = vperm.xlu0 %7428, %v802_v8   ;;  %7275 = vmatprep.subr.bf16.mxu0 %v8062_v1  ;;  %v7432_v44 = vld [vmem:[#allocation5 + $0x8] ss:$12 sps:$4 sm:$0xff]   ;;  %v7452_v51 = vld [vmem:[#allocation5 + $0x80] ss:$12 sps:$4 sm:$0xff]   ;;  %v7455_v52 = vld [vmem:[#allocation5 + $0x90] ss:$12 sps:$4 sm:$0xff]  }
 0x10c   : > { %992 = vmatpush1.bf16.msra.mxu1 %v7439_v24  ;;  %v7448_v50 = vld [vmem:[#allocation5 + $0x68] ss:$12 sps:$4 sm:$0xff]   ;;  %v7456_v53 = vld [vmem:[#allocation5 + $0x98] ss:$12 sps:$4 sm:$0xff]   ;;  %v7460_v56 = vld [vmem:[#allocation5 + $0xb0] ss:$12 sps:$4 sm:$0xff]  }
 0x10d   : > { %993 = vmatprep.subr.bf16.mxu1 %v7441_v25  ;;  %v7457_v54 = vld [vmem:[#allocation5 + $0xac] ss:$12 sps:$4 sm:$0xff]   ;;  %v7459_v55 = vld [vmem:[#allocation5 + $0xa8] ss:$12 sps:$4 sm:$0xff]   ;;  %v8466_v3 = vld [vmem:[%s9137_s5] sm:$0x7]  ;;  %v1114_v25 = vunpack.c.0.s8 %v1113_v21 }
 0x10e   : > { %7277 = vmatpush3.bf16.msra.mxu0 %v7276_v22  ;;  %v731_v57 = vld [vmem:[%s9135_s3] sm:$0xff]  ;;  %v1082_v22 = vunpack.c.0.s8 %v1081_v19  ;;  %vm1759_vm4 = vcmask 1043456   ;;  %vm2090_vm5 = vcmask 523264   ;;  %vm2092_vm6 = vcmask 785408   ;;  %s9215_s11 = sld [smem:[#allocation35_spill]]  ;;  %s9216_s29 = sld [smem:[#allocation37_spill]] }
 0x10f   : > { %7278 = vmatprep.subr.bf16.mxu0 %v8062_v1  ;;  %s9218_s28 = sld [smem:[#allocation38_spill]]  ;;  %s9220_s26 = sld [smem:[#allocation24_spill]] }
 0x110   : > { %994 = vmatpush1.bf16.msra.mxu1 %v7443_v29  ;;  %s9221_s22 = sld [smem:[#allocation39_spill]]  ;;  %s6750_s19 = sshll.u32 %s8188_s0, 7 }
 0x111   : > { %995 = vmatprep.subr.bf16.mxu1 %v7445_v30  ;;  %s9222_s24 = sld [smem:[#allocation29_spill]]  ;;  %s8071_s30 = smov [#allocation16]  }
 0x112   : > { %7280 = vmatpush3.bf16.msra.mxu0 %v7279_v27  ;;  %s7965_s2 = sshll.u32 %s8071_s30, 4  ;;  %s7966_s2 = int_to_ptr.vmem [resolvable:$false] %s7965_s2 }
 0x113   : > { %7281 = vmatprep.subr.bf16.mxu0 %v8062_v1 }
 0x114   : > { %996 = vmatpush1.bf16.msra.mxu1 %v7447_v34  ;;  %s9217_s4 = smov %s9216_s29 }
 0x115   : > { %997 = vmatprep.subr.bf16.mxu1 %v7449_v35  ;;  %s9219_s17 = smov %s9218_s28  ;;  %s694_s9 = sand.u32 1, %s9220_s26  }
 0x116   : > { %7283 = vmatpush3.bf16.msra.mxu0 %v7282_v33  ;;  %s7967_s26 = scalar_lea.vmem %s7966_s2, 256 }
 0x117   : > { %7284 = vmatprep.subr.bf16.mxu0 %v8062_v1  ;;  %p9224_p11 = scmp.ne.s32.totalorder %s9222_s24, 0 }
 0x118   : > { %998 = vmatpush1.bf16.msra.mxu1 %v7451_v38 }
 0x119   : > { %999 = vmatprep.subr.bf16.mxu1 %v7453_v40 }
 0x11a   : > { %7286 = vmatpush3.bf16.msra.mxu0 %v7285_v39 }
 0x11b   : > { %7287 = vmatprep.subr.bf16.mxu0 %v8062_v1  ;;  %v8458_v1 = vshrl.u32 %v707_v42, 7 }
 0x11c   : > { %1000 = vmatpush1.bf16.msra.mxu1 %v7455_v52 }
 0x11d   : > { %1001 = vmatprep.subr.bf16.mxu1 %v7457_v54  ;;  %v8461_v2 = vsub.s32 1, %v8458_v1  ;;  %v8469_v4 = vsub.s32 0, %v8458_v1  ;;  %v8484_v26 = vsub.s32 %v1082_v22, %v8458_v1  ;;  %v8487_v32 = vsub.s32 %v1114_v25, %v8458_v1 }
 0x11e   : > { %7289 = vmatpush3.bf16.msra.mxu0 %v7288_v41 }
 0x11f   : > { %6982 = vmatprep.subr.bf16.mxu0 %v8064_v7  ;;  %v851_v5 = vrot.slane %v8466_v3, %v8461_v2  ;;  %v847_v11 = vrot.slane %v8466_v3, %v8469_v4 }
 0x120   : > { %1002 = vmatpush1.bf16.msra.mxu1 %v7459_v55 }
 0x121   : > { %7002 = vmatprep.subr.bf16.mxu1 %v8064_v7 }
 0x186   : > { %v711_v45 = vpop.permute.xlu0 %710 }
 0x187   : > { %vm712_vm1 = vcmp.eq.s32.totalorder %v711_v45, %v708_v43 }
 0x188   : > { %6980 = vmatmul.mubr.msk.f32.vlgmr.msra.gmra.mrb[0].mxu0 %vm712_vm1, %v8065_v46 }
 0x189   : > { %6983 = vmatpush3.bf16.msra.mxu0 %v7432_v44  ;;  %6998 = vmatprep.mubr.msk.bf16.mxu0 %vm8063_vm0, %v8064_v7 }
 0x18a   : > { %6984 = vmatprep.subr.bf16.mxu0 %v8064_v7  ;;  %v806_v61 = vpop.permute.xlu0 %805 }
 0x18d   : > { %6985 = vmatpush3.bf16.msra.mxu0 %v7436_v47 }
 0x18e   : > { %6986 = vmatprep.subr.bf16.mxu0 %v8064_v7 }
 0x191   : > { %6987 = vmatpush3.bf16.msra.mxu0 %v7440_v48 }
 0x192   : > { %6988 = vmatprep.subr.bf16.mxu0 %v8064_v7 }
 0x195   : > { %6989 = vmatpush3.bf16.msra.mxu0 %v7444_v49 }
 0x196   : > { %6990 = vmatprep.subr.bf16.mxu0 %v8064_v7 }
 0x199   : > { %6991 = vmatpush3.bf16.msra.mxu0 %v7448_v50 }
 0x19a   : > { %6992 = vmatprep.subr.bf16.mxu0 %v8064_v7 }
 0x19d   : > { %6993 = vmatpush3.bf16.msra.mxu0 %v7452_v51 }
 0x19e   : > { %6994 = vmatprep.subr.bf16.mxu0 %v8064_v7 }
 0x1a1   : > { %6995 = vmatpush3.bf16.msra.mxu0 %v7456_v53 }
 0x1a2   : > { %6996 = vmatprep.subr.bf16.mxu0 %v8064_v7 }
 0x1a5   : > { %6997 = vmatpush3.bf16.msra.mxu0 %v7460_v56 }
 0x1a6   : > { %7026 = vmatprep.subr.bf16.mxu0 %v8064_v7 }
 0x25b   : > { %v798_v58 = vpop.f32.mrb[0].mxu0 }
 0x25c   : > { %v799_v59 = vadd.f32 %v798_v58, %v731_v57  ;;  %v6981_v60 = vpop.f32.mrb[1].mxu0 }
 0x25e   : > { %v8450_v62 = vmul.f32 %v806_v61, %v799_v59 }
 0x260   : > { %v809_v63 = vpack.c.bf16 %v8450_v62, %v8450_v62 }
 0x262   : > { %1020 = vmatmul.mubr.bf16.vlgmr.msra.gmra.mrb[0].mxu1 %v809_v63  ;;  %6999 = vmatmul.mubr.bf16.vlgmr.msra.gmra.mrb[4].mxu0 %v809_v63 }
 0x263   : > { %7004 = vmatprep.mubr.msk.bf16.mxu1 %vm8063_vm0, %v8064_v7  ;;  %7028 = vmatprep.mubr.msk.bf16.mxu0 %vm8063_vm0, %v8064_v7 }
 0x335   : > { %v1021_v6 = vpop.f32.mrb[0].mxu1  ;;  %v8473_v8 = vpop.f32.mrb[4].mxu0 }
 0x336   : > { %v1023_v9 = vpop.f32.mrb[1].mxu1  ;;  %v7000_v10 = vpop.f32.mrb[5].mxu0  ;;  %v1022_v17 = vadd.f32 %v1021_v6, %v847_v11 }
 0x337   : > { %v1024_v12 = vadd.f32 %v1023_v9, %v851_v5  ;;  %v1025_v13 = vpop.f32.mrb[2].mxu1  ;;  %v1065_v14 = vpop.f32.mrb[6].mxu0 }
 0x338   : > { %v1026_v15 = vpop.f32.mrb[3].mxu1  ;;  %v7001_v16 = vpop.f32.mrb[7].mxu0 }
 0x339   : > { %1225 = vrot.lane.b32.xlu0 %v1024_v12, %s8066_s27  ;;  %1219 = vrot.lane.b32.xlu1 %v1024_v12, %s8067_s18 }
 0x33d   : > { %1222 = vrot.lane.b32.xlu1 %v1024_v12, %s8068_s16  ;;  %1072 = vrot.lane.b32.xlu0 %v1022_v17, %s8068_s16 }
 0x341   : > { %1069 = vrot.lane.b32.xlu1 %v1022_v17, %s8067_s18 }
 0x345   : > { %1075 = vrot.lane.b32.xlu1 %v1022_v17, %s8066_s27 }
 0x3ab   : > { %v1226_v23 = vpop.permute.xlu0 %1225  ;;  %v1220_v24 = vpop.permute.xlu1 %1219 }
 0x3ac   : > { %v1244_v27 = vcombine.low %v1220_v24, %v1226_v23  ;;  %v1245_v28 = vcombine.high %v1220_v24, %v1226_v23 }
 0x3ae   : > { %v1252_v33 = vrot.slane %v1244_v27, %v8484_v26  ;;  %v1259_v34 = vrot.slane %v1245_v28, %v8484_v26 }
 0x3af   : > { %v1223_v29 = vpop.permute.xlu1 %1222  ;;  %v1073_v42 = vpop.permute.xlu0 %1072 }
 0x3b0   : > { %v1228_v30 = vcombine.low %v1024_v12, %v1223_v29  ;;  %v1229_v31 = vcombine.high %v1024_v12, %v1223_v29  ;;  %v1078_v47 = vcombine.low %v1022_v17, %v1073_v42  ;;  %v1079_v48 = vcombine.high %v1022_v17, %v1073_v42 }
 0x3b2   : > { %v1236_v35 = vrot.slane %v1228_v30, %v8484_v26  ;;  %v1243_v36 = vrot.slane %v1229_v31, %v8484_v26  ;;  %v1086_v60 = vrot.slane %v1078_v47, %v8484_v26  ;;  %v1093_v61 = vrot.slane %v1079_v48, %v8484_v26 }
 0x3b3   : > { %v1070_v37 = vpop.permute.xlu1 %1069 }
 0x3b4   : > { %v1260_v38 = vcombine.low %v1236_v35, %v1252_v33  ;;  %v1261_v39 = vcombine.high %v1236_v35, %v1252_v33  ;;  %v1276_v40 = vcombine.low %v1243_v36, %v1259_v34  ;;  %v1277_v41 = vcombine.high %v1243_v36, %v1259_v34 }
 0x3b6   : > { %v1268_v43 = vrot.slane %v1260_v38, %v8487_v32  ;;  %v1275_v44 = vrot.slane %v1261_v39, %v8487_v32  ;;  %v1284_v45 = vrot.slane %v1276_v40, %v8487_v32  ;;  %v1291_v46 = vrot.slane %v1277_v41, %v8487_v32 }
 0x3b7   : > { %v1076_v49 = vpop.permute.xlu1 %1075 }
 0x3b8   : > { %v1296_v50 = vcombine.low %v1268_v43, %v1275_v44  ;;  %v6498_v51 = vcombine.high %v1268_v43, %v1275_v44  ;;  %v1312_v52 = vcombine.low %v1284_v45, %v1291_v46  ;;  %v6499_v53 = vcombine.high %v1284_v45, %v1291_v46 }
 0x3b9   : > { %v1094_v54 = vcombine.low %v1070_v37, %v1076_v49  ;;  %v1095_v55 = vcombine.high %v1070_v37, %v1076_v49 }
 0x3ba   : > { %v1303_v56 = vrot.slane %v1296_v50, %v8484_v26  ;;  %v1311_v57 = vrot.slane %v6498_v51, %v8484_v26  ;;  %v1319_v58 = vrot.slane %v1312_v52, %v8484_v26  ;;  %v1327_v59 = vrot.slane %v6499_v53, %v8484_v26 }
 0x3bb   : > { %v1102_v63 = vrot.slane %v1094_v54, %v8484_v26  ;;  %v1109_v5 = vrot.slane %v1095_v55, %v8484_v26 }
 0x3bc   : > { %v1328_v6 = vcombine.low %v1303_v56, %v1311_v57  ;;  %v1344_v9 = vcombine.low %v1319_v58, %v1327_v59  ;;  %v1329_v33 = vcombine.high %v1303_v56, %v1311_v57  ;;  %v1345_v37 = vcombine.high %v1319_v58, %v1327_v59 }
 0x3bd   : > { %v1110_v10 = vcombine.low %v1086_v60, %v1102_v63  ;;  %v1111_v11 = vcombine.high %v1086_v60, %v1102_v63  ;;  %v1126_v12 = vcombine.low %v1093_v61, %v1109_v5  ;;  %v1127_v13 = vcombine.high %v1093_v61, %v1109_v5 }
 0x3be   : > { %v1336_v14 = vrot.slane %v1328_v6, %v8487_v32  ;;  %v1352_v15 = vrot.slane %v1344_v9, %v8487_v32  ;;  %v1343_v42 = vrot.slane %v1329_v33, %v8487_v32  ;;  %v1359_v43 = vrot.slane %v1345_v37, %v8487_v32 }
 0x3bf   : > { %v1118_v16 = vrot.slane %v1110_v10, %v8487_v32  ;;  %v1125_v17 = vrot.slane %v1111_v11, %v8487_v32  ;;  %v1134_v18 = vrot.slane %v1126_v12, %v8487_v32  ;;  %v1141_v19 = vrot.slane %v1127_v13, %v8487_v32 }
 0x3c0   : > { %v1360_v20 = vcombine.low %v1336_v14, %v1352_v15  ;;  %v1361_v36 = vcombine.high %v1336_v14, %v1352_v15  ;;  %v1362_v46 = vcombine.low %v1343_v42, %v1359_v43  ;;  %v1363_v55 = vcombine.high %v1343_v42, %v1359_v43 }
 0x3c1   : > { %v1146_v21 = vcombine.low %v1118_v16, %v1125_v17  ;;  %v6496_v22 = vcombine.high %v1118_v16, %v1125_v17  ;;  %v1162_v23 = vcombine.low %v1134_v18, %v1141_v19  ;;  %v6497_v24 = vcombine.high %v1134_v18, %v1141_v19 }
 0x3c2   : > { %v1364_v25 = vpack.c.bf16 %v1360_v20, %v1360_v20  ;;  %v1365_v41 = vpack.c.bf16 %v1361_v36, %v1361_v36  ;;  %v1366_v50 = vpack.c.bf16 %v1362_v46, %v1362_v46  ;;  %v1367_v57 = vpack.c.bf16 %v1363_v55, %v1363_v55 }
 0x3c3   : > { %v1153_v27 = vrot.slane %v1146_v21, %v8484_v26  ;;  %v1161_v28 = vrot.slane %v6496_v22, %v8484_v26  ;;  %v1169_v29 = vrot.slane %v1162_v23, %v8484_v26  ;;  %v1177_v30 = vrot.slane %v6497_v24, %v8484_v26 }
 0x3c4   : > { %v1523_v31 = vsel %vm1518_vm2, %v1364_v25, 0  ;;  %v1569_v45 = vsel %vm1518_vm2, %v1365_v41, 0  ;;  %v1615_v54 = vsel %vm1518_vm2, %v1366_v50, 0  ;;  %v1661_v59 = vsel %vm1518_vm2, %v1367_v57, 0 }
 0x3c5   : > { %v1178_v34 = vcombine.low %v1153_v27, %v1161_v28  ;;  %v1194_v35 = vcombine.low %v1169_v29, %v1177_v30  ;;  %7003 = vmatpush3.bf16.xpose.msra.mxu1 %v1523_v31  ;;  %v1179_v47 = vcombine.high %v1153_v27, %v1161_v28  ;;  %v1195_v48 = vcombine.high %v1169_v29, %v1177_v30 }
 0x3c6   : > { %7008 = vmatprep.subr.bf16.mxu1 %v8064_v7  ;;  %v8544_v22 = vsub.s32 2, %v8458_v1 }
 0x3c7   : > { %v1186_v38 = vrot.slane %v1178_v34, %v8487_v32  ;;  %v1202_v39 = vrot.slane %v1194_v35, %v8487_v32  ;;  %v1193_v52 = vrot.slane %v1179_v47, %v8487_v32  ;;  %v1209_v53 = vrot.slane %v1195_v48, %v8487_v32 }
 0x3c8   : > { %v855_v25 = vrot.slane %v8466_v3, %v8544_v22 }
 0x3c9   : > { %v1210_v40 = vcombine.low %v1186_v38, %v1202_v39  ;;  %v1211_v49 = vcombine.high %v1186_v38, %v1202_v39  ;;  %v1212_v56 = vcombine.low %v1193_v52, %v1209_v53  ;;  %v1213_v60 = vcombine.high %v1193_v52, %v1209_v53 }
 0x3ca   : > { %v1063_v31 = vadd.f32 %v8473_v8, %v855_v25 }
 0x3cb   : > { %v1214_v44 = vpack.c.bf16 %v1210_v40, %v1210_v40  ;;  %v1215_v51 = vpack.c.bf16 %v1211_v49, %v1211_v49  ;;  %v1216_v58 = vpack.c.bf16 %v1212_v56, %v1212_v56  ;;  %v1217_v61 = vpack.c.bf16 %v1213_v60, %v1213_v60 }
 0x3cd   : > { %7005 = vmatmul.mubr.msk.bf16.vlgmr.msra.gmra.mrb[4].mxu1 %vm1518_vm2, %v1214_v44 }
 0x3ce   : > { %7009 = vmatpush3.bf16.xpose.msra.mxu1 %v1569_v45  ;;  %7010 = vmatprep.mubr.msk.bf16.mxu1 %vm8063_vm0, %v8064_v7 }
 0x3cf   : > { %7014 = vmatprep.subr.bf16.mxu1 %v8064_v7 }
 0x3d5   : > { %7011 = vmatmul.mubr.msk.bf16.vlgmr.msra.gmra.mrb[8].mxu1 %vm1518_vm2, %v1215_v51 }
 0x3d6   : > { %7015 = vmatpush3.bf16.xpose.msra.mxu1 %v1615_v54  ;;  %7016 = vmatprep.mubr.msk.bf16.mxu1 %vm8063_vm0, %v8064_v7 }
 0x3d7   : > { %7020 = vmatprep.subr.bf16.mxu1 %v8064_v7 }
 0x3dd   : > { %7017 = vmatmul.mubr.msk.bf16.vlgmr.msra.gmra.mrb[12].mxu1 %vm1518_vm2, %v1216_v58 }
 0x3de   : > { %7021 = vmatpush3.bf16.xpose.msra.mxu1 %v1661_v59  ;;  %7022 = vmatprep.mubr.msk.bf16.mxu1 %vm8063_vm0, %v8064_v7 }
 0x3df   : > { %7032 = vmatprep.subr.bf16.mxu1 %v8064_v7 }
 0x3e5   : > { %7023 = vmatmul.mubr.msk.bf16.vlgmr.msra.gmra.mrb[16].mxu1 %vm1518_vm2, %v1217_v61 }
 0x3e6   : > { %7034 = vmatprep.mubr.msk.bf16.mxu1 %vm8063_vm0, %v8064_v7 }
 0x4a0   : > { %v1559_v63 = vpop.f32.mrb[4].mxu1 }
 0x4a1   : > { %v1703_v5 = vmul.f32 0.17677669, %v1559_v63  ;;  %v7006_v6 = vpop.f32.mrb[5].mxu1 }
 0x4a2   : > { %v1562_v9 = vpop.f32.mrb[6].mxu1 }
 0x4a3   : > { %v7007_v10 = vpop.f32.mrb[7].mxu1  ;;  %v1708_v11 = vsel %vm1707_vm3, %v1703_v5, -inf }
 0x4a4   : > { %1709 = vmax.xlane.f32.xlu0 %v1708_v11 }
 0x4a8   : > { %v1605_v12 = vpop.f32.mrb[8].mxu1 }
 0x4a9   : > { %v1704_v13 = vmul.f32 0.17677669, %v1605_v12  ;;  %v7012_v14 = vpop.f32.mrb[9].mxu1 }
 0x4aa   : > { %v1608_v15 = vpop.f32.mrb[10].mxu1 }
 0x4ab   : > { %v7013_v16 = vpop.f32.mrb[11].mxu1  ;;  %v1711_v17 = vsel %vm1707_vm3, %v1704_v13, -inf }
 0x4ac   : > { %1712 = vmax.xlane.f32.xlu1 %v1711_v17 }
 0x4b0   : > { %v1651_v18 = vpop.f32.mrb[12].mxu1 }
 0x4b1   : > { %v1705_v19 = vmul.f32 0.17677669, %v1651_v18  ;;  %v7018_v20 = vpop.f32.mrb[13].mxu1 }
 0x4b2   : > { %v1654_v21 = vpop.f32.mrb[14].mxu1 }
 0x4b3   : > { %v7019_v23 = vpop.f32.mrb[15].mxu1  ;;  %v1714_v24 = vsel %vm1707_vm3, %v1705_v19, -inf }
 0x4b4   : > { %1715 = vmax.xlane.f32.xlu0 %v1714_v24 }
 0x4b8   : > { %v1697_v27 = vpop.f32.mrb[16].mxu1 }
 0x4b9   : > { %v1706_v28 = vmul.f32 0.17677669, %v1697_v27  ;;  %v7024_v29 = vpop.f32.mrb[17].mxu1 }
 0x4ba   : > { %v1700_v30 = vpop.f32.mrb[18].mxu1 }
 0x4bb   : > { %v7025_v33 = vpop.f32.mrb[19].mxu1  ;;  %v1717_v34 = vsel %vm1707_vm3, %v1706_v28, -inf }
 0x4bc   : > { %1718 = vmax.xlane.f32.xlu0 %v1717_v34 }
 0x4bd   : > { %1369 = vrot.lane.b32.xlu1 %v1063_v31, %s8067_s18 }
 0x531   : > { %v1710_v1 = vpop.xlane.xlu0 %1709 }
 0x532   : > { %v1720_v35 = vsub.f32 %v1703_v5, %v1710_v1 }
 0x534   : > { %v1724_v36 = vmul.f32 1.442695, %v1720_v35 }
 0x536   : > { %7677 = vpow2.f32 %v1724_v36 }
 0x539   : > { %v1713_v37 = vpop.xlane.xlu1 %1712 }
 0x53a   : > { %v1721_v38 = vsub.f32 %v1704_v13, %v1713_v37 }
 0x53c   : > { %v1726_v39 = vmul.f32 1.442695, %v1721_v38 }
 0x53d   : > { %v1370_v52 = vpop.permute.xlu1 %1369 }
 0x53e   : > { %7679 = vpow2.f32 %v1726_v39 }
 0x540   : > { %v8552_v3 = vpop.eup %7677 }
 0x541   : > { %v1732_v40 = vsel %vm1707_vm3, %v8552_v3, 0.0  ;;  %v1716_v42 = vpop.xlane.xlu0 %1715 }
 0x542   : > { %1733 = vadd.xlane.f32.xlu1 %v1732_v40  ;;  %v1722_v43 = vsub.f32 %v1705_v19, %v1716_v42 }
 0x544   : > { %v1728_v44 = vmul.f32 1.442695, %v1722_v43 }
 0x546   : > { %7681 = vpow2.f32 %v1728_v44 }
 0x548   : > { %v8556_v8 = vpop.eup %7679 }
 0x549   : > { %v1735_v41 = vsel %vm1707_vm3, %v8556_v8, 0.0  ;;  %v1719_v45 = vpop.xlane.xlu0 %1718 }
 0x54a   : > { %1736 = vadd.xlane.f32.xlu0 %v1735_v41  ;;  %v1723_v46 = vsub.f32 %v1706_v28, %v1719_v45 }
 0x54c   : > { %v1730_v47 = vmul.f32 1.442695, %v1723_v46 }
 0x54e   : > { %7683 = vpow2.f32 %v1730_v47 }
 0x550   : > { %v8562_v48 = vpop.eup %7681 }
 0x551   : > { %v1738_v49 = vsel %vm1707_vm3, %v8562_v48, 0.0 }
 0x553   : > { %1375 = vrot.lane.b32.xlu1 %v1063_v31, %s8066_s27 }
 0x558   : > { %v8566_v50 = vpop.eup %7683 }
 0x559   : > { %v1741_v51 = vsel %vm1707_vm3, %v8566_v50, 0.0 }
 0x560   : > { %1372 = vrot.lane.b32.xlu0 %v1063_v31, %s8068_s16 }
 0x577   : > { %1739 = vadd.xlane.f32.xlu1 %v1738_v49 }
 0x57f   : > { %1742 = vadd.xlane.f32.xlu0 %v1741_v51 }
 0x5cf   : > { %v1734_v53 = vpop.xlane.xlu1 %1733 }
 0x5d0   : > { %7685 = vrcp.f32 %v1734_v53 }
 0x5d3   : > { %v1376_v54 = vpop.permute.xlu1 %1375 }
 0x5d4   : > { %v1394_v56 = vcombine.low %v1370_v52, %v1376_v54  ;;  %v1395_v57 = vcombine.high %v1370_v52, %v1376_v54 }
 0x5d6   : > { %v1402_v61 = vrot.slane %v1394_v56, %v8484_v26  ;;  %v1409_v63 = vrot.slane %v1395_v57, %v8484_v26 }
 0x5d7   : > { %v1737_v55 = vpop.xlane.xlu0 %1736 }
 0x5d8   : > { %7687 = vrcp.f32 %v1737_v55 }
 0x5db   : > { %v1373_v58 = vpop.permute.xlu0 %1372 }
 0x5dc   : > { %v1378_v59 = vcombine.low %v1063_v31, %v1373_v58  ;;  %v1379_v60 = vcombine.high %v1063_v31, %v1373_v58  ;;  %v7686_v31 = vpop.eup %7685 }
 0x5dd   : > { %v1748_v41 = vmul.f32 %v7686_v31, %v8552_v3 }
 0x5de   : > { %v1386_v5 = vrot.slane %v1378_v59, %v8484_v26  ;;  %v1393_v6 = vrot.slane %v1379_v60, %v8484_v26 }
 0x5df   : > { %v1752_v51 = vpack.c.bf16 %v1748_v41, %v1748_v41 }
 0x5e0   : > { %v1410_v9 = vcombine.low %v1386_v5, %v1402_v61  ;;  %v1411_v10 = vcombine.high %v1386_v5, %v1402_v61  ;;  %v1426_v11 = vcombine.low %v1393_v6, %v1409_v63  ;;  %v1427_v12 = vcombine.high %v1393_v6, %v1409_v63  ;;  %v7461_v61 = vld [vmem:[#allocation7] sm:$0xff]   ;;  %v7462_v63 = vld [vmem:[#allocation7 + $0x8] sm:$0xff]   ;;  %v7464_v5 = vld [vmem:[#allocation7 + $0x18] sm:$0xff]  }
 0x5e1   : > { %v7466_v6 = vld [vmem:[#allocation7 + $0x28] sm:$0xff]  }
 0x5e2   : > { %v1418_v13 = vrot.slane %v1410_v9, %v8487_v32  ;;  %v1425_v14 = vrot.slane %v1411_v10, %v8487_v32  ;;  %v1434_v15 = vrot.slane %v1426_v11, %v8487_v32  ;;  %v1441_v16 = vrot.slane %v1427_v12, %v8487_v32  ;;  %v7688_v36 = vpop.eup %7687 }
 0x5e3   : > { %v1749_v42 = vmul.f32 %v7688_v36, %v8556_v8 }
 0x5e4   : > { %v1446_v17 = vcombine.low %v1418_v13, %v1425_v14  ;;  %v6500_v18 = vcombine.high %v1418_v13, %v1425_v14  ;;  %v1462_v19 = vcombine.low %v1434_v15, %v1441_v16  ;;  %v6501_v20 = vcombine.high %v1434_v15, %v1441_v16 }
 0x5e5   : > { %v1753_v52 = vpack.c.bf16 %v1749_v42, %v1749_v42 }
 0x5e6   : > { %v1453_v21 = vrot.slane %v1446_v17, %v8484_v26  ;;  %v1461_v23 = vrot.slane %v6500_v18, %v8484_v26  ;;  %v1469_v24 = vrot.slane %v1462_v19, %v8484_v26  ;;  %v1477_v25 = vrot.slane %v6501_v20, %v8484_v26 }
 0x5e8   : > { %v1478_v27 = vcombine.low %v1453_v21, %v1461_v23  ;;  %v1494_v28 = vcombine.low %v1469_v24, %v1477_v25  ;;  %v1479_v29 = vcombine.high %v1453_v21, %v1461_v23  ;;  %v1495_v30 = vcombine.high %v1469_v24, %v1477_v25 }
 0x5ea   : > { %v1486_v33 = vrot.slane %v1478_v27, %v8487_v32  ;;  %v1502_v34 = vrot.slane %v1494_v28, %v8487_v32  ;;  %v1493_v1 = vrot.slane %v1479_v29, %v8487_v32  ;;  %v1509_v35 = vrot.slane %v1495_v30, %v8487_v32 }
 0x5ec   : > { %v1510_v37 = vcombine.low %v1486_v33, %v1502_v34  ;;  %v1511_v38 = vcombine.high %v1486_v33, %v1502_v34  ;;  %v1512_v39 = vcombine.low %v1493_v1, %v1509_v35  ;;  %v1513_v40 = vcombine.high %v1493_v1, %v1509_v35  ;;  %v7467_v35 = vld [vmem:[#allocation7 + $0x30] sm:$0xff]  }
 0x5ee   : > { %v1514_v43 = vpack.c.bf16 %v1510_v37, %v1510_v37  ;;  %v1515_v44 = vpack.c.bf16 %v1511_v38, %v1511_v38  ;;  %v1516_v47 = vpack.c.bf16 %v1512_v39, %v1512_v39  ;;  %v1517_v49 = vpack.c.bf16 %v1513_v40, %v1513_v40 }
 0x5f0   : > { %v1761_v45 = vsel %vm1759_vm4, %v1514_v43, 0  ;;  %v1807_v46 = vsel %vm1759_vm4, %v1515_v44, 0  ;;  %v1853_v3 = vsel %vm1759_vm4, %v1516_v47, 0  ;;  %v1899_v8 = vsel %vm1759_vm4, %v1517_v49, 0  ;;  %v7468_v44 = vld [vmem:[#allocation7 + $0x38] sm:$0xff]  }
 0x5f1   : > { %7027 = vmatpush3.bf16.msra.mxu0 %v1761_v45  ;;  %7033 = vmatpush3.bf16.msra.mxu1 %v1807_v46 }
 0x5f2   : > { %7038 = vmatprep.subr.bf16.mxu0 %v8064_v7  ;;  %7044 = vmatprep.subr.bf16.mxu1 %v8064_v7 }
 0x5f4   : > { %7029 = vmatmul.mubr.msk.bf16.vlgmr.msra.gmra.mrb[8].mxu0 %vm1707_vm3, %v1752_v51  ;;  %7035 = vmatmul.mubr.msk.bf16.vlgmr.msra.gmra.mrb[20].mxu1 %vm1707_vm3, %v1753_v52 }
 0x5f5   : > { %7039 = vmatpush3.bf16.msra.mxu0 %v1853_v3  ;;  %7045 = vmatpush3.bf16.msra.mxu1 %v1899_v8 }
 0x5f6   : > { %7040 = vmatprep.mubr.msk.bf16.mxu0 %vm8063_vm0, %v8064_v7  ;;  %7046 = vmatprep.mubr.msk.bf16.mxu1 %vm8063_vm0, %v8064_v7 }
 0x5f7   : > { %7050 = vmatprep.subr.bf16.mxu0 %v8064_v7 }
 0x604   : > { %v1740_v53 = vpop.xlane.xlu1 %1739 }
 0x605   : > { %7689 = vrcp.f32 %v1740_v53 }
 0x60c   : > { %v1743_v54 = vpop.xlane.xlu0 %1742 }
 0x60d   : > { %7691 = vrcp.f32 %v1743_v54 }
 0x60f   : > { %v7690_v55 = vpop.eup %7689 }
 0x610   : > { %v1750_v56 = vmul.f32 %v7690_v55, %v8562_v48  ;;  %v7463_v48 = vld [vmem:[#allocation7 + $0x10] sm:$0xff]  }
 0x612   : > { %v1754_v57 = vpack.c.bf16 %v1750_v56, %v1750_v56 }
 0x614   : > { %7041 = vmatmul.mubr.msk.bf16.vlgmr.msra.gmra.mrb[12].mxu0 %vm1707_vm3, %v1754_v57 }
 0x615   : > { %7066 = vmatprep.mubr.msk.bf16.mxu0 %vm8063_vm0, %v8064_v7  ;;  %7051 = vmatpush3.bf16.msra.mxu0 %v7461_v61 }
 0x616   : > { %7052 = vmatprep.subr.bf16.mxu0 %v8064_v7 }
 0x617   : > { %v7692_v58 = vpop.eup %7691 }
 0x618   : > { %v1751_v59 = vmul.f32 %v7692_v58, %v8566_v50  ;;  %v7465_v50 = vld [vmem:[#allocation7 + $0x20] sm:$0xff]  }
 0x619   : > { %7053 = vmatpush3.bf16.msra.mxu0 %v7462_v63 }
 0x61a   : > { %v1755_v60 = vpack.c.bf16 %v1751_v59, %v1751_v59  ;;  %7054 = vmatprep.subr.bf16.mxu0 %v8064_v7 }
 0x61c   : > { %7047 = vmatmul.mubr.msk.bf16.vlgmr.msra.gmra.mrb[24].mxu1 %vm1707_vm3, %v1755_v60 }
 0x61d   : > { %2376 = vmatprep.mubr.bf16.mxu1 %v8061_v0  ;;  %7055 = vmatpush3.bf16.msra.mxu0 %v7463_v48 }
 0x61e   : > { %7056 = vmatprep.subr.bf16.mxu0 %v8064_v7 }
 0x621   : > { %7057 = vmatpush3.bf16.msra.mxu0 %v7464_v5 }
 0x622   : > { %7058 = vmatprep.subr.bf16.mxu0 %v8064_v7 }
 0x625   : > { %7059 = vmatpush3.bf16.msra.mxu0 %v7465_v50 }
 0x626   : > { %7060 = vmatprep.subr.bf16.mxu0 %v8064_v7 }
 0x629   : > { %7061 = vmatpush3.bf16.msra.mxu0 %v7466_v6 }
 0x62a   : > { %7062 = vmatprep.subr.bf16.mxu0 %v8064_v7 }
 0x62d   : > { %7063 = vmatpush3.bf16.msra.mxu0 %v7467_v35  ;;  %v7481_v35 = vld [vmem:[#allocation8 + $0x40] ss:$8 sps:$4 sm:$0xff]  }
 0x62e   : > { %7064 = vmatprep.subr.bf16.mxu0 %v8064_v7 }
 0x631   : > { %7065 = vmatpush3.bf16.msra.mxu0 %v7468_v44  ;;  %v7495_v44 = vld [vmem:[#allocation10 + $0x48] sm:$0xff]  }
 0x6c7   : > { %v1797_v9 = vpop.f32.mrb[8].mxu0  ;;  %v1843_v10 = vpop.f32.mrb[20].mxu1 }
 0x6c8   : > { %v7030_v11 = vpop.f32.mrb[9].mxu0  ;;  %v7036_v12 = vpop.f32.mrb[21].mxu1 }
 0x6c9   : > { %v1800_v13 = vpop.f32.mrb[10].mxu0  ;;  %v1846_v14 = vpop.f32.mrb[22].mxu1 }
 0x6ca   : > { %v7031_v15 = vpop.f32.mrb[11].mxu0  ;;  %v7037_v16 = vpop.f32.mrb[23].mxu1  ;;  %v6512_v14 = vld [vmem:[%s9139_s7] ss:$0 sm:$0xff] }
 0x6e7   : > { %v1889_v17 = vpop.f32.mrb[12].mxu0 }
 0x6e8   : > { %v1941_v18 = vcombine.low %v1797_v9, %v1889_v17  ;;  %v1942_v19 = vcombine.high %v1797_v9, %v1889_v17  ;;  %v7042_v20 = vpop.f32.mrb[13].mxu0 }
 0x6e9   : > { %v1892_v21 = vpop.f32.mrb[14].mxu0 }
 0x6ea   : > { %v7043_v23 = vpop.f32.mrb[15].mxu0  ;;  %v1949_v30 = vrot.slane %v1941_v18, %v8484_v26  ;;  %v1956_v31 = vrot.slane %v1942_v19, %v8484_v26  ;;  %v7469_v21 = vld [vmem:[#allocation8] ss:$8 sps:$4 sm:$0xff]  }
 0x6eb   : > { %v7471_v23 = vld [vmem:[#allocation8 + $0x4] ss:$8 sps:$4 sm:$0xff]  }
 0x6ec   : > { %2344 = vmatprep.subr.bf16.mxu1 %v7471_v23 }
 0x6ed   : > { %2345 = vmatpush1.bf16.msra.mxu1 %v7469_v21 }
 0x6ef   : > { %v1935_v24 = vpop.f32.mrb[24].mxu1 }
 0x6f0   : > { %v1957_v25 = vcombine.low %v1843_v10, %v1935_v24  ;;  %v1958_v27 = vcombine.high %v1843_v10, %v1935_v24  ;;  %v7048_v28 = vpop.f32.mrb[25].mxu1  ;;  %v7474_v24 = vld [vmem:[#allocation8 + $0x14] ss:$8 sps:$4 sm:$0xff]  }
 0x6f1   : > { %v1938_v29 = vpop.f32.mrb[26].mxu1  ;;  %2346 = vmatprep.subr.bf16.mxu1 %v7474_v24  ;;  %v7475_v28 = vld [vmem:[#allocation8 + $0x20] ss:$8 sps:$4 sm:$0xff]  }
 0x6f2   : > { %v1965_v33 = vrot.slane %v1957_v25, %v8484_v26  ;;  %v1972_v34 = vrot.slane %v1958_v27, %v8484_v26  ;;  %v7049_v1 = vpop.f32.mrb[27].mxu1  ;;  %v7472_v25 = vld [vmem:[#allocation8 + $0x10] ss:$8 sps:$4 sm:$0xff]   ;;  %v7477_v27 = vld [vmem:[#allocation8 + $0x24] ss:$8 sps:$4 sm:$0xff]  }
 0x6f3   : > { %2347 = vmatpush1.bf16.msra.mxu1 %v7472_v25  ;;  %v7483_v1 = vld [vmem:[#allocation8 + $0x44] ss:$8 sps:$4 sm:$0xff]   ;;  %v6539_v25 = vld [vmem:[#allocation11] ss:$0 sm:$0xff] }
 0x6f4   : > { %v1973_v36 = vcombine.low %v1949_v30, %v1965_v33  ;;  %v1974_v37 = vcombine.high %v1949_v30, %v1965_v33  ;;  %v1989_v38 = vcombine.low %v1956_v31, %v1972_v34  ;;  %v1990_v39 = vcombine.high %v1956_v31, %v1972_v34  ;;  %2348 = vmatprep.subr.bf16.mxu1 %v7477_v27  ;;  %v7480_v34 = vld [vmem:[#allocation8 + $0x34] ss:$8 sps:$4 sm:$0xff]  }
 0x6f6   : > { %v1981_v40 = vrot.slane %v1973_v36, %v8487_v32  ;;  %v1988_v41 = vrot.slane %v1974_v37, %v8487_v32  ;;  %v1997_v42 = vrot.slane %v1989_v38, %v8487_v32  ;;  %v2004_v43 = vrot.slane %v1990_v39, %v8487_v32  ;;  %v7486_v36 = vld [vmem:[#allocation8 + $0x54] ss:$8 sps:$4 sm:$0xff]   ;;  %v7484_v37 = vld [vmem:[#allocation8 + $0x50] ss:$8 sps:$4 sm:$0xff]   ;;  %v7489_v38 = vld [vmem:[#allocation8 + $0x64] ss:$8 sps:$4 sm:$0xff]  }
 0x6f7   : > { %2349 = vmatpush1.bf16.msra.mxu1 %v7475_v28  ;;  %v7487_v39 = vld [vmem:[#allocation8 + $0x60] ss:$8 sps:$4 sm:$0xff]  }
 0x6f8   : > { %v2009_v45 = vcombine.low %v1981_v40, %v1988_v41  ;;  %v6510_v46 = vcombine.high %v1981_v40, %v1988_v41  ;;  %v2025_v47 = vcombine.low %v1997_v42, %v2004_v43  ;;  %v6511_v49 = vcombine.high %v1997_v42, %v2004_v43  ;;  %2350 = vmatprep.subr.bf16.mxu1 %v7480_v34  ;;  %v7492_v40 = vld [vmem:[#allocation8 + $0x74] ss:$8 sps:$4 sm:$0xff]   ;;  %v7490_v41 = vld [vmem:[#allocation8 + $0x70] ss:$8 sps:$4 sm:$0xff]   ;;  %v7493_v42 = vld [vmem:[#allocation10 + $0x40] sm:$0xff]  }
 0x6f9   : > { %v7494_v43 = vld [vmem:[#allocation10] sm:$0xff]   ;;  %6804 = vmatprep.subr.bf16.mxu0 %v7493_v42 }
 0x6fa   : > { %v2016_v51 = vrot.slane %v2009_v45, %v8484_v26  ;;  %v2024_v52 = vrot.slane %v6510_v46, %v8484_v26  ;;  %v2032_v3 = vrot.slane %v2025_v47, %v8484_v26  ;;  %v2040_v8 = vrot.slane %v6511_v49, %v8484_v26  ;;  %v7496_v45 = vld [vmem:[#allocation10 + $0x8] sm:$0xff]   ;;  %v7497_v46 = vld [vmem:[#allocation10 + $0x50] sm:$0xff]   ;;  %v7499_v49 = vld [vmem:[#allocation10 + $0x58] sm:$0xff]  }
 0x6fb   : > { %v7498_v47 = vld [vmem:[#allocation10 + $0x10] sm:$0xff]   ;;  %v7509_v34 = vld [vmem:[#allocation5 + $0xc0] ss:$12 sps:$4 sm:$0xff]  }
 0x6fc   : > { %v2042_v53 = vcombine.high %v2016_v51, %v2024_v52  ;;  %v2058_v54 = vcombine.high %v2032_v3, %v2040_v8  ;;  %v2041_v55 = vcombine.low %v2016_v51, %v2024_v52  ;;  %v2057_v56 = vcombine.low %v2032_v3, %v2040_v8  ;;  %v7500_v51 = vld [vmem:[#allocation10 + $0x18] sm:$0xff]   ;;  %v7501_v52 = vld [vmem:[#allocation10 + $0x60] sm:$0xff]   ;;  %v7503_v8 = vld [vmem:[#allocation10 + $0x68] sm:$0xff]  }
 0x6fd   : > { %v7502_v3 = vld [vmem:[#allocation10 + $0x20] sm:$0xff]  }
 0x6fe   : > { %v2056_v57 = vrot.slane %v2042_v53, %v8487_v32  ;;  %v2072_v58 = vrot.slane %v2058_v54, %v8487_v32  ;;  %v2049_v59 = vrot.slane %v2041_v55, %v8487_v32  ;;  %v2065_v60 = vrot.slane %v2057_v56, %v8487_v32  ;;  %v7504_v53 = vld [vmem:[#allocation10 + $0x28] sm:$0xff]  }
 0x700   : > { %v2075_v61 = vcombine.low %v2056_v57, %v2072_v58  ;;  %v2074_v63 = vcombine.high %v2049_v59, %v2065_v60  ;;  %v2076_v48 = vcombine.high %v2056_v57, %v2072_v58  ;;  %v2073_v5 = vcombine.low %v2049_v59, %v2065_v60  ;;  %v6521_v58 = vld [vmem:[%s9140_s8] ss:$0 sm:$0xff] }
 0x701   : > { %v6522_v60 = vld [vmem:[%s9215_s11] ss:$0 sm:$0xff] }
 0x702   : > { %2082 = vrot.lane.b32.xlu1 %v2075_v61, %s8068_s16  ;;  %2078 = vrot.lane.b32.xlu0 %v2074_v63, %s8066_s27 }
 0x706   : > { %2086 = vrot.lane.b32.xlu1 %v2076_v48, %s8067_s18 }
 0x774   : > { %v2083_v50 = vpop.permute.xlu1 %2082  ;;  %v2079_v6 = vpop.permute.xlu0 %2078 }
 0x775   : > { %v2089_v9 = vsel %vm1518_vm2, %v2073_v5, %v2079_v6  ;;  %v7505_v5 = vld [vmem:[#allocation10 + $0x70] sm:$0xff]   ;;  %v7507_v6 = vld [vmem:[#allocation10 + $0x78] sm:$0xff]  }
 0x776   : > { %v2091_v11 = vsel %vm2090_vm5, %v2089_v9, %v2083_v50  ;;  %v7506_v50 = vld [vmem:[#allocation10 + $0x30] sm:$0xff]   ;;  %v7508_v9 = vld [vmem:[#allocation10 + $0x38] sm:$0xff]  }
 0x778   : > { %v2087_v10 = vpop.permute.xlu1 %2086 }
 0x779   : > { %v2093_v12 = vsel %vm2092_vm6, %v2091_v11, %v2087_v10  ;;  %v2252_v10 = vld [vmem:[%s9216_s29] sm:$0x3]  ;;  %s6284_s29 = scalar_lea.sflag [#allocation4], %s694_s9 }
 0x77a   : > { %v2094_v13 = vpack.c.bf16 %v2093_v12, %v2093_v12  ;;  %v2257_v11 = vrot.slane %v2252_v10, %v8469_v4  ;;  %v2261_v12 = vrot.slane %v2252_v10, %v8461_v2 }
 0x77c   : > { %7067 = vmatmul.mubr.bf16.vlgmr.msra.gmra.mrb[16].mxu0 %v2094_v13 }
 0x77d   : > { %6805 = vmatpush3.bf16.msra.mxu0 %v7494_v43 }
 0x77e   : > { %6806 = vmatprep.subr.bf16.mxu0 %v7495_v44  ;;  %v7520_v44 = vld [vmem:[#allocation5 + $0xf8] ss:$12 sps:$4 sm:$0xff]  }
 0x781   : > { %6807 = vmatpush3.bf16.msra.mxu0 %v7496_v45  ;;  %v7523_v45 = vld [vmem:[#allocation5 + $0x10c] ss:$12 sps:$4 sm:$0xff]  }
 0x782   : > { %6808 = vmatprep.subr.bf16.mxu0 %v7497_v46  ;;  %v7521_v46 = vld [vmem:[#allocation5 + $0x108] ss:$12 sps:$4 sm:$0xff]  }
 0x785   : > { %6809 = vmatpush3.bf16.msra.mxu0 %v7498_v47  ;;  %v7524_v47 = vld [vmem:[#allocation5 + $0x110] ss:$12 sps:$4 sm:$0xff]  }
 0x786   : > { %6810 = vmatprep.subr.bf16.mxu0 %v7499_v49  ;;  %v7527_v49 = vld [vmem:[#allocation5 + $0x124] ss:$12 sps:$4 sm:$0xff]  }
 0x789   : > { %6811 = vmatpush3.bf16.msra.mxu0 %v7500_v51  ;;  %v7525_v51 = vld [vmem:[#allocation5 + $0x120] ss:$12 sps:$4 sm:$0xff]  }
 0x78a   : > { %6812 = vmatprep.subr.bf16.mxu0 %v7501_v52  ;;  %v7528_v52 = vld [vmem:[#allocation5 + $0x128] ss:$12 sps:$4 sm:$0xff]  }
 0x78d   : > { %6813 = vmatpush3.bf16.msra.mxu0 %v7502_v3  ;;  %v7531_v3 = vld [vmem:[#allocation5 + $0x13c] ss:$12 sps:$4 sm:$0xff]  }
 0x78e   : > { %6814 = vmatprep.subr.bf16.mxu0 %v7503_v8  ;;  %v7529_v8 = vld [vmem:[#allocation5 + $0x138] ss:$12 sps:$4 sm:$0xff]  }
 0x791   : > { %6815 = vmatpush3.bf16.msra.mxu0 %v7504_v53  ;;  %v7532_v53 = vld [vmem:[#allocation5 + $0x140] ss:$12 sps:$4 sm:$0xff]  }
 0x792   : > { %6816 = vmatprep.subr.bf16.mxu0 %v7505_v5  ;;  %v6556_v5 = vld [vmem:[#allocation13] ss:$0 sm:$0xff] }
 0x795   : > { %6817 = vmatpush3.bf16.msra.mxu0 %v7506_v50 }
 0x796   : > { %6818 = vmatprep.subr.bf16.mxu0 %v7507_v6  ;;  %v6557_v6 = vld [vmem:[#allocation14] ss:$0 sm:$0xff] }
 0x799   : > { %6819 = vmatpush3.bf16.msra.mxu0 %v7508_v9 }
 0x79a   : > { %7070 = vmatprep.subr.bf16.mxu0 %v8064_v7 }
 0x84f   : > { %v2200_v15 = vpop.f32.mrb[16].mxu0 }
 0x850   : > { %v2201_v16 = vadd.f32 %v6512_v14, %v2200_v15  ;;  %v7068_v17 = vpop.f32.mrb[17].mxu0 }
 0x851   : > { %v2203_v18 = vpop.f32.mrb[18].mxu0 }
 0x852   : > { %v7069_v19 = vpop.f32.mrb[19].mxu0  ;;  %v2206_v20 = vadd.f32 %v2201_v16, %v8450_v62  ;;  %v7478_v62 = vld [vmem:[#allocation8 + $0x30] ss:$8 sps:$4 sm:$0xff]  }
 0x853   : > { %2351 = vmatpush1.bf16.msra.mxu1 %v7478_v62  ;;  %v7511_v62 = vld [vmem:[#allocation5 + $0xc4] ss:$12 sps:$4 sm:$0xff]  }
 0x854   : > { %2207 = vadd.xlane.f32.xlu0 %v2206_v20  ;;  %2352 = vmatprep.subr.bf16.mxu1 %v7483_v1  ;;  %v7512_v1 = vld [vmem:[#allocation5 + $0xc8] ss:$12 sps:$4 sm:$0xff]  }
 0x857   : > { %2353 = vmatpush1.bf16.msra.mxu1 %v7481_v35  ;;  %v7515_v35 = vld [vmem:[#allocation5 + $0xdc] ss:$12 sps:$4 sm:$0xff]  }
 0x858   : > { %2354 = vmatprep.subr.bf16.mxu1 %v7486_v36  ;;  %v7516_v36 = vld [vmem:[#allocation5 + $0xe0] ss:$12 sps:$4 sm:$0xff]  }
 0x85b   : > { %2355 = vmatpush1.bf16.msra.mxu1 %v7484_v37  ;;  %v7513_v37 = vld [vmem:[#allocation5 + $0xd8] ss:$12 sps:$4 sm:$0xff]  }
 0x85c   : > { %2356 = vmatprep.subr.bf16.mxu1 %v7489_v38  ;;  %v7519_v38 = vld [vmem:[#allocation5 + $0xf4] ss:$12 sps:$4 sm:$0xff]  }
 0x85f   : > { %2357 = vmatpush1.bf16.msra.mxu1 %v7487_v39  ;;  %v7517_v39 = vld [vmem:[#allocation5 + $0xf0] ss:$12 sps:$4 sm:$0xff]  }
 0x860   : > { %2358 = vmatprep.subr.bf16.mxu1 %v7492_v40 }
 0x863   : > { %2359 = vmatpush1.bf16.msra.mxu1 %v7490_v41 }
 0x864   : > { %2772 = vmatprep.subr.bf16.mxu1 %v7511_v62 }
 0x8e1   : > { %v2208_v29 = vpop.xlane.xlu0 %2207 }
 0x8e2   : > { %v2210_v30 = vmul.f32 0.0078125, %v2208_v29 }
 0x8e4   : > { %v2211_v31 = vsub.f32 %v2206_v20, %v2210_v30 }
 0x8e6   : > { %v2212_v33 = vmul.f32 %v2211_v31, %v2211_v31 }
 0x8e8   : > { %2213 = vadd.xlane.f32.xlu1 %v2212_v33 }
 0x975   : > { %v2214_v54 = vpop.xlane.xlu1 %2213 }
 0x976   : > { %v2215_v55 = vmul.f32 0.0078125, %v2214_v54  ;;  %v7535_v54 = vld [vmem:[#allocation5 + $0x154] ss:$12 sps:$4 sm:$0xff]  }
 0x978   : > { %v2216_v56 = vadd.f32 1e-05, %v2215_v55  ;;  %v7533_v55 = vld [vmem:[#allocation5 + $0x150] ss:$12 sps:$4 sm:$0xff]  }
 0x97a   : > { %7693 = vrsqrt.f32 %v2216_v56  ;;  %v7536_v56 = vld [vmem:[#allocation5 + $0x158] ss:$12 sps:$4 sm:$0xff]  }
 0x984   : > { %v7694_v57 = vpop.eup %7693 }
 0x985   : > { %v2218_v59 = vmul.f32 %v7694_v57, %v2211_v31  ;;  %v7539_v57 = vld [vmem:[#allocation5 + $0x16c] ss:$12 sps:$4 sm:$0xff]  }
 0x987   : > { %v2226_v61 = vmul.f32 %v6521_v58, %v2218_v59  ;;  %v7537_v58 = vld [vmem:[#allocation5 + $0x168] ss:$12 sps:$4 sm:$0xff]   ;;  %v7540_v59 = vld [vmem:[#allocation5 + $0x170] ss:$12 sps:$4 sm:$0xff]  }
 0x989   : > { %v2234_v63 = vadd.f32 %v6522_v60, %v2226_v61 }
 0x98b   : > { %v2235_v48 = vpack.c.bf16 %v2234_v63, %v2234_v63 }
 0x98d   : > { %2377 = vmatmul.mubr.bf16.vlgmr.msra.gmra.mrb[28].mxu1 %v2235_v48 }
 0x98e   : > { %2804 = vmatprep.mubr.bf16.mxu1 %v8061_v0  ;;  %2773 = vmatpush1.bf16.msra.mxu1 %v7509_v34 }
 0x98f   : > { %2774 = vmatprep.subr.bf16.mxu1 %v7515_v35 }
 0x992   : > { %2775 = vmatpush1.bf16.msra.mxu1 %v7513_v37 }
 0x993   : > { %2776 = vmatprep.subr.bf16.mxu1 %v7519_v38 }
 0x996   : > { %2777 = vmatpush1.bf16.msra.mxu1 %v7517_v39 }
 0x997   : > { %2778 = vmatprep.subr.bf16.mxu1 %v7523_v45 }
 0x99a   : > { %2779 = vmatpush1.bf16.msra.mxu1 %v7521_v46 }
 0x99b   : > { %2780 = vmatprep.subr.bf16.mxu1 %v7527_v49 }
 0x99e   : > { %2781 = vmatpush1.bf16.msra.mxu1 %v7525_v51 }
 0x99f   : > { %2782 = vmatprep.subr.bf16.mxu1 %v7531_v3 }
 0x9a2   : > { %2783 = vmatpush1.bf16.msra.mxu1 %v7529_v8 }
 0x9a3   : > { %2784 = vmatprep.subr.bf16.mxu1 %v7535_v54 }
 0x9a6   : > { %2785 = vmatpush1.bf16.msra.mxu1 %v7533_v55 }
 0x9a7   : > { %2786 = vmatprep.subr.bf16.mxu1 %v7539_v57 }
 0x9aa   : > { %2787 = vmatpush1.bf16.msra.mxu1 %v7537_v58 }
 0x9ab   : > { %7090 = vmatprep.subr.bf16.mxu1 %v8064_v7 }
 0xa60   : > { %v2378_v13 = vpop.f32.mrb[28].mxu1 }
 0xa61   : > { %v2379_v14 = vadd.f32 %v2378_v13, %v2257_v11  ;;  %v2380_v15 = vpop.f32.mrb[29].mxu1 }
 0xa62   : > { %v2381_v16 = vadd.f32 %v2380_v15, %v2261_v12  ;;  %v2382_v17 = vpop.f32.mrb[30].mxu1  ;;  %v8676_v12 = vld [vmem:[%s9137_s5 + $0x3] sm:$0x7] }
 0xa63   : > { %v2385_v18 = vmax.f32 %v2379_v14, 0.0  ;;  %v2383_v19 = vpop.f32.mrb[31].mxu1  ;;  %v2636_v13 = vrot.slane %v8676_v12, %v8461_v2 }
 0xa64   : > { %v2386_v20 = vmax.f32 %v2381_v16, 0.0 }
 0xa65   : > { %v2387_v23 = vpack.c.bf16 %v2385_v18, %v2385_v18  ;;  %v2632_v18 = vrot.slane %v8676_v12, %v8469_v4 }
 0xa66   : > { %v2388_v21 = vpack.c.bf16 %v2386_v20, %v2386_v20 }
 0xa68   : > { %2556 = vmatprep.mubr.bf16.mxu0 %v2388_v21 }
 0xa69   : > { %2557 = vmatmul.mubr.bf16.vlgmr.msra.gmra.mrb[20].mxu0 %v2387_v23 }
 0xa6a   : > { %7086 = vmatprep.mubr.msk.bf16.mxu0 %vm8063_vm0, %v8064_v7  ;;  %7071 = vmatpush3.bf16.msra.mxu0 %v7512_v1 }
 0xa6b   : > { %7072 = vmatprep.subr.bf16.mxu0 %v8064_v7 }
 0xa6e   : > { %7073 = vmatpush3.bf16.msra.mxu0 %v7516_v36 }
 0xa6f   : > { %7074 = vmatprep.subr.bf16.mxu0 %v8064_v7 }
 0xa72   : > { %7075 = vmatpush3.bf16.msra.mxu0 %v7520_v44 }
 0xa73   : > { %7076 = vmatprep.subr.bf16.mxu0 %v8064_v7 }
 0xa76   : > { %7077 = vmatpush3.bf16.msra.mxu0 %v7524_v47 }
 0xa77   : > { %7078 = vmatprep.subr.bf16.mxu0 %v8064_v7 }
 0xa7a   : > { %7079 = vmatpush3.bf16.msra.mxu0 %v7528_v52 }
 0xa7b   : > { %7080 = vmatprep.subr.bf16.mxu0 %v8064_v7 }
 0xa7e   : > { %7081 = vmatpush3.bf16.msra.mxu0 %v7532_v53 }
 0xa7f   : > { %7082 = vmatprep.subr.bf16.mxu0 %v8064_v7 }
 0xa82   : > { %7083 = vmatpush3.bf16.msra.mxu0 %v7536_v56 }
 0xa83   : > { %7084 = vmatprep.subr.bf16.mxu0 %v8064_v7 }
 0xa86   : > { %7085 = vmatpush3.bf16.msra.mxu0 %v7540_v59 }
 0xa87   : > { %7114 = vmatprep.subr.bf16.mxu0 %v8064_v7 }
 0xb3c   : > { %v6820_v24 = vpop.f32.mrb[20].mxu0 }
 0xb3d   : > { %v6821_v27 = vpop.f32.mrb[21].mxu0 }
 0xb3e   : > { %v6822_v28 = vadd.f32 %v6821_v27, %v6820_v24  ;;  %v6823_v29 = vpop.f32.mrb[22].mxu0 }
 0xb3f   : > { %v6824_v30 = vpop.f32.mrb[23].mxu0 }
 0xb40   : > { %v2559_v31 = vadd.f32 %v6822_v28, %v6539_v25 }
 0xb42   : > { %v2564_v33 = vadd.f32 %v2559_v31, %v2234_v63 }
 0xb44   : > { %2565 = vadd.xlane.f32.xlu0 %v2564_v33 }
 0xbd1   : > { %v2566_v40 = vpop.xlane.xlu0 %2565 }
 0xbd2   : > { %v2567_v41 = vmul.f32 0.0078125, %v2566_v40 }
 0xbd4   : > { %v2568_v42 = vsub.f32 %v2564_v33, %v2567_v41 }
 0xbd6   : > { %v2569_v43 = vmul.f32 %v2568_v42, %v2568_v42 }
 0xbd8   : > { %2570 = vadd.xlane.f32.xlu0 %v2569_v43 }
 0xc65   : > { %v2571_v60 = vpop.xlane.xlu0 %2570 }
 0xc66   : > { %v2572_v61 = vmul.f32 0.0078125, %v2571_v60 }
 0xc68   : > { %v2573_v63 = vadd.f32 1e-05, %v2572_v61 }
 0xc6a   : > { %7695 = vrsqrt.f32 %v2573_v63 }
 0xc74   : > { %v7696_v48 = vpop.eup %7695 }
 0xc75   : > { %v2575_v50 = vmul.f32 %v7696_v48, %v2568_v42 }
 0xc77   : > { %v2583_v9 = vmul.f32 %v6556_v5, %v2575_v50 }
 0xc79   : > { %v8665_v10 = vadd.f32 %v6557_v6, %v2583_v9 }
 0xc7b   : > { %v2592_v11 = vpack.c.bf16 %v8665_v10, %v8665_v10 }
 0xc7d   : > { %2805 = vmatmul.mubr.bf16.vlgmr.msra.gmra.mrb[32].mxu1 %v2592_v11  ;;  %7087 = vmatmul.mubr.bf16.vlgmr.msra.gmra.mrb[24].mxu0 %v2592_v11 }
 0xc7e   : > { %7092 = vmatprep.mubr.msk.bf16.mxu1 %vm8063_vm0, %v8064_v7  ;;  %7116 = vmatprep.mubr.msk.bf16.mxu0 %vm8063_vm0, %v8064_v7 }
 0xd50   : > { %v2806_v14 = vpop.f32.mrb[32].mxu1  ;;  %v8680_v15 = vpop.f32.mrb[24].mxu0 }
 0xd51   : > { %v2808_v16 = vpop.f32.mrb[33].mxu1  ;;  %v7088_v17 = vpop.f32.mrb[25].mxu0  ;;  %v2807_v25 = vadd.f32 %v2806_v14, %v2632_v18 }
 0xd52   : > { %v2809_v19 = vadd.f32 %v2808_v16, %v2636_v13  ;;  %v2810_v20 = vpop.f32.mrb[34].mxu1  ;;  %v2850_v21 = vpop.f32.mrb[26].mxu0 }
 0xd53   : > { %v2811_v23 = vpop.f32.mrb[35].mxu1  ;;  %v7089_v24 = vpop.f32.mrb[27].mxu0 }
 0xd54   : > { %3007 = vrot.lane.b32.xlu0 %v2809_v19, %s8068_s16  ;;  %3004 = vrot.lane.b32.xlu1 %v2809_v19, %s8067_s18 }
 0xd58   : > { %3010 = vrot.lane.b32.xlu1 %v2809_v19, %s8066_s27  ;;  %2857 = vrot.lane.b32.xlu0 %v2807_v25, %s8068_s16 }
 0xd5c   : > { %2854 = vrot.lane.b32.xlu1 %v2807_v25, %s8067_s18 }
 0xd60   : > { %2860 = vrot.lane.b32.xlu1 %v2807_v25, %s8066_s27 }
 0xdc6   : > { %v3008_v27 = vpop.permute.xlu0 %3007  ;;  %v3005_v28 = vpop.permute.xlu1 %3004 }
 0xdc7   : > { %v3013_v29 = vcombine.low %v2809_v19, %v3008_v27  ;;  %v3014_v30 = vcombine.high %v2809_v19, %v3008_v27 }
 0xdc9   : > { %v3021_v62 = vrot.slane %v3013_v29, %v8484_v26  ;;  %v3028_v1 = vrot.slane %v3014_v30, %v8484_v26 }
 0xdca   : > { %v3011_v31 = vpop.permute.xlu1 %3010  ;;  %v2858_v42 = vpop.permute.xlu0 %2857 }
 0xdcb   : > { %v3029_v33 = vcombine.low %v3005_v28, %v3011_v31  ;;  %v3030_v34 = vcombine.high %v3005_v28, %v3011_v31  ;;  %v2863_v47 = vcombine.low %v2807_v25, %v2858_v42  ;;  %v2864_v49 = vcombine.high %v2807_v25, %v2858_v42 }
 0xdcd   : > { %v3037_v35 = vrot.slane %v3029_v33, %v8484_v26  ;;  %v3044_v36 = vrot.slane %v3030_v34, %v8484_v26  ;;  %v2871_v60 = vrot.slane %v2863_v47, %v8484_v26  ;;  %v2878_v61 = vrot.slane %v2864_v49, %v8484_v26 }
 0xdce   : > { %v2855_v37 = vpop.permute.xlu1 %2854 }
 0xdcf   : > { %v3045_v38 = vcombine.low %v3021_v62, %v3037_v35  ;;  %v3046_v39 = vcombine.high %v3021_v62, %v3037_v35  ;;  %v3061_v40 = vcombine.low %v3028_v1, %v3044_v36  ;;  %v3062_v41 = vcombine.high %v3028_v1, %v3044_v36 }
 0xdd1   : > { %v3053_v43 = vrot.slane %v3045_v38, %v8487_v32  ;;  %v3060_v44 = vrot.slane %v3046_v39, %v8487_v32  ;;  %v3069_v45 = vrot.slane %v3061_v40, %v8487_v32  ;;  %v3076_v46 = vrot.slane %v3062_v41, %v8487_v32 }
 0xdd2   : > { %v2861_v51 = vpop.permute.xlu1 %2860 }
 0xdd3   : > { %v3081_v52 = vcombine.low %v3053_v43, %v3060_v44  ;;  %v6585_v3 = vcombine.high %v3053_v43, %v3060_v44  ;;  %v3097_v8 = vcombine.low %v3069_v45, %v3076_v46  ;;  %v6586_v53 = vcombine.high %v3069_v45, %v3076_v46 }
 0xdd4   : > { %v2879_v54 = vcombine.low %v2855_v37, %v2861_v51  ;;  %v2880_v55 = vcombine.high %v2855_v37, %v2861_v51 }
 0xdd5   : > { %v3088_v56 = vrot.slane %v3081_v52, %v8484_v26  ;;  %v3096_v57 = vrot.slane %v6585_v3, %v8484_v26  ;;  %v3104_v58 = vrot.slane %v3097_v8, %v8484_v26  ;;  %v3112_v59 = vrot.slane %v6586_v53, %v8484_v26 }
 0xdd6   : > { %v2887_v63 = vrot.slane %v2879_v54, %v8484_v26  ;;  %v2894_v48 = vrot.slane %v2880_v55, %v8484_v26 }
 0xdd7   : > { %v3113_v5 = vcombine.low %v3088_v56, %v3096_v57  ;;  %v3129_v50 = vcombine.low %v3104_v58, %v3112_v59  ;;  %v3114_v62 = vcombine.high %v3088_v56, %v3096_v57  ;;  %v3130_v37 = vcombine.high %v3104_v58, %v3112_v59 }
 0xdd8   : > { %v2895_v6 = vcombine.low %v2871_v60, %v2887_v63  ;;  %v2896_v9 = vcombine.high %v2871_v60, %v2887_v63  ;;  %v2911_v11 = vcombine.low %v2878_v61, %v2894_v48  ;;  %v2912_v13 = vcombine.high %v2878_v61, %v2894_v48 }
 0xdd9   : > { %v3121_v14 = vrot.slane %v3113_v5, %v8487_v32  ;;  %v3137_v16 = vrot.slane %v3129_v50, %v8487_v32  ;;  %v3128_v42 = vrot.slane %v3114_v62, %v8487_v32  ;;  %v3144_v43 = vrot.slane %v3130_v37, %v8487_v32 }
 0xdda   : > { %v2903_v17 = vrot.slane %v2895_v6, %v8487_v32  ;;  %v2910_v18 = vrot.slane %v2896_v9, %v8487_v32  ;;  %v2919_v19 = vrot.slane %v2911_v11, %v8487_v32  ;;  %v2926_v20 = vrot.slane %v2912_v13, %v8487_v32 }
 0xddb   : > { %v3145_v21 = vcombine.low %v3121_v14, %v3137_v16  ;;  %v3146_v36 = vcombine.high %v3121_v14, %v3137_v16  ;;  %v3147_v46 = vcombine.low %v3128_v42, %v3144_v43  ;;  %v3148_v55 = vcombine.high %v3128_v42, %v3144_v43 }
 0xddc   : > { %v2931_v23 = vcombine.low %v2903_v17, %v2910_v18  ;;  %v6583_v24 = vcombine.high %v2903_v17, %v2910_v18  ;;  %v2947_v25 = vcombine.low %v2919_v19, %v2926_v20  ;;  %v6584_v27 = vcombine.high %v2919_v19, %v2926_v20 }
 0xddd   : > { %v3149_v28 = vpack.c.bf16 %v3145_v21, %v3145_v21  ;;  %v3150_v41 = vpack.c.bf16 %v3146_v36, %v3146_v36  ;;  %v3151_v52 = vpack.c.bf16 %v3147_v46, %v3147_v46  ;;  %v3152_v57 = vpack.c.bf16 %v3148_v55, %v3148_v55 }
 0xdde   : > { %v2938_v29 = vrot.slane %v2931_v23, %v8484_v26  ;;  %v2946_v30 = vrot.slane %v6583_v24, %v8484_v26  ;;  %v2954_v31 = vrot.slane %v2947_v25, %v8484_v26  ;;  %v2962_v33 = vrot.slane %v6584_v27, %v8484_v26 }
 0xddf   : > { %v3307_v34 = vsel %vm1518_vm2, %v3149_v28, 0  ;;  %v3353_v45 = vsel %vm1518_vm2, %v3150_v41, 0  ;;  %v3399_v54 = vsel %vm1518_vm2, %v3151_v52, 0  ;;  %v3445_v59 = vsel %vm1518_vm2, %v3152_v57, 0 }
 0xde0   : > { %v2963_v1 = vcombine.low %v2938_v29, %v2946_v30  ;;  %v2979_v35 = vcombine.low %v2954_v31, %v2962_v33  ;;  %7091 = vmatpush3.bf16.xpose.msra.mxu1 %v3307_v34  ;;  %v2964_v47 = vcombine.high %v2938_v29, %v2946_v30  ;;  %v2980_v49 = vcombine.high %v2954_v31, %v2962_v33 }
 0xde1   : > { %7096 = vmatprep.subr.bf16.mxu1 %v8064_v7  ;;  %v2640_v27 = vrot.slane %v8676_v12, %v8544_v22 }
 0xde2   : > { %v2971_v38 = vrot.slane %v2963_v1, %v8487_v32  ;;  %v2987_v39 = vrot.slane %v2979_v35, %v8487_v32  ;;  %v2978_v8 = vrot.slane %v2964_v47, %v8487_v32  ;;  %v2994_v53 = vrot.slane %v2980_v49, %v8487_v32 }
 0xde3   : > { %v2848_v33 = vadd.f32 %v8680_v15, %v2640_v27 }
 0xde4   : > { %v2995_v40 = vcombine.low %v2971_v38, %v2987_v39  ;;  %v2996_v51 = vcombine.high %v2971_v38, %v2987_v39  ;;  %v2997_v56 = vcombine.low %v2978_v8, %v2994_v53  ;;  %v2998_v60 = vcombine.high %v2978_v8, %v2994_v53 }
 0xde6   : > { %v2999_v44 = vpack.c.bf16 %v2995_v40, %v2995_v40  ;;  %v3000_v3 = vpack.c.bf16 %v2996_v51, %v2996_v51  ;;  %v3001_v58 = vpack.c.bf16 %v2997_v56, %v2997_v56  ;;  %v3002_v61 = vpack.c.bf16 %v2998_v60, %v2998_v60 }
 0xde8   : > { %7093 = vmatmul.mubr.msk.bf16.vlgmr.msra.gmra.mrb[36].mxu1 %vm1518_vm2, %v2999_v44 }
 0xde9   : > { %7097 = vmatpush3.bf16.xpose.msra.mxu1 %v3353_v45  ;;  %7098 = vmatprep.mubr.msk.bf16.mxu1 %vm8063_vm0, %v8064_v7 }
 0xdea   : > { %7102 = vmatprep.subr.bf16.mxu1 %v8064_v7 }
 0xdf0   : > { %7099 = vmatmul.mubr.msk.bf16.vlgmr.msra.gmra.mrb[40].mxu1 %vm1518_vm2, %v3000_v3 }
 0xdf1   : > { %7103 = vmatpush3.bf16.xpose.msra.mxu1 %v3399_v54  ;;  %7104 = vmatprep.mubr.msk.bf16.mxu1 %vm8063_vm0, %v8064_v7 }
 0xdf2   : > { %7108 = vmatprep.subr.bf16.mxu1 %v8064_v7 }
 0xdf8   : > { %7105 = vmatmul.mubr.msk.bf16.vlgmr.msra.gmra.mrb[44].mxu1 %vm1518_vm2, %v3001_v58 }
 0xdf9   : > { %7109 = vmatpush3.bf16.xpose.msra.mxu1 %v3445_v59  ;;  %7110 = vmatprep.mubr.msk.bf16.mxu1 %vm8063_vm0, %v8064_v7 }
 0xdfa   : > { %7120 = vmatprep.subr.bf16.mxu1 %v8064_v7 }
 0xe00   : > { %7111 = vmatmul.mubr.msk.bf16.vlgmr.msra.gmra.mrb[48].mxu1 %vm1518_vm2, %v3002_v61 }
 0xe01   : > { %7122 = vmatprep.mubr.msk.bf16.mxu1 %vm8063_vm0, %v8064_v7 }
 0xebb   : > { %v3343_v63 = vpop.f32.mrb[36].mxu1 }
 0xebc   : > { %v3487_v48 = vmul.f32 0.17677669, %v3343_v63  ;;  %v7094_v5 = vpop.f32.mrb[37].mxu1 }
 0xebd   : > { %v3346_v50 = vpop.f32.mrb[38].mxu1 }
 0xebe   : > { %v7095_v6 = vpop.f32.mrb[39].mxu1  ;;  %v3491_v9 = vsel %vm1707_vm3, %v3487_v48, -inf }
 0xebf   : > { %3492 = vmax.xlane.f32.xlu0 %v3491_v9 }
 0xec3   : > { %v3389_v11 = vpop.f32.mrb[40].mxu1 }
 0xec4   : > { %v3488_v13 = vmul.f32 0.17677669, %v3389_v11  ;;  %v7100_v14 = vpop.f32.mrb[41].mxu1 }
 0xec5   : > { %v3392_v16 = vpop.f32.mrb[42].mxu1 }
 0xec6   : > { %v7101_v17 = vpop.f32.mrb[43].mxu1  ;;  %v3494_v18 = vsel %vm1707_vm3, %v3488_v13, -inf }
 0xec7   : > { %3495 = vmax.xlane.f32.xlu1 %v3494_v18 }
 0xecb   : > { %v3435_v19 = vpop.f32.mrb[44].mxu1 }
 0xecc   : > { %v3489_v20 = vmul.f32 0.17677669, %v3435_v19  ;;  %v7106_v21 = vpop.f32.mrb[45].mxu1 }
 0xecd   : > { %v3438_v23 = vpop.f32.mrb[46].mxu1 }
 0xece   : > { %v7107_v24 = vpop.f32.mrb[47].mxu1  ;;  %v3497_v25 = vsel %vm1707_vm3, %v3489_v20, -inf }
 0xecf   : > { %3498 = vmax.xlane.f32.xlu0 %v3497_v25 }
 0xed3   : > { %v3481_v28 = vpop.f32.mrb[48].mxu1 }
 0xed4   : > { %v3490_v29 = vmul.f32 0.17677669, %v3481_v28  ;;  %v7112_v30 = vpop.f32.mrb[49].mxu1 }
 0xed5   : > { %v3484_v31 = vpop.f32.mrb[50].mxu1 }
 0xed6   : > { %v7113_v34 = vpop.f32.mrb[51].mxu1  ;;  %v3500_v62 = vsel %vm1707_vm3, %v3490_v29, -inf }
 0xed7   : > { %3501 = vmax.xlane.f32.xlu0 %v3500_v62 }
 0xed8   : > { %3154 = vrot.lane.b32.xlu1 %v2848_v33, %s8067_s18 }
 0xf4c   : > { %v3493_v1 = vpop.xlane.xlu0 %3492 }
 0xf4d   : > { %v3503_v35 = vsub.f32 %v3487_v48, %v3493_v1 }
 0xf4f   : > { %v3507_v36 = vmul.f32 1.442695, %v3503_v35 }
 0xf51   : > { %7697 = vpow2.f32 %v3507_v36 }
 0xf54   : > { %v3496_v37 = vpop.xlane.xlu1 %3495 }
 0xf55   : > { %v3504_v38 = vsub.f32 %v3488_v13, %v3496_v37 }
 0xf57   : > { %v3509_v39 = vmul.f32 1.442695, %v3504_v38 }
 0xf58   : > { %v3155_v8 = vpop.permute.xlu1 %3154 }
 0xf59   : > { %7699 = vpow2.f32 %v3509_v39 }
 0xf5b   : > { %v8750_v12 = vpop.eup %7697 }
 0xf5c   : > { %v3515_v40 = vsel %vm1707_vm3, %v8750_v12, 0.0  ;;  %v3499_v42 = vpop.xlane.xlu0 %3498 }
 0xf5d   : > { %3516 = vadd.xlane.f32.xlu1 %v3515_v40  ;;  %v3505_v43 = vsub.f32 %v3489_v20, %v3499_v42 }
 0xf5f   : > { %v3511_v44 = vmul.f32 1.442695, %v3505_v43 }
 0xf61   : > { %7701 = vpow2.f32 %v3511_v44 }
 0xf63   : > { %v8754_v15 = vpop.eup %7699 }
 0xf64   : > { %v3518_v41 = vsel %vm1707_vm3, %v8754_v15, 0.0  ;;  %v3502_v45 = vpop.xlane.xlu0 %3501 }
 0xf65   : > { %3519 = vadd.xlane.f32.xlu0 %v3518_v41  ;;  %v3506_v46 = vsub.f32 %v3490_v29, %v3502_v45 }
 0xf67   : > { %v3513_v47 = vmul.f32 1.442695, %v3506_v46 }
 0xf69   : > { %7703 = vpow2.f32 %v3513_v47 }
 0xf6b   : > { %v8760_v49 = vpop.eup %7701 }
 0xf6c   : > { %v3521_v51 = vsel %vm1707_vm3, %v8760_v49, 0.0 }
 0xf6e   : > { %3160 = vrot.lane.b32.xlu1 %v2848_v33, %s8066_s27 }
 0xf73   : > { %v8764_v52 = vpop.eup %7703 }
 0xf74   : > { %v3524_v3 = vsel %vm1707_vm3, %v8764_v52, 0.0 }
 0xf7b   : > { %3157 = vrot.lane.b32.xlu0 %v2848_v33, %s8068_s16 }
 0xf92   : > { %3522 = vadd.xlane.f32.xlu1 %v3521_v51 }
 0xf9a   : > { %3525 = vadd.xlane.f32.xlu0 %v3524_v3 }
 0xfea   : > { %v3517_v53 = vpop.xlane.xlu1 %3516 }
 0xfeb   : > { %7705 = vrcp.f32 %v3517_v53 }
 0xfee   : > { %v3161_v54 = vpop.permute.xlu1 %3160 }
 0xfef   : > { %v3179_v56 = vcombine.low %v3155_v8, %v3161_v54  ;;  %v3180_v57 = vcombine.high %v3155_v8, %v3161_v54 }
 0xff1   : > { %v3187_v61 = vrot.slane %v3179_v56, %v8484_v26  ;;  %v3194_v63 = vrot.slane %v3180_v57, %v8484_v26 }
 0xff2   : > { %v3520_v55 = vpop.xlane.xlu0 %3519 }
 0xff3   : > { %7707 = vrcp.f32 %v3520_v55 }
 0xff6   : > { %v3158_v58 = vpop.permute.xlu0 %3157 }
 0xff7   : > { %v3163_v59 = vcombine.low %v2848_v33, %v3158_v58  ;;  %v3164_v60 = vcombine.high %v2848_v33, %v3158_v58  ;;  %v7706_v33 = vpop.eup %7705 }
 0xff8   : > { %v3531_v41 = vmul.f32 %v7706_v33, %v8750_v12 }
 0xff9   : > { %v3171_v48 = vrot.slane %v3163_v59, %v8484_v26  ;;  %v3178_v5 = vrot.slane %v3164_v60, %v8484_v26 }
 0xffa   : > { %v3535_v3 = vpack.c.bf16 %v3531_v41, %v3531_v41 }
 0xffb   : > { %v3195_v50 = vcombine.low %v3171_v48, %v3187_v61  ;;  %v3196_v6 = vcombine.high %v3171_v48, %v3187_v61  ;;  %v3211_v9 = vcombine.low %v3178_v5, %v3194_v63  ;;  %v3212_v11 = vcombine.high %v3178_v5, %v3194_v63  ;;  %v7541_v61 = vld [vmem:[#allocation7 + $0x40] sm:$0xff]   ;;  %v7542_v63 = vld [vmem:[#allocation7 + $0x48] sm:$0xff]   ;;  %v7544_v48 = vld [vmem:[#allocation7 + $0x58] sm:$0xff]  }
 0xffc   : > { %v7546_v5 = vld [vmem:[#allocation7 + $0x68] sm:$0xff]  }
 0xffd   : > { %v3203_v13 = vrot.slane %v3195_v50, %v8487_v32  ;;  %v3210_v14 = vrot.slane %v3196_v6, %v8487_v32  ;;  %v3219_v16 = vrot.slane %v3211_v9, %v8487_v32  ;;  %v3226_v17 = vrot.slane %v3212_v11, %v8487_v32  ;;  %v7708_v36 = vpop.eup %7707 }
 0xffe   : > { %v3532_v42 = vmul.f32 %v7708_v36, %v8754_v15 }
 0xfff   : > { %v3231_v18 = vcombine.low %v3203_v13, %v3210_v14  ;;  %v6587_v19 = vcombine.high %v3203_v13, %v3210_v14  ;;  %v3247_v20 = vcombine.low %v3219_v16, %v3226_v17  ;;  %v6588_v21 = vcombine.high %v3219_v16, %v3226_v17 }
0x1000   : > { %v3536_v8 = vpack.c.bf16 %v3532_v42, %v3532_v42 }
0x1001   : > { %v3238_v23 = vrot.slane %v3231_v18, %v8484_v26  ;;  %v3246_v24 = vrot.slane %v6587_v19, %v8484_v26  ;;  %v3254_v25 = vrot.slane %v3247_v20, %v8484_v26  ;;  %v3262_v27 = vrot.slane %v6588_v21, %v8484_v26 }
0x1003   : > { %v3263_v28 = vcombine.low %v3238_v23, %v3246_v24  ;;  %v3279_v29 = vcombine.low %v3254_v25, %v3262_v27  ;;  %v3264_v30 = vcombine.high %v3238_v23, %v3246_v24  ;;  %v3280_v31 = vcombine.high %v3254_v25, %v3262_v27 }
0x1005   : > { %v3271_v34 = vrot.slane %v3263_v28, %v8487_v32  ;;  %v3287_v62 = vrot.slane %v3279_v29, %v8487_v32  ;;  %v3278_v1 = vrot.slane %v3264_v30, %v8487_v32  ;;  %v3294_v35 = vrot.slane %v3280_v31, %v8487_v32 }
0x1007   : > { %v3295_v37 = vcombine.low %v3271_v34, %v3287_v62  ;;  %v3296_v38 = vcombine.high %v3271_v34, %v3287_v62  ;;  %v3297_v39 = vcombine.low %v3278_v1, %v3294_v35  ;;  %v3298_v40 = vcombine.high %v3278_v1, %v3294_v35  ;;  %v7547_v35 = vld [vmem:[#allocation7 + $0x70] sm:$0xff]  }
0x1009   : > { %v3299_v43 = vpack.c.bf16 %v3295_v37, %v3295_v37  ;;  %v3300_v44 = vpack.c.bf16 %v3296_v38, %v3296_v38  ;;  %v3301_v47 = vpack.c.bf16 %v3297_v39, %v3297_v39  ;;  %v3302_v51 = vpack.c.bf16 %v3298_v40, %v3298_v40 }
0x100b   : > { %v3543_v45 = vsel %vm1759_vm4, %v3299_v43, 0  ;;  %v3589_v46 = vsel %vm1759_vm4, %v3300_v44, 0  ;;  %v3635_v12 = vsel %vm1759_vm4, %v3301_v47, 0  ;;  %v3681_v15 = vsel %vm1759_vm4, %v3302_v51, 0  ;;  %v7548_v44 = vld [vmem:[#allocation7 + $0x78] sm:$0xff]  }
0x100c   : > { %7115 = vmatpush3.bf16.msra.mxu0 %v3543_v45  ;;  %7121 = vmatpush3.bf16.msra.mxu1 %v3589_v46 }
0x100d   : > { %7126 = vmatprep.subr.bf16.mxu0 %v8064_v7  ;;  %7132 = vmatprep.subr.bf16.mxu1 %v8064_v7 }
0x100f   : > { %7117 = vmatmul.mubr.msk.bf16.vlgmr.msra.gmra.mrb[28].mxu0 %vm1707_vm3, %v3535_v3  ;;  %7123 = vmatmul.mubr.msk.bf16.vlgmr.msra.gmra.mrb[52].mxu1 %vm1707_vm3, %v3536_v8 }
0x1010   : > { %7127 = vmatpush3.bf16.msra.mxu0 %v3635_v12  ;;  %7133 = vmatpush3.bf16.msra.mxu1 %v3681_v15 }
0x1011   : > { %7128 = vmatprep.mubr.msk.bf16.mxu0 %vm8063_vm0, %v8064_v7  ;;  %7134 = vmatprep.mubr.msk.bf16.mxu1 %vm8063_vm0, %v8064_v7 }
0x1012   : > { %7138 = vmatprep.subr.bf16.mxu0 %v8064_v7 }
0x101f   : > { %v3523_v53 = vpop.xlane.xlu1 %3522 }
0x1020   : > { %7709 = vrcp.f32 %v3523_v53 }
0x1027   : > { %v3526_v54 = vpop.xlane.xlu0 %3525 }
0x1028   : > { %7711 = vrcp.f32 %v3526_v54 }
0x102a   : > { %v7710_v55 = vpop.eup %7709 }
0x102b   : > { %v3533_v56 = vmul.f32 %v7710_v55, %v8760_v49  ;;  %v7543_v49 = vld [vmem:[#allocation7 + $0x50] sm:$0xff]  }
0x102d   : > { %v3537_v57 = vpack.c.bf16 %v3533_v56, %v3533_v56 }
0x102f   : > { %7129 = vmatmul.mubr.msk.bf16.vlgmr.msra.gmra.mrb[32].mxu0 %vm1707_vm3, %v3537_v57 }
0x1030   : > { %7154 = vmatprep.mubr.msk.bf16.mxu0 %vm8063_vm0, %v8064_v7  ;;  %7139 = vmatpush3.bf16.msra.mxu0 %v7541_v61 }
0x1031   : > { %7140 = vmatprep.subr.bf16.mxu0 %v8064_v7 }
0x1032   : > { %v7712_v58 = vpop.eup %7711 }
0x1033   : > { %v3534_v59 = vmul.f32 %v7712_v58, %v8764_v52  ;;  %v7545_v52 = vld [vmem:[#allocation7 + $0x60] sm:$0xff]  }
0x1034   : > { %7141 = vmatpush3.bf16.msra.mxu0 %v7542_v63 }
0x1035   : > { %v3538_v60 = vpack.c.bf16 %v3534_v59, %v3534_v59  ;;  %7142 = vmatprep.subr.bf16.mxu0 %v8064_v7 }
0x1037   : > { %7135 = vmatmul.mubr.msk.bf16.vlgmr.msra.gmra.mrb[56].mxu1 %vm1707_vm3, %v3538_v60 }
0x1038   : > { %4161 = vmatprep.mubr.bf16.mxu1 %v8061_v0  ;;  %7143 = vmatpush3.bf16.msra.mxu0 %v7543_v49 }
0x1039   : > { %7144 = vmatprep.subr.bf16.mxu0 %v8064_v7 }
0x103c   : > { %7145 = vmatpush3.bf16.msra.mxu0 %v7544_v48 }
0x103d   : > { %7146 = vmatprep.subr.bf16.mxu0 %v8064_v7 }
0x1040   : > { %7147 = vmatpush3.bf16.msra.mxu0 %v7545_v52 }
0x1041   : > { %7148 = vmatprep.subr.bf16.mxu0 %v8064_v7 }
0x1044   : > { %7149 = vmatpush3.bf16.msra.mxu0 %v7546_v5 }
0x1045   : > { %7150 = vmatprep.subr.bf16.mxu0 %v8064_v7 }
0x1048   : > { %7151 = vmatpush3.bf16.msra.mxu0 %v7547_v35  ;;  %v7561_v35 = vld [vmem:[#allocation8 + $0xc0] ss:$8 sps:$4 sm:$0xff]  }
0x1049   : > { %7152 = vmatprep.subr.bf16.mxu0 %v8064_v7 }
0x104c   : > { %7153 = vmatpush3.bf16.msra.mxu0 %v7548_v44  ;;  %v7575_v44 = vld [vmem:[#allocation10 + $0xc8] sm:$0xff]  }
0x10e2   : > { %v3579_v50 = vpop.f32.mrb[28].mxu0  ;;  %v3625_v6 = vpop.f32.mrb[52].mxu1 }
0x10e3   : > { %v7118_v9 = vpop.f32.mrb[29].mxu0  ;;  %v7124_v11 = vpop.f32.mrb[53].mxu1 }
0x10e4   : > { %v3582_v13 = vpop.f32.mrb[30].mxu0  ;;  %v3628_v14 = vpop.f32.mrb[54].mxu1 }
0x10e5   : > { %v7119_v16 = vpop.f32.mrb[31].mxu0  ;;  %v7125_v17 = vpop.f32.mrb[55].mxu1  ;;  %v6600_v14 = vld [vmem:[%s9139_s7 + $0x1] ss:$0 sm:$0xff] }
0x1102   : > { %v3671_v18 = vpop.f32.mrb[32].mxu0 }
0x1103   : > { %v3723_v19 = vcombine.low %v3579_v50, %v3671_v18  ;;  %v3724_v20 = vcombine.high %v3579_v50, %v3671_v18  ;;  %v7130_v21 = vpop.f32.mrb[33].mxu0 }
0x1104   : > { %v3674_v23 = vpop.f32.mrb[34].mxu0 }
0x1105   : > { %v7131_v24 = vpop.f32.mrb[35].mxu0  ;;  %v3731_v31 = vrot.slane %v3723_v19, %v8484_v26  ;;  %v3738_v33 = vrot.slane %v3724_v20, %v8484_v26  ;;  %v7549_v23 = vld [vmem:[#allocation8 + $0x80] ss:$8 sps:$4 sm:$0xff]  }
0x1106   : > { %v7551_v24 = vld [vmem:[#allocation8 + $0x84] ss:$8 sps:$4 sm:$0xff]  }
0x1107   : > { %4129 = vmatprep.subr.bf16.mxu1 %v7551_v24 }
0x1108   : > { %4130 = vmatpush1.bf16.msra.mxu1 %v7549_v23 }
0x110a   : > { %v3717_v25 = vpop.f32.mrb[56].mxu1 }
0x110b   : > { %v3739_v27 = vcombine.low %v3625_v6, %v3717_v25  ;;  %v3740_v28 = vcombine.high %v3625_v6, %v3717_v25  ;;  %v7136_v29 = vpop.f32.mrb[57].mxu1  ;;  %v7554_v25 = vld [vmem:[#allocation8 + $0x94] ss:$8 sps:$4 sm:$0xff]  }
0x110c   : > { %v3720_v30 = vpop.f32.mrb[58].mxu1  ;;  %4131 = vmatprep.subr.bf16.mxu1 %v7554_v25  ;;  %v7555_v29 = vld [vmem:[#allocation8 + $0xa0] ss:$8 sps:$4 sm:$0xff]  }
0x110d   : > { %v3747_v34 = vrot.slane %v3739_v27, %v8484_v26  ;;  %v3754_v62 = vrot.slane %v3740_v28, %v8484_v26  ;;  %v7137_v1 = vpop.f32.mrb[59].mxu1  ;;  %v7552_v27 = vld [vmem:[#allocation8 + $0x90] ss:$8 sps:$4 sm:$0xff]   ;;  %v7557_v28 = vld [vmem:[#allocation8 + $0xa4] ss:$8 sps:$4 sm:$0xff]  }
0x110e   : > { %4132 = vmatpush1.bf16.msra.mxu1 %v7552_v27  ;;  %v7563_v1 = vld [vmem:[#allocation8 + $0xc4] ss:$8 sps:$4 sm:$0xff]   ;;  %v6630_v27 = vld [vmem:[#allocation11 + $0x1] ss:$0 sm:$0xff] }
0x110f   : > { %v3755_v36 = vcombine.low %v3731_v31, %v3747_v34  ;;  %v3756_v37 = vcombine.high %v3731_v31, %v3747_v34  ;;  %v3771_v38 = vcombine.low %v3738_v33, %v3754_v62  ;;  %v3772_v39 = vcombine.high %v3738_v33, %v3754_v62  ;;  %4133 = vmatprep.subr.bf16.mxu1 %v7557_v28  ;;  %v7560_v62 = vld [vmem:[#allocation8 + $0xb4] ss:$8 sps:$4 sm:$0xff]  }
0x1111   : > { %v3763_v40 = vrot.slane %v3755_v36, %v8487_v32  ;;  %v3770_v41 = vrot.slane %v3756_v37, %v8487_v32  ;;  %v3779_v42 = vrot.slane %v3771_v38, %v8487_v32  ;;  %v3786_v43 = vrot.slane %v3772_v39, %v8487_v32  ;;  %v7566_v36 = vld [vmem:[#allocation8 + $0xd4] ss:$8 sps:$4 sm:$0xff]   ;;  %v7564_v37 = vld [vmem:[#allocation8 + $0xd0] ss:$8 sps:$4 sm:$0xff]   ;;  %v7569_v38 = vld [vmem:[#allocation8 + $0xe4] ss:$8 sps:$4 sm:$0xff]  }
0x1112   : > { %4134 = vmatpush1.bf16.msra.mxu1 %v7555_v29  ;;  %v7567_v39 = vld [vmem:[#allocation8 + $0xe0] ss:$8 sps:$4 sm:$0xff]  }
0x1113   : > { %v3791_v45 = vcombine.low %v3763_v40, %v3770_v41  ;;  %v6597_v46 = vcombine.high %v3763_v40, %v3770_v41  ;;  %v3807_v47 = vcombine.low %v3779_v42, %v3786_v43  ;;  %v6598_v51 = vcombine.high %v3779_v42, %v3786_v43  ;;  %4135 = vmatprep.subr.bf16.mxu1 %v7560_v62  ;;  %v7572_v40 = vld [vmem:[#allocation8 + $0xf4] ss:$8 sps:$4 sm:$0xff]   ;;  %v7570_v41 = vld [vmem:[#allocation8 + $0xf0] ss:$8 sps:$4 sm:$0xff]   ;;  %v7573_v42 = vld [vmem:[#allocation10 + $0xc0] sm:$0xff]  }
0x1114   : > { %v7574_v43 = vld [vmem:[#allocation10 + $0x80] sm:$0xff]   ;;  %6860 = vmatprep.subr.bf16.mxu0 %v7573_v42 }
0x1115   : > { %v3798_v3 = vrot.slane %v3791_v45, %v8484_v26  ;;  %v3806_v8 = vrot.slane %v6597_v46, %v8484_v26  ;;  %v3814_v12 = vrot.slane %v3807_v47, %v8484_v26  ;;  %v3822_v15 = vrot.slane %v6598_v51, %v8484_v26  ;;  %v7576_v45 = vld [vmem:[#allocation10 + $0x88] sm:$0xff]   ;;  %v7577_v46 = vld [vmem:[#allocation10 + $0xd0] sm:$0xff]   ;;  %v7579_v51 = vld [vmem:[#allocation10 + $0xd8] sm:$0xff]  }
0x1116   : > { %v7578_v47 = vld [vmem:[#allocation10 + $0x90] sm:$0xff]   ;;  %v7589_v62 = vld [vmem:[#allocation5 + $0x180] ss:$12 sps:$4 sm:$0xff]  }
0x1117   : > { %v3824_v53 = vcombine.high %v3798_v3, %v3806_v8  ;;  %v3840_v54 = vcombine.high %v3814_v12, %v3822_v15  ;;  %v3823_v55 = vcombine.low %v3798_v3, %v3806_v8  ;;  %v3839_v56 = vcombine.low %v3814_v12, %v3822_v15  ;;  %v7580_v3 = vld [vmem:[#allocation10 + $0x98] sm:$0xff]   ;;  %v7581_v8 = vld [vmem:[#allocation10 + $0xe0] sm:$0xff]   ;;  %v7583_v15 = vld [vmem:[#allocation10 + $0xe8] sm:$0xff]  }
0x1118   : > { %v7582_v12 = vld [vmem:[#allocation10 + $0xa0] sm:$0xff]  }
0x1119   : > { %v3838_v57 = vrot.slane %v3824_v53, %v8487_v32  ;;  %v3854_v58 = vrot.slane %v3840_v54, %v8487_v32  ;;  %v3831_v59 = vrot.slane %v3823_v55, %v8487_v32  ;;  %v3847_v60 = vrot.slane %v3839_v56, %v8487_v32  ;;  %v7584_v53 = vld [vmem:[#allocation10 + $0xa8] sm:$0xff]  }
0x111b   : > { %v3857_v61 = vcombine.low %v3838_v57, %v3854_v58  ;;  %v3856_v63 = vcombine.high %v3831_v59, %v3847_v60  ;;  %v3858_v49 = vcombine.high %v3838_v57, %v3854_v58  ;;  %v3855_v48 = vcombine.low %v3831_v59, %v3847_v60  ;;  %v6610_v58 = vld [vmem:[%s9140_s8 + $0x1] ss:$0 sm:$0xff] }
0x111c   : > { %v6612_v60 = vld [vmem:[%s9215_s11 + $0x1] ss:$0 sm:$0xff] }
0x111d   : > { %3864 = vrot.lane.b32.xlu1 %v3857_v61, %s8068_s16  ;;  %3860 = vrot.lane.b32.xlu0 %v3856_v63, %s8066_s27 }
0x1121   : > { %3868 = vrot.lane.b32.xlu1 %v3858_v49, %s8067_s18 }
0x118f   : > { %v3865_v52 = vpop.permute.xlu1 %3864  ;;  %v3861_v5 = vpop.permute.xlu0 %3860 }
0x1190   : > { %v3871_v50 = vsel %vm1518_vm2, %v3855_v48, %v3861_v5  ;;  %v7585_v48 = vld [vmem:[#allocation10 + $0xf0] sm:$0xff]   ;;  %v7587_v5 = vld [vmem:[#allocation10 + $0xf8] sm:$0xff]  }
0x1191   : > { %v3872_v9 = vsel %vm2090_vm5, %v3871_v50, %v3865_v52  ;;  %v7586_v52 = vld [vmem:[#allocation10 + $0xb0] sm:$0xff]   ;;  %v7588_v50 = vld [vmem:[#allocation10 + $0xb8] sm:$0xff]  }
0x1193   : > { %v3869_v6 = vpop.permute.xlu1 %3868 }
0x1194   : > { %v3873_v11 = vsel %vm2092_vm6, %v3872_v9, %v3869_v6  ;;  %v6613_v6 = vld [vmem:[%s9217_s4 + $0x2] sm:$0x3] }
0x1195   : > { %v3874_v13 = vpack.c.bf16 %v3873_v11, %v3873_v11  ;;  %v4042_v9 = vrot.slane %v6613_v6, %v8469_v4  ;;  %v4046_v11 = vrot.slane %v6613_v6, %v8461_v2 }
0x1197   : > { %7155 = vmatmul.mubr.bf16.vlgmr.msra.gmra.mrb[36].mxu0 %v3874_v13 }
0x1198   : > { %6861 = vmatpush3.bf16.msra.mxu0 %v7574_v43 }
0x1199   : > { %6862 = vmatprep.subr.bf16.mxu0 %v7575_v44  ;;  %v7600_v44 = vld [vmem:[#allocation5 + $0x1b8] ss:$12 sps:$4 sm:$0xff]  }
0x119c   : > { %6863 = vmatpush3.bf16.msra.mxu0 %v7576_v45  ;;  %v7603_v45 = vld [vmem:[#allocation5 + $0x1cc] ss:$12 sps:$4 sm:$0xff]  }
0x119d   : > { %6864 = vmatprep.subr.bf16.mxu0 %v7577_v46  ;;  %v7601_v46 = vld [vmem:[#allocation5 + $0x1c8] ss:$12 sps:$4 sm:$0xff]  }
0x11a0   : > { %6865 = vmatpush3.bf16.msra.mxu0 %v7578_v47  ;;  %v7604_v47 = vld [vmem:[#allocation5 + $0x1d0] ss:$12 sps:$4 sm:$0xff]  }
0x11a1   : > { %6866 = vmatprep.subr.bf16.mxu0 %v7579_v51  ;;  %v7607_v51 = vld [vmem:[#allocation5 + $0x1e4] ss:$12 sps:$4 sm:$0xff]  }
0x11a4   : > { %6867 = vmatpush3.bf16.msra.mxu0 %v7580_v3  ;;  %v7605_v3 = vld [vmem:[#allocation5 + $0x1e0] ss:$12 sps:$4 sm:$0xff]  }
0x11a5   : > { %6868 = vmatprep.subr.bf16.mxu0 %v7581_v8  ;;  %v7608_v8 = vld [vmem:[#allocation5 + $0x1e8] ss:$12 sps:$4 sm:$0xff]  }
0x11a8   : > { %6869 = vmatpush3.bf16.msra.mxu0 %v7582_v12  ;;  %v7611_v12 = vld [vmem:[#allocation5 + $0x1fc] ss:$12 sps:$4 sm:$0xff]  }
0x11a9   : > { %6870 = vmatprep.subr.bf16.mxu0 %v7583_v15  ;;  %v7609_v15 = vld [vmem:[#allocation5 + $0x1f8] ss:$12 sps:$4 sm:$0xff]  }
0x11ac   : > { %6871 = vmatpush3.bf16.msra.mxu0 %v7584_v53  ;;  %v7612_v53 = vld [vmem:[#allocation5 + $0x200] ss:$12 sps:$4 sm:$0xff]  }
0x11ad   : > { %6872 = vmatprep.subr.bf16.mxu0 %v7585_v48  ;;  %v6647_v48 = vld [vmem:[#allocation13 + $0x1] ss:$0 sm:$0xff] }
0x11b0   : > { %6873 = vmatpush3.bf16.msra.mxu0 %v7586_v52 }
0x11b1   : > { %6874 = vmatprep.subr.bf16.mxu0 %v7587_v5  ;;  %v6648_v5 = vld [vmem:[#allocation14 + $0x1] ss:$0 sm:$0xff] }
0x11b4   : > { %6875 = vmatpush3.bf16.msra.mxu0 %v7588_v50 }
0x11b5   : > { %7158 = vmatprep.subr.bf16.mxu0 %v8064_v7 }
0x126a   : > { %v3982_v16 = vpop.f32.mrb[36].mxu0 }
0x126b   : > { %v3983_v17 = vadd.f32 %v6600_v14, %v3982_v16  ;;  %v7156_v18 = vpop.f32.mrb[37].mxu0 }
0x126c   : > { %v3985_v19 = vpop.f32.mrb[38].mxu0 }
0x126d   : > { %v7157_v20 = vpop.f32.mrb[39].mxu0  ;;  %v3988_v21 = vadd.f32 %v3983_v17, %v8665_v10  ;;  %v7558_v10 = vld [vmem:[#allocation8 + $0xb0] ss:$8 sps:$4 sm:$0xff]  }
0x126e   : > { %4136 = vmatpush1.bf16.msra.mxu1 %v7558_v10  ;;  %v7591_v10 = vld [vmem:[#allocation5 + $0x184] ss:$12 sps:$4 sm:$0xff]  }
0x126f   : > { %3989 = vadd.xlane.f32.xlu0 %v3988_v21  ;;  %4137 = vmatprep.subr.bf16.mxu1 %v7563_v1  ;;  %v7592_v1 = vld [vmem:[#allocation5 + $0x188] ss:$12 sps:$4 sm:$0xff]  }
0x1272   : > { %4138 = vmatpush1.bf16.msra.mxu1 %v7561_v35  ;;  %v7595_v35 = vld [vmem:[#allocation5 + $0x19c] ss:$12 sps:$4 sm:$0xff]  }
0x1273   : > { %4139 = vmatprep.subr.bf16.mxu1 %v7566_v36  ;;  %v7596_v36 = vld [vmem:[#allocation5 + $0x1a0] ss:$12 sps:$4 sm:$0xff]  }
0x1276   : > { %4140 = vmatpush1.bf16.msra.mxu1 %v7564_v37  ;;  %v7593_v37 = vld [vmem:[#allocation5 + $0x198] ss:$12 sps:$4 sm:$0xff]  }
0x1277   : > { %4141 = vmatprep.subr.bf16.mxu1 %v7569_v38  ;;  %v7599_v38 = vld [vmem:[#allocation5 + $0x1b4] ss:$12 sps:$4 sm:$0xff]  }
0x127a   : > { %4142 = vmatpush1.bf16.msra.mxu1 %v7567_v39  ;;  %v7597_v39 = vld [vmem:[#allocation5 + $0x1b0] ss:$12 sps:$4 sm:$0xff]  }
0x127b   : > { %4143 = vmatprep.subr.bf16.mxu1 %v7572_v40 }
0x127e   : > { %4144 = vmatpush1.bf16.msra.mxu1 %v7570_v41 }
0x127f   : > { %4561 = vmatprep.subr.bf16.mxu1 %v7591_v10 }
0x12fc   : > { %v3990_v30 = vpop.xlane.xlu0 %3989 }
0x12fd   : > { %v3991_v31 = vmul.f32 0.0078125, %v3990_v30 }
0x12ff   : > { %v3992_v33 = vsub.f32 %v3988_v21, %v3991_v31 }
0x1301   : > { %v3993_v34 = vmul.f32 %v3992_v33, %v3992_v33 }
0x1303   : > { %3994 = vadd.xlane.f32.xlu1 %v3993_v34 }
0x1390   : > { %v3995_v54 = vpop.xlane.xlu1 %3994 }
0x1391   : > { %v3996_v55 = vmul.f32 0.0078125, %v3995_v54  ;;  %v7615_v54 = vld [vmem:[#allocation5 + $0x214] ss:$12 sps:$4 sm:$0xff]  }
0x1393   : > { %v3997_v56 = vadd.f32 1e-05, %v3996_v55  ;;  %v7613_v55 = vld [vmem:[#allocation5 + $0x210] ss:$12 sps:$4 sm:$0xff]  }
0x1395   : > { %7713 = vrsqrt.f32 %v3997_v56  ;;  %v7616_v56 = vld [vmem:[#allocation5 + $0x218] ss:$12 sps:$4 sm:$0xff]  }
0x139f   : > { %v7714_v57 = vpop.eup %7713 }
0x13a0   : > { %v3999_v59 = vmul.f32 %v7714_v57, %v3992_v33  ;;  %v7619_v57 = vld [vmem:[#allocation5 + $0x22c] ss:$12 sps:$4 sm:$0xff]  }
0x13a2   : > { %v4008_v61 = vmul.f32 %v6610_v58, %v3999_v59  ;;  %v7617_v58 = vld [vmem:[#allocation5 + $0x228] ss:$12 sps:$4 sm:$0xff]   ;;  %v7620_v59 = vld [vmem:[#allocation5 + $0x230] ss:$12 sps:$4 sm:$0xff]  }
0x13a4   : > { %v4017_v63 = vadd.f32 %v6612_v60, %v4008_v61 }
0x13a6   : > { %v4018_v49 = vpack.c.bf16 %v4017_v63, %v4017_v63 }
0x13a8   : > { %4162 = vmatmul.mubr.bf16.vlgmr.msra.gmra.mrb[60].mxu1 %v4018_v49 }
0x13a9   : > { %4593 = vmatprep.mubr.bf16.mxu1 %v8061_v0  ;;  %4562 = vmatpush1.bf16.msra.mxu1 %v7589_v62 }
0x13aa   : > { %4563 = vmatprep.subr.bf16.mxu1 %v7595_v35 }
0x13ad   : > { %4564 = vmatpush1.bf16.msra.mxu1 %v7593_v37 }
0x13ae   : > { %4565 = vmatprep.subr.bf16.mxu1 %v7599_v38 }
0x13b1   : > { %4566 = vmatpush1.bf16.msra.mxu1 %v7597_v39 }
0x13b2   : > { %4567 = vmatprep.subr.bf16.mxu1 %v7603_v45 }
0x13b5   : > { %4568 = vmatpush1.bf16.msra.mxu1 %v7601_v46 }
0x13b6   : > { %4569 = vmatprep.subr.bf16.mxu1 %v7607_v51 }
0x13b9   : > { %4570 = vmatpush1.bf16.msra.mxu1 %v7605_v3 }
0x13ba   : > { %4571 = vmatprep.subr.bf16.mxu1 %v7611_v12 }
0x13bd   : > { %4572 = vmatpush1.bf16.msra.mxu1 %v7609_v15 }
0x13be   : > { %4573 = vmatprep.subr.bf16.mxu1 %v7615_v54 }
0x13c1   : > { %4574 = vmatpush1.bf16.msra.mxu1 %v7613_v55 }
0x13c2   : > { %4575 = vmatprep.subr.bf16.mxu1 %v7619_v57 }
0x13c5   : > { %4576 = vmatpush1.bf16.msra.mxu1 %v7617_v58 }
0x13c6   : > { %7178 = vmatprep.subr.bf16.mxu1 %v8064_v7 }
0x147b   : > { %v4163_v13 = vpop.f32.mrb[60].mxu1 }
0x147c   : > { %v4164_v14 = vadd.f32 %v4163_v13, %v4042_v9  ;;  %v4165_v16 = vpop.f32.mrb[61].mxu1 }
0x147d   : > { %v4166_v17 = vadd.f32 %v4165_v16, %v4046_v11  ;;  %v4167_v18 = vpop.f32.mrb[62].mxu1  ;;  %v8874_v11 = vld [vmem:[%s9137_s5 + $0x6] sm:$0x7] }
0x147e   : > { %v4170_v19 = vmax.f32 %v4164_v14, 0.0  ;;  %v4168_v20 = vpop.f32.mrb[63].mxu1  ;;  %v4425_v13 = vrot.slane %v8874_v11, %v8461_v2 }
0x147f   : > { %v4171_v21 = vmax.f32 %v4166_v17, 0.0 }
0x1480   : > { %v4172_v24 = vpack.c.bf16 %v4170_v19, %v4170_v19  ;;  %v4421_v19 = vrot.slane %v8874_v11, %v8469_v4 }
0x1481   : > { %v4173_v23 = vpack.c.bf16 %v4171_v21, %v4171_v21 }
0x1483   : > { %4343 = vmatprep.mubr.bf16.mxu0 %v4173_v23 }
0x1484   : > { %4344 = vmatmul.mubr.bf16.vlgmr.msra.gmra.mrb[40].mxu0 %v4172_v24 }
0x1485   : > { %7174 = vmatprep.mubr.msk.bf16.mxu0 %vm8063_vm0, %v8064_v7  ;;  %7159 = vmatpush3.bf16.msra.mxu0 %v7592_v1 }
0x1486   : > { %7160 = vmatprep.subr.bf16.mxu0 %v8064_v7 }
0x1489   : > { %7161 = vmatpush3.bf16.msra.mxu0 %v7596_v36 }
0x148a   : > { %7162 = vmatprep.subr.bf16.mxu0 %v8064_v7 }
0x148d   : > { %7163 = vmatpush3.bf16.msra.mxu0 %v7600_v44 }
0x148e   : > { %7164 = vmatprep.subr.bf16.mxu0 %v8064_v7 }
0x1491   : > { %7165 = vmatpush3.bf16.msra.mxu0 %v7604_v47 }
0x1492   : > { %7166 = vmatprep.subr.bf16.mxu0 %v8064_v7 }
0x1495   : > { %7167 = vmatpush3.bf16.msra.mxu0 %v7608_v8 }
0x1496   : > { %7168 = vmatprep.subr.bf16.mxu0 %v8064_v7 }
0x1499   : > { %7169 = vmatpush3.bf16.msra.mxu0 %v7612_v53 }
0x149a   : > { %7170 = vmatprep.subr.bf16.mxu0 %v8064_v7 }
0x149d   : > { %7171 = vmatpush3.bf16.msra.mxu0 %v7616_v56 }
0x149e   : > { %7172 = vmatprep.subr.bf16.mxu0 %v8064_v7 }
0x14a1   : > { %7173 = vmatpush3.bf16.msra.mxu0 %v7620_v59 }
0x14a2   : > { %7202 = vmatprep.subr.bf16.mxu0 %v8064_v7 }
0x1557   : > { %v6876_v25 = vpop.f32.mrb[40].mxu0 }
0x1558   : > { %v6877_v28 = vpop.f32.mrb[41].mxu0 }
0x1559   : > { %v6878_v29 = vadd.f32 %v6877_v28, %v6876_v25  ;;  %v6879_v30 = vpop.f32.mrb[42].mxu0 }
0x155a   : > { %v6880_v31 = vpop.f32.mrb[43].mxu0 }
0x155b   : > { %v4346_v33 = vadd.f32 %v6878_v29, %v6630_v27 }
0x155d   : > { %v4351_v34 = vadd.f32 %v4346_v33, %v4017_v63 }
0x155f   : > { %4352 = vadd.xlane.f32.xlu0 %v4351_v34 }
0x15ec   : > { %v4353_v40 = vpop.xlane.xlu0 %4352 }
0x15ed   : > { %v4354_v41 = vmul.f32 0.0078125, %v4353_v40 }
0x15ef   : > { %v4355_v42 = vsub.f32 %v4351_v34, %v4354_v41 }
0x15f1   : > { %v4356_v43 = vmul.f32 %v4355_v42, %v4355_v42 }
0x15f3   : > { %4357 = vadd.xlane.f32.xlu0 %v4356_v43 }
0x1680   : > { %v4358_v60 = vpop.xlane.xlu0 %4357 }
0x1681   : > { %v4359_v61 = vmul.f32 0.0078125, %v4358_v60 }
0x1683   : > { %v4360_v63 = vadd.f32 1e-05, %v4359_v61 }
0x1685   : > { %7715 = vrsqrt.f32 %v4360_v63 }
0x168f   : > { %v7716_v49 = vpop.eup %7715 }
0x1690   : > { %v4362_v52 = vmul.f32 %v7716_v49, %v4355_v42 }
0x1692   : > { %v4371_v50 = vmul.f32 %v6647_v48, %v4362_v52 }
0x1694   : > { %v8863_v6 = vadd.f32 %v6648_v5, %v4371_v50 }
0x1696   : > { %v4381_v9 = vpack.c.bf16 %v8863_v6, %v8863_v6 }
0x1698   : > { %4594 = vmatmul.mubr.bf16.vlgmr.msra.gmra.mrb[64].mxu1 %v4381_v9  ;;  %7175 = vmatmul.mubr.bf16.vlgmr.msra.gmra.mrb[44].mxu0 %v4381_v9 }
0x1699   : > { %7180 = vmatprep.mubr.msk.bf16.mxu1 %vm8063_vm0, %v8064_v7  ;;  %7204 = vmatprep.mubr.msk.bf16.mxu0 %vm8063_vm0, %v8064_v7 }
0x176b   : > { %v4595_v14 = vpop.f32.mrb[64].mxu1  ;;  %v8878_v16 = vpop.f32.mrb[44].mxu0 }
0x176c   : > { %v4597_v17 = vpop.f32.mrb[65].mxu1  ;;  %v7176_v18 = vpop.f32.mrb[45].mxu0  ;;  %v4596_v27 = vadd.f32 %v4595_v14, %v4421_v19 }
0x176d   : > { %v4598_v20 = vadd.f32 %v4597_v17, %v4425_v13  ;;  %v4599_v21 = vpop.f32.mrb[66].mxu1  ;;  %v4639_v23 = vpop.f32.mrb[46].mxu0 }
0x176e   : > { %v4600_v24 = vpop.f32.mrb[67].mxu1  ;;  %v7177_v25 = vpop.f32.mrb[47].mxu0 }
0x176f   : > { %4796 = vrot.lane.b32.xlu0 %v4598_v20, %s8068_s16  ;;  %4793 = vrot.lane.b32.xlu1 %v4598_v20, %s8067_s18 }
0x1773   : > { %4799 = vrot.lane.b32.xlu1 %v4598_v20, %s8066_s27  ;;  %4646 = vrot.lane.b32.xlu0 %v4596_v27, %s8068_s16 }
0x1777   : > { %4643 = vrot.lane.b32.xlu1 %v4596_v27, %s8067_s18 }
0x177b   : > { %4649 = vrot.lane.b32.xlu1 %v4596_v27, %s8066_s27 }
0x17e1   : > { %v4797_v28 = vpop.permute.xlu0 %4796  ;;  %v4794_v29 = vpop.permute.xlu1 %4793 }
0x17e2   : > { %v4802_v30 = vcombine.low %v4598_v20, %v4797_v28  ;;  %v4803_v31 = vcombine.high %v4598_v20, %v4797_v28 }
0x17e4   : > { %v4810_v10 = vrot.slane %v4802_v30, %v8484_v26  ;;  %v4817_v1 = vrot.slane %v4803_v31, %v8484_v26 }
0x17e5   : > { %v4800_v33 = vpop.permute.xlu1 %4799  ;;  %v4647_v42 = vpop.permute.xlu0 %4646 }
0x17e6   : > { %v4818_v34 = vcombine.low %v4794_v29, %v4800_v33  ;;  %v4819_v62 = vcombine.high %v4794_v29, %v4800_v33  ;;  %v4652_v47 = vcombine.low %v4596_v27, %v4647_v42  ;;  %v4653_v51 = vcombine.high %v4596_v27, %v4647_v42 }
0x17e8   : > { %v4826_v35 = vrot.slane %v4818_v34, %v8484_v26  ;;  %v4833_v36 = vrot.slane %v4819_v62, %v8484_v26  ;;  %v4660_v60 = vrot.slane %v4652_v47, %v8484_v26  ;;  %v4667_v61 = vrot.slane %v4653_v51, %v8484_v26 }
0x17e9   : > { %v4644_v37 = vpop.permute.xlu1 %4643 }
0x17ea   : > { %v4834_v38 = vcombine.low %v4810_v10, %v4826_v35  ;;  %v4835_v39 = vcombine.high %v4810_v10, %v4826_v35  ;;  %v4850_v40 = vcombine.low %v4817_v1, %v4833_v36  ;;  %v4851_v41 = vcombine.high %v4817_v1, %v4833_v36 }
0x17ec   : > { %v4842_v43 = vrot.slane %v4834_v38, %v8487_v32  ;;  %v4849_v44 = vrot.slane %v4835_v39, %v8487_v32  ;;  %v4858_v45 = vrot.slane %v4850_v40, %v8487_v32  ;;  %v4865_v46 = vrot.slane %v4851_v41, %v8487_v32 }
0x17ed   : > { %v4650_v3 = vpop.permute.xlu1 %4649 }
0x17ee   : > { %v4870_v8 = vcombine.low %v4842_v43, %v4849_v44  ;;  %v6676_v12 = vcombine.high %v4842_v43, %v4849_v44  ;;  %v4886_v15 = vcombine.low %v4858_v45, %v4865_v46  ;;  %v6677_v53 = vcombine.high %v4858_v45, %v4865_v46 }
0x17ef   : > { %v4668_v54 = vcombine.low %v4644_v37, %v4650_v3  ;;  %v4669_v55 = vcombine.high %v4644_v37, %v4650_v3 }
0x17f0   : > { %v4877_v56 = vrot.slane %v4870_v8, %v8484_v26  ;;  %v4885_v57 = vrot.slane %v6676_v12, %v8484_v26  ;;  %v4893_v58 = vrot.slane %v4886_v15, %v8484_v26  ;;  %v4901_v59 = vrot.slane %v6677_v53, %v8484_v26 }
0x17f1   : > { %v4676_v63 = vrot.slane %v4668_v54, %v8484_v26  ;;  %v4683_v49 = vrot.slane %v4669_v55, %v8484_v26 }
0x17f2   : > { %v4902_v48 = vcombine.low %v4877_v56, %v4885_v57  ;;  %v4918_v52 = vcombine.low %v4893_v58, %v4901_v59  ;;  %v4903_v10 = vcombine.high %v4877_v56, %v4885_v57  ;;  %v4919_v37 = vcombine.high %v4893_v58, %v4901_v59 }
0x17f3   : > { %v4684_v5 = vcombine.low %v4660_v60, %v4676_v63  ;;  %v4685_v50 = vcombine.high %v4660_v60, %v4676_v63  ;;  %v4700_v9 = vcombine.low %v4667_v61, %v4683_v49  ;;  %v4701_v13 = vcombine.high %v4667_v61, %v4683_v49 }
0x17f4   : > { %v4910_v14 = vrot.slane %v4902_v48, %v8487_v32  ;;  %v4926_v17 = vrot.slane %v4918_v52, %v8487_v32  ;;  %v4917_v42 = vrot.slane %v4903_v10, %v8487_v32  ;;  %v4933_v43 = vrot.slane %v4919_v37, %v8487_v32 }
0x17f5   : > { %v4692_v18 = vrot.slane %v4684_v5, %v8487_v32  ;;  %v4699_v19 = vrot.slane %v4685_v50, %v8487_v32  ;;  %v4708_v20 = vrot.slane %v4700_v9, %v8487_v32  ;;  %v4715_v21 = vrot.slane %v4701_v13, %v8487_v32 }
0x17f6   : > { %v4934_v23 = vcombine.low %v4910_v14, %v4926_v17  ;;  %v4935_v36 = vcombine.high %v4910_v14, %v4926_v17  ;;  %v4936_v46 = vcombine.low %v4917_v42, %v4933_v43  ;;  %v4937_v55 = vcombine.high %v4917_v42, %v4933_v43 }
0x17f7   : > { %v4720_v24 = vcombine.low %v4692_v18, %v4699_v19  ;;  %v6674_v25 = vcombine.high %v4692_v18, %v4699_v19  ;;  %v4736_v27 = vcombine.low %v4708_v20, %v4715_v21  ;;  %v6675_v28 = vcombine.high %v4708_v20, %v4715_v21 }
0x17f8   : > { %v4938_v29 = vpack.c.bf16 %v4934_v23, %v4934_v23  ;;  %v4939_v41 = vpack.c.bf16 %v4935_v36, %v4935_v36  ;;  %v4940_v8 = vpack.c.bf16 %v4936_v46, %v4936_v46  ;;  %v4941_v57 = vpack.c.bf16 %v4937_v55, %v4937_v55 }
0x17f9   : > { %v4727_v30 = vrot.slane %v4720_v24, %v8484_v26  ;;  %v4735_v31 = vrot.slane %v6674_v25, %v8484_v26  ;;  %v4743_v33 = vrot.slane %v4736_v27, %v8484_v26  ;;  %v4751_v34 = vrot.slane %v6675_v28, %v8484_v26 }
0x17fa   : > { %v5096_v62 = vsel %vm1518_vm2, %v4938_v29, 0  ;;  %v5142_v45 = vsel %vm1518_vm2, %v4939_v41, 0  ;;  %v5188_v54 = vsel %vm1518_vm2, %v4940_v8, 0  ;;  %v5234_v59 = vsel %vm1518_vm2, %v4941_v57, 0 }
0x17fb   : > { %v4752_v1 = vcombine.low %v4727_v30, %v4735_v31  ;;  %v4768_v35 = vcombine.low %v4743_v33, %v4751_v34  ;;  %7179 = vmatpush3.bf16.xpose.msra.mxu1 %v5096_v62  ;;  %v4753_v47 = vcombine.high %v4727_v30, %v4735_v31  ;;  %v4769_v51 = vcombine.high %v4743_v33, %v4751_v34 }
0x17fc   : > { %7184 = vmatprep.subr.bf16.mxu1 %v8064_v7  ;;  %v4429_v28 = vrot.slane %v8874_v11, %v8544_v22 }
0x17fd   : > { %v4760_v38 = vrot.slane %v4752_v1, %v8487_v32  ;;  %v4776_v39 = vrot.slane %v4768_v35, %v8487_v32  ;;  %v4767_v15 = vrot.slane %v4753_v47, %v8487_v32  ;;  %v4783_v53 = vrot.slane %v4769_v51, %v8487_v32 }
0x17fe   : > { %v4637_v34 = vadd.f32 %v8878_v16, %v4429_v28 }
0x17ff   : > { %v4784_v40 = vcombine.low %v4760_v38, %v4776_v39  ;;  %v4785_v3 = vcombine.high %v4760_v38, %v4776_v39  ;;  %v4786_v56 = vcombine.low %v4767_v15, %v4783_v53  ;;  %v4787_v60 = vcombine.high %v4767_v15, %v4783_v53 }
0x1801   : > { %v4788_v44 = vpack.c.bf16 %v4784_v40, %v4784_v40  ;;  %v4789_v12 = vpack.c.bf16 %v4785_v3, %v4785_v3  ;;  %v4790_v58 = vpack.c.bf16 %v4786_v56, %v4786_v56  ;;  %v4791_v61 = vpack.c.bf16 %v4787_v60, %v4787_v60 }
0x1803   : > { %7181 = vmatmul.mubr.msk.bf16.vlgmr.msra.gmra.mrb[68].mxu1 %vm1518_vm2, %v4788_v44 }
0x1804   : > { %7185 = vmatpush3.bf16.xpose.msra.mxu1 %v5142_v45  ;;  %7186 = vmatprep.mubr.msk.bf16.mxu1 %vm8063_vm0, %v8064_v7 }
0x1805   : > { %7190 = vmatprep.subr.bf16.mxu1 %v8064_v7 }
0x180b   : > { %7187 = vmatmul.mubr.msk.bf16.vlgmr.msra.gmra.mrb[72].mxu1 %vm1518_vm2, %v4789_v12 }
0x180c   : > { %7191 = vmatpush3.bf16.xpose.msra.mxu1 %v5188_v54  ;;  %7192 = vmatprep.mubr.msk.bf16.mxu1 %vm8063_vm0, %v8064_v7 }
0x180d   : > { %7196 = vmatprep.subr.bf16.mxu1 %v8064_v7 }
0x1813   : > { %7193 = vmatmul.mubr.msk.bf16.vlgmr.msra.gmra.mrb[76].mxu1 %vm1518_vm2, %v4790_v58 }
0x1814   : > { %7197 = vmatpush3.bf16.xpose.msra.mxu1 %v5234_v59  ;;  %7198 = vmatprep.mubr.msk.bf16.mxu1 %vm8063_vm0, %v8064_v7 }
0x1815   : > { %7208 = vmatprep.subr.bf16.mxu1 %v8064_v7 }
0x181b   : > { %7199 = vmatmul.mubr.msk.bf16.vlgmr.msra.gmra.mrb[80].mxu1 %vm1518_vm2, %v4791_v61 }
0x181c   : > { %7210 = vmatprep.mubr.msk.bf16.mxu1 %vm8063_vm0, %v8064_v7 }
0x18d6   : > { %v5132_v63 = vpop.f32.mrb[68].mxu1 }
0x18d7   : > { %v5276_v49 = vmul.f32 0.17677669, %v5132_v63  ;;  %v7182_v48 = vpop.f32.mrb[69].mxu1 }
0x18d8   : > { %v5135_v52 = vpop.f32.mrb[70].mxu1 }
0x18d9   : > { %v7183_v5 = vpop.f32.mrb[71].mxu1  ;;  %v5280_v50 = vsel %vm1707_vm3, %v5276_v49, -inf }
0x18da   : > { %5281 = vmax.xlane.f32.xlu0 %v5280_v50 }
0x18de   : > { %v5178_v9 = vpop.f32.mrb[72].mxu1 }
0x18df   : > { %v5277_v13 = vmul.f32 0.17677669, %v5178_v9  ;;  %v7188_v14 = vpop.f32.mrb[73].mxu1 }
0x18e0   : > { %v5181_v17 = vpop.f32.mrb[74].mxu1 }
0x18e1   : > { %v7189_v18 = vpop.f32.mrb[75].mxu1  ;;  %v5283_v19 = vsel %vm1707_vm3, %v5277_v13, -inf }
0x18e2   : > { %5284 = vmax.xlane.f32.xlu1 %v5283_v19 }
0x18e6   : > { %v5224_v20 = vpop.f32.mrb[76].mxu1 }
0x18e7   : > { %v5278_v21 = vmul.f32 0.17677669, %v5224_v20  ;;  %v7194_v23 = vpop.f32.mrb[77].mxu1 }
0x18e8   : > { %v5227_v24 = vpop.f32.mrb[78].mxu1 }
0x18e9   : > { %v7195_v25 = vpop.f32.mrb[79].mxu1  ;;  %v5286_v27 = vsel %vm1707_vm3, %v5278_v21, -inf }
0x18ea   : > { %5287 = vmax.xlane.f32.xlu0 %v5286_v27 }
0x18ee   : > { %v5270_v29 = vpop.f32.mrb[80].mxu1 }
0x18ef   : > { %v5279_v30 = vmul.f32 0.17677669, %v5270_v29  ;;  %v7200_v31 = vpop.f32.mrb[81].mxu1 }
0x18f0   : > { %v5273_v33 = vpop.f32.mrb[82].mxu1 }
0x18f1   : > { %v7201_v62 = vpop.f32.mrb[83].mxu1  ;;  %v5289_v10 = vsel %vm1707_vm3, %v5279_v30, -inf }
0x18f2   : > { %5290 = vmax.xlane.f32.xlu0 %v5289_v10 }
0x18f3   : > { %4943 = vrot.lane.b32.xlu1 %v4637_v34, %s8067_s18 }
0x1967   : > { %v5282_v1 = vpop.xlane.xlu0 %5281 }
0x1968   : > { %v5292_v35 = vsub.f32 %v5276_v49, %v5282_v1 }
0x196a   : > { %v5296_v36 = vmul.f32 1.442695, %v5292_v35 }
0x196c   : > { %7717 = vpow2.f32 %v5296_v36 }
0x196f   : > { %v5285_v37 = vpop.xlane.xlu1 %5284 }
0x1970   : > { %v5293_v38 = vsub.f32 %v5277_v13, %v5285_v37 }
0x1972   : > { %v5298_v39 = vmul.f32 1.442695, %v5293_v38 }
0x1973   : > { %v4944_v12 = vpop.permute.xlu1 %4943 }
0x1974   : > { %7719 = vpow2.f32 %v5298_v39 }
0x1976   : > { %v8948_v22 = vpop.eup %7717 }
0x1977   : > { %v5304_v11 = vsel %vm1707_vm3, %v8948_v22, 0.0  ;;  %v5288_v41 = vpop.xlane.xlu0 %5287 }
0x1978   : > { %5305 = vadd.xlane.f32.xlu1 %v5304_v11  ;;  %v5294_v42 = vsub.f32 %v5278_v21, %v5288_v41 }
0x197a   : > { %v5300_v43 = vmul.f32 1.442695, %v5294_v42 }
0x197c   : > { %7721 = vpow2.f32 %v5300_v43 }
0x197e   : > { %v8952_v16 = vpop.eup %7719 }
0x197f   : > { %v5307_v40 = vsel %vm1707_vm3, %v8952_v16, 0.0  ;;  %v5291_v44 = vpop.xlane.xlu0 %5290 }
0x1980   : > { %5308 = vadd.xlane.f32.xlu0 %v5307_v40  ;;  %v5295_v45 = vsub.f32 %v5279_v30, %v5291_v44 }
0x1982   : > { %v5302_v46 = vmul.f32 1.442695, %v5295_v45 }
0x1984   : > { %7723 = vpow2.f32 %v5302_v46 }
0x1986   : > { %v8958_v47 = vpop.eup %7721 }
0x1987   : > { %v5310_v51 = vsel %vm1707_vm3, %v8958_v47, 0.0 }
0x1989   : > { %4949 = vrot.lane.b32.xlu1 %v4637_v34, %s8066_s27 }
0x198e   : > { %v8962_v3 = vpop.eup %7723 }
0x198f   : > { %v5313_v8 = vsel %vm1707_vm3, %v8962_v3, 0.0 }
0x1996   : > { %4946 = vrot.lane.b32.xlu0 %v4637_v34, %s8068_s16 }
0x19ad   : > { %5311 = vadd.xlane.f32.xlu1 %v5310_v51 }
0x19b5   : > { %5314 = vadd.xlane.f32.xlu0 %v5313_v8 }
0x1a05   : > { %v5306_v15 = vpop.xlane.xlu1 %5305 }
0x1a06   : > { %7725 = vrcp.f32 %v5306_v15 }
0x1a09   : > { %v4950_v53 = vpop.permute.xlu1 %4949 }
0x1a0a   : > { %v4968_v55 = vcombine.low %v4944_v12, %v4950_v53  ;;  %v4969_v56 = vcombine.high %v4944_v12, %v4950_v53 }
0x1a0c   : > { %v4976_v60 = vrot.slane %v4968_v55, %v8484_v26  ;;  %v4983_v61 = vrot.slane %v4969_v56, %v8484_v26 }
0x1a0d   : > { %v5309_v54 = vpop.xlane.xlu0 %5308 }
0x1a0e   : > { %7727 = vrcp.f32 %v5309_v54 }
0x1a10   : > { %v7726_v33 = vpop.eup %7725 }
0x1a11   : > { %v4947_v57 = vpop.permute.xlu0 %4946  ;;  %v5320_v11 = vmul.f32 %v7726_v33, %v8948_v22 }
0x1a12   : > { %v4952_v58 = vcombine.low %v4637_v34, %v4947_v57  ;;  %v4953_v59 = vcombine.high %v4637_v34, %v4947_v57 }
0x1a13   : > { %v5324_v51 = vpack.c.bf16 %v5320_v11, %v5320_v11 }
0x1a14   : > { %v4960_v63 = vrot.slane %v4952_v58, %v8484_v26  ;;  %v4967_v49 = vrot.slane %v4953_v59, %v8484_v26  ;;  %v7621_v59 = vld [vmem:[#allocation7 + $0x80] sm:$0xff]  }
0x1a16   : > { %v4984_v48 = vcombine.low %v4960_v63, %v4976_v60  ;;  %v4985_v52 = vcombine.high %v4960_v63, %v4976_v60  ;;  %v5000_v5 = vcombine.low %v4967_v49, %v4983_v61  ;;  %v5001_v50 = vcombine.high %v4967_v49, %v4983_v61  ;;  %v7622_v60 = vld [vmem:[#allocation7 + $0x88] sm:$0xff]   ;;  %v7624_v61 = vld [vmem:[#allocation7 + $0x98] sm:$0xff]  }
0x1a17   : > { %v7626_v63 = vld [vmem:[#allocation7 + $0xa8] sm:$0xff]  }
0x1a18   : > { %v4992_v9 = vrot.slane %v4984_v48, %v8487_v32  ;;  %v4999_v13 = vrot.slane %v4985_v52, %v8487_v32  ;;  %v5008_v14 = vrot.slane %v5000_v5, %v8487_v32  ;;  %v5015_v17 = vrot.slane %v5001_v50, %v8487_v32  ;;  %v7728_v35 = vpop.eup %7727 }
0x1a19   : > { %v5321_v40 = vmul.f32 %v7728_v35, %v8952_v16 }
0x1a1a   : > { %v5020_v18 = vcombine.low %v4992_v9, %v4999_v13  ;;  %v6678_v19 = vcombine.high %v4992_v9, %v4999_v13  ;;  %v5036_v20 = vcombine.low %v5008_v14, %v5015_v17  ;;  %v6679_v21 = vcombine.high %v5008_v14, %v5015_v17 }
0x1a1b   : > { %v5325_v8 = vpack.c.bf16 %v5321_v40, %v5321_v40  ;;  %v7628_v40 = vld [vmem:[#allocation7 + $0xb8] sm:$0xff]  }
0x1a1c   : > { %v5027_v23 = vrot.slane %v5020_v18, %v8484_v26  ;;  %v5035_v24 = vrot.slane %v6678_v19, %v8484_v26  ;;  %v5043_v25 = vrot.slane %v5036_v20, %v8484_v26  ;;  %v5051_v27 = vrot.slane %v6679_v21, %v8484_v26 }
0x1a1e   : > { %v5052_v28 = vcombine.low %v5027_v23, %v5035_v24  ;;  %v5068_v29 = vcombine.low %v5043_v25, %v5051_v27  ;;  %v5053_v30 = vcombine.high %v5027_v23, %v5035_v24  ;;  %v5069_v31 = vcombine.high %v5043_v25, %v5051_v27 }
0x1a20   : > { %v5060_v34 = vrot.slane %v5052_v28, %v8487_v32  ;;  %v5076_v62 = vrot.slane %v5068_v29, %v8487_v32  ;;  %v5067_v10 = vrot.slane %v5053_v30, %v8487_v32  ;;  %v5083_v1 = vrot.slane %v5069_v31, %v8487_v32 }
0x1a22   : > { %v5084_v36 = vcombine.low %v5060_v34, %v5076_v62  ;;  %v5085_v37 = vcombine.high %v5060_v34, %v5076_v62  ;;  %v5086_v38 = vcombine.low %v5067_v10, %v5083_v1  ;;  %v5087_v39 = vcombine.high %v5067_v10, %v5083_v1  ;;  %v7627_v62 = vld [vmem:[#allocation7 + $0xb0] sm:$0xff]  }
0x1a24   : > { %v5088_v41 = vpack.c.bf16 %v5084_v36, %v5084_v36  ;;  %v5089_v42 = vpack.c.bf16 %v5085_v37, %v5085_v37  ;;  %v5090_v45 = vpack.c.bf16 %v5086_v38, %v5086_v38  ;;  %v5091_v46 = vpack.c.bf16 %v5087_v39, %v5087_v39 }
0x1a26   : > { %v5332_v43 = vsel %vm1759_vm4, %v5088_v41, 0  ;;  %v5378_v44 = vsel %vm1759_vm4, %v5089_v42, 0  ;;  %v5424_v22 = vsel %vm1759_vm4, %v5090_v45, 0  ;;  %v5470_v16 = vsel %vm1759_vm4, %v5091_v46, 0 }
0x1a27   : > { %7203 = vmatpush3.bf16.msra.mxu0 %v5332_v43  ;;  %7209 = vmatpush3.bf16.msra.mxu1 %v5378_v44 }
0x1a28   : > { %7214 = vmatprep.subr.bf16.mxu0 %v8064_v7  ;;  %7220 = vmatprep.subr.bf16.mxu1 %v8064_v7 }
0x1a2a   : > { %7205 = vmatmul.mubr.msk.bf16.vlgmr.msra.gmra.mrb[48].mxu0 %vm1707_vm3, %v5324_v51  ;;  %7211 = vmatmul.mubr.msk.bf16.vlgmr.msra.gmra.mrb[84].mxu1 %vm1707_vm3, %v5325_v8 }
0x1a2b   : > { %7215 = vmatpush3.bf16.msra.mxu0 %v5424_v22  ;;  %7221 = vmatpush3.bf16.msra.mxu1 %v5470_v16 }
0x1a2c   : > { %7216 = vmatprep.mubr.msk.bf16.mxu0 %vm8063_vm0, %v8064_v7  ;;  %7222 = vmatprep.mubr.msk.bf16.mxu1 %vm8063_vm0, %v8064_v7 }
0x1a2d   : > { %7226 = vmatprep.subr.bf16.mxu0 %v8064_v7 }
0x1a3a   : > { %v5312_v12 = vpop.xlane.xlu1 %5311 }
0x1a3b   : > { %7729 = vrcp.f32 %v5312_v12 }
0x1a42   : > { %v5315_v15 = vpop.xlane.xlu0 %5314 }
0x1a43   : > { %7731 = vrcp.f32 %v5315_v15 }
0x1a45   : > { %v7730_v53 = vpop.eup %7729 }
0x1a46   : > { %v5322_v54 = vmul.f32 %v7730_v53, %v8958_v47  ;;  %v7623_v47 = vld [vmem:[#allocation7 + $0x90] sm:$0xff]  }
0x1a48   : > { %v5326_v55 = vpack.c.bf16 %v5322_v54, %v5322_v54 }
0x1a4a   : > { %7217 = vmatmul.mubr.msk.bf16.vlgmr.msra.gmra.mrb[52].mxu0 %vm1707_vm3, %v5326_v55 }
0x1a4b   : > { %7242 = vmatprep.mubr.msk.bf16.mxu0 %vm8063_vm0, %v8064_v7  ;;  %7227 = vmatpush3.bf16.msra.mxu0 %v7621_v59 }
0x1a4c   : > { %7228 = vmatprep.subr.bf16.mxu0 %v8064_v7 }
0x1a4d   : > { %v7732_v56 = vpop.eup %7731 }
0x1a4e   : > { %v5323_v57 = vmul.f32 %v7732_v56, %v8962_v3  ;;  %v7625_v3 = vld [vmem:[#allocation7 + $0xa0] sm:$0xff]  }
0x1a4f   : > { %7229 = vmatpush3.bf16.msra.mxu0 %v7622_v60 }
0x1a50   : > { %v5327_v58 = vpack.c.bf16 %v5323_v57, %v5323_v57  ;;  %7230 = vmatprep.subr.bf16.mxu0 %v8064_v7 }
0x1a52   : > { %7223 = vmatmul.mubr.msk.bf16.vlgmr.msra.gmra.mrb[88].mxu1 %vm1707_vm3, %v5327_v58 }
0x1a53   : > { %5950 = vmatprep.mubr.bf16.mxu1 %v8061_v0  ;;  %7231 = vmatpush3.bf16.msra.mxu0 %v7623_v47 }
0x1a54   : > { %7232 = vmatprep.subr.bf16.mxu0 %v8064_v7 }
0x1a57   : > { %7233 = vmatpush3.bf16.msra.mxu0 %v7624_v61 }
0x1a58   : > { %7234 = vmatprep.subr.bf16.mxu0 %v8064_v7 }
0x1a5b   : > { %7235 = vmatpush3.bf16.msra.mxu0 %v7625_v3 }
0x1a5c   : > { %7236 = vmatprep.subr.bf16.mxu0 %v8064_v7 }
0x1a5f   : > { %7237 = vmatpush3.bf16.msra.mxu0 %v7626_v63 }
0x1a60   : > { %7238 = vmatprep.subr.bf16.mxu0 %v8064_v7 }
0x1a63   : > { %7239 = vmatpush3.bf16.msra.mxu0 %v7627_v62  ;;  %v7647_v62 = vld [vmem:[#allocation8 + $0x160] ss:$8 sps:$4 sm:$0xff]  }
0x1a64   : > { %7240 = vmatprep.subr.bf16.mxu0 %v8064_v7 }
0x1a67   : > { %7241 = vmatpush3.bf16.msra.mxu0 %v7628_v40  ;;  %v7659_v40 = vld [vmem:[#allocation10 + $0x158] sm:$0xff]  }
0x1afd   : > { %v5368_v0 = vpop.f32.mrb[48].mxu0  ;;  %v5414_v49 = vpop.f32.mrb[84].mxu1 }
0x1afe   : > { %v7206_v48 = vpop.f32.mrb[49].mxu0  ;;  %v7212_v52 = vpop.f32.mrb[85].mxu1 }
0x1aff   : > { %v5371_v5 = vpop.f32.mrb[50].mxu0  ;;  %v5417_v50 = vpop.f32.mrb[86].mxu1 }
0x1b00   : > { %v7207_v9 = vpop.f32.mrb[51].mxu0  ;;  %v7213_v13 = vpop.f32.mrb[87].mxu1 }
0x1b1d   : > { %v5460_v14 = vpop.f32.mrb[52].mxu0 }
0x1b1e   : > { %v5512_v17 = vcombine.low %v5368_v0, %v5460_v14  ;;  %v5513_v18 = vcombine.high %v5368_v0, %v5460_v14  ;;  %v7218_v19 = vpop.f32.mrb[53].mxu0  ;;  %v7629_v14 = vld [vmem:[#allocation8 + $0x100] ss:$8 sps:$4 sm:$0xff]  }
0x1b1f   : > { %v5463_v20 = vpop.f32.mrb[54].mxu0  ;;  %v7632_v19 = vld [vmem:[#allocation8 + $0x110] ss:$8 sps:$4 sm:$0xff]  }
0x1b20   : > { %v7219_v21 = vpop.f32.mrb[55].mxu0  ;;  %v5520_v29 = vrot.slane %v5512_v17, %v8484_v26  ;;  %v5527_v30 = vrot.slane %v5513_v18, %v8484_v26  ;;  %v7631_v17 = vld [vmem:[#allocation8 + $0x104] ss:$8 sps:$4 sm:$0xff]   ;;  %v7634_v18 = vld [vmem:[#allocation8 + $0x114] ss:$8 sps:$4 sm:$0xff]  }
0x1b21   : > { %5918 = vmatprep.subr.bf16.mxu1 %v7631_v17  ;;  %v7637_v20 = vld [vmem:[#allocation8 + $0x124] ss:$8 sps:$4 sm:$0xff]   ;;  %v7635_v21 = vld [vmem:[#allocation8 + $0x120] ss:$8 sps:$4 sm:$0xff]  }
0x1b22   : > { %5919 = vmatpush1.bf16.msra.mxu1 %v7629_v14 }
0x1b23   : > { %5920 = vmatprep.subr.bf16.mxu1 %v7634_v18 }
0x1b25   : > { %v5506_v23 = vpop.f32.mrb[88].mxu1 }
0x1b26   : > { %v5528_v24 = vcombine.low %v5414_v49, %v5506_v23  ;;  %v5529_v25 = vcombine.high %v5414_v49, %v5506_v23  ;;  %v7224_v27 = vpop.f32.mrb[89].mxu1  ;;  %v6691_v49 = vld [vmem:[%s9139_s7 + $0x2] ss:$0 sm:$0xff]  ;;  %5921 = vmatpush1.bf16.msra.mxu1 %v7632_v19 }
0x1b27   : > { %v5509_v28 = vpop.f32.mrb[90].mxu1  ;;  %5922 = vmatprep.subr.bf16.mxu1 %v7637_v20  ;;  %v7669_v20 = vld [vmem:[%s9218_s28] sm:$0xff]   ;;  %s6467_s28 = sshll.u32 %s694_s9, 3 }
0x1b28   : > { %v5536_v31 = vrot.slane %v5528_v24, %v8484_v26  ;;  %v5543_v33 = vrot.slane %v5529_v25, %v8484_v26  ;;  %v7225_v34 = vpop.f32.mrb[91].mxu1  ;;  %v7640_v28 = vld [vmem:[#allocation8 + $0x134] ss:$8 sps:$4 sm:$0xff]   ;;  %s696_s25 = scalar_lea.vmem [#allocation16], %s6467_s28 }
0x1b29   : > { %v7649_v34 = vld [vmem:[#allocation8 + $0x164] ss:$8 sps:$4 sm:$0xff]   ;;  %s6297_s23 = sshll.u32 %s696_s25, 4  ;;  %s9092_s23 = int_to_ptr.vmem [resolvable:$true] %s6297_s23 }
0x1b2a   : > { %v5544_v10 = vcombine.low %v5520_v29, %v5536_v31  ;;  %v5545_v1 = vcombine.high %v5520_v29, %v5536_v31  ;;  %v5560_v35 = vcombine.low %v5527_v30, %v5543_v33  ;;  %v5561_v36 = vcombine.high %v5527_v30, %v5543_v33  ;;  %5923 = vmatpush1.bf16.msra.mxu1 %v7635_v21  ;;  %v7643_v29 = vld [vmem:[#allocation8 + $0x144] ss:$8 sps:$4 sm:$0xff]   ;;  %v7641_v30 = vld [vmem:[#allocation8 + $0x140] ss:$8 sps:$4 sm:$0xff]   ;;  %v7646_v31 = vld [vmem:[#allocation8 + $0x154] ss:$8 sps:$4 sm:$0xff]   ;;  %p7968_p6 = scmp.lt.s32.totalorder %s9092_s23, %s7966_s2 }
0x1b2b   : > { %5924 = vmatprep.subr.bf16.mxu1 %v7640_v28  ;;  %v7644_v33 = vld [vmem:[#allocation8 + $0x150] ss:$8 sps:$4 sm:$0xff]   ;;  %v7671_v28 = vld [vmem:[%s9219_s17 + $0x10] sm:$0xff]   ;;  %s7961_s0 = scalar_lea.vmem %s9092_s23, 128 }
0x1b2c   : > { %v5552_v37 = vrot.slane %v5544_v10, %v8487_v32  ;;  %v5559_v38 = vrot.slane %v5545_v1, %v8487_v32  ;;  %v5568_v39 = vrot.slane %v5560_v35, %v8487_v32  ;;  %v5575_v11 = vrot.slane %v5561_v36, %v8487_v32  ;;  %v7652_v10 = vld [vmem:[#allocation8 + $0x174] ss:$8 sps:$4 sm:$0xff]   ;;  %v7650_v1 = vld [vmem:[#allocation8 + $0x170] ss:$8 sps:$4 sm:$0xff]   ;;  %v7653_v35 = vld [vmem:[#allocation10 + $0x140] sm:$0xff]   ;;  %p7962_p8 = scmp.ne.s32.totalorder %s9092_s23, %s7961_s0  ;;  %p7969_p9 = scmp.lt.s32.totalorder %s7967_s26, %s7961_s0 }
0x1b2d   : > { %v7654_v36 = vld [vmem:[#allocation10 + $0x100] sm:$0xff]   ;;  %6916 = vmatprep.subr.bf16.mxu0 %v7653_v35  ;;  %v7670_v21 = vld [vmem:[%s9219_s17 + $0x8] sm:$0xff]  }
0x1b2e   : > { %v5580_v41 = vcombine.low %v5552_v37, %v5559_v38  ;;  %v6688_v42 = vcombine.high %v5552_v37, %v5559_v38  ;;  %v5596_v43 = vcombine.low %v5568_v39, %v5575_v11  ;;  %v6689_v44 = vcombine.high %v5568_v39, %v5575_v11  ;;  %v7655_v37 = vld [vmem:[#allocation10 + $0x148] sm:$0xff]   ;;  %v7657_v39 = vld [vmem:[#allocation10 + $0x150] sm:$0xff]   ;;  %v6738_v35 = vld [vmem:[#allocation13 + $0x2] ss:$0 sm:$0xff]  ;;  %p7963_p5 = pnand %p7962_p8, %p9224_p11  ;;  %p7970_p10 = por %p7969_p9, %p7968_p6 }
0x1b2f   : > { %v7656_v38 = vld [vmem:[#allocation10 + $0x108] sm:$0xff]   ;;  %v7658_v11 = vld [vmem:[#allocation10 + $0x110] sm:$0xff]  }
0x1b30   : > { %v5587_v45 = vrot.slane %v5580_v41, %v8484_v26  ;;  %v5595_v46 = vrot.slane %v6688_v42, %v8484_v26  ;;  %v5603_v51 = vrot.slane %v5596_v43, %v8484_v26  ;;  %v5611_v8 = vrot.slane %v6689_v44, %v8484_v26  ;;  %v7660_v41 = vld [vmem:[#allocation10 + $0x118] sm:$0xff]   ;;  %v7661_v42 = vld [vmem:[#allocation10 + $0x160] sm:$0xff]   ;;  %v7663_v44 = vld [vmem:[#allocation10 + $0x168] sm:$0xff]   ;;  %p7964_p0 = pneg %p7963_p5 }
0x1b31   : > { %v7662_v43 = vld [vmem:[#allocation10 + $0x120] sm:$0xff]  }
0x1b32   : > { %v5613_v22 = vcombine.high %v5587_v45, %v5595_v46  ;;  %v5629_v16 = vcombine.high %v5603_v51, %v5611_v8  ;;  %v5612_v12 = vcombine.low %v5587_v45, %v5595_v46  ;;  %v5628_v15 = vcombine.low %v5603_v51, %v5611_v8  ;;  %v7664_v45 = vld [vmem:[#allocation10 + $0x128] sm:$0xff]   ;;  %p7971_p13 = pnand %p7970_p10, %p7964_p0 }
0x1b34   : > { %v5627_v53 = vrot.slane %v5613_v22, %v8487_v32  ;;  %v5643_v54 = vrot.slane %v5629_v16, %v8487_v32  ;;  %v5620_v55 = vrot.slane %v5612_v12, %v8487_v32  ;;  %v5636_v56 = vrot.slane %v5628_v15, %v8487_v32  ;;  %v6701_v16 = vld [vmem:[%s9140_s8 + $0x2] ss:$0 sm:$0xff] }
0x1b35   : > { %v6703_v15 = vld [vmem:[%s9215_s11 + $0x2] ss:$0 sm:$0xff] }
0x1b36   : > { %v5646_v57 = vcombine.low %v5627_v53, %v5643_v54  ;;  %v5645_v58 = vcombine.high %v5620_v55, %v5636_v56  ;;  %v5647_v59 = vcombine.high %v5627_v53, %v5643_v54  ;;  %v5644_v60 = vcombine.low %v5620_v55, %v5636_v56  ;;  %v7665_v56 = vld [vmem:[#allocation10 + $0x170] sm:$0xff]  }
0x1b38   : > { %5653 = vrot.lane.b32.xlu1 %v5646_v57, %s8068_s16  ;;  %5649 = vrot.lane.b32.xlu0 %v5645_v58, %s8066_s27  ;;  %v7666_v57 = vld [vmem:[#allocation10 + $0x130] sm:$0xff]   ;;  %v7667_v58 = vld [vmem:[#allocation10 + $0x178] sm:$0xff]  }
0x1b3c   : > { %5657 = vrot.lane.b32.xlu1 %v5647_v59, %s8067_s18  ;;  %v7668_v59 = vld [vmem:[#allocation10 + $0x138] sm:$0xff]   ;;  %s9223_s18 = sld [smem:[#allocation40_spill]] }
0x1b42   : > { %s9090_s16 = scalar_lea.hbm %s9223_s18, %s6750_s19 }
0x1baa   : > { %v5654_v26 = vpop.permute.xlu1 %5653  ;;  %v5650_v47 = vpop.permute.xlu0 %5649 }
0x1bab   : > { %v5660_v61 = vsel %vm1518_vm2, %v5644_v60, %v5650_v47  ;;  %v6704_v60 = vld [vmem:[%s9217_s4 + $0x4] sm:$0x3] }
0x1bac   : > { %v5661_v63 = vsel %vm2090_vm5, %v5660_v61, %v5654_v26  ;;  %v5831_v26 = vrot.slane %v6704_v60, %v8469_v4  ;;  %v5835_v47 = vrot.slane %v6704_v60, %v8461_v2 }
0x1bae   : > { %v5658_v3 = vpop.permute.xlu1 %5657 }
0x1baf   : > { %v5662_v0 = vsel %vm2092_vm6, %v5661_v63, %v5658_v3 }
0x1bb0   : > { %v5663_v32 = vpack.c.bf16 %v5662_v0, %v5662_v0 }
0x1bb2   : > { %7243 = vmatmul.mubr.bf16.vlgmr.msra.gmra.mrb[56].mxu0 %v5663_v32 }
0x1bb3   : > { %6917 = vmatpush3.bf16.msra.mxu0 %v7654_v36 }
0x1bb4   : > { %6918 = vmatprep.subr.bf16.mxu0 %v7655_v37  ;;  %v6739_v37 = vld [vmem:[#allocation14 + $0x2] ss:$0 sm:$0xff] }
0x1bb7   : > { %6919 = vmatpush3.bf16.msra.mxu0 %v7656_v38 }
0x1bb8   : > { %6920 = vmatprep.subr.bf16.mxu0 %v7657_v39 }
0x1bbb   : > { %6921 = vmatpush3.bf16.msra.mxu0 %v7658_v11 }
0x1bbc   : > { %6922 = vmatprep.subr.bf16.mxu0 %v7659_v40 }
0x1bbf   : > { %6923 = vmatpush3.bf16.msra.mxu0 %v7660_v41 }
0x1bc0   : > { %6924 = vmatprep.subr.bf16.mxu0 %v7661_v42 }
0x1bc3   : > { %6925 = vmatpush3.bf16.msra.mxu0 %v7662_v43 }
0x1bc4   : > { %6926 = vmatprep.subr.bf16.mxu0 %v7663_v44 }
0x1bc7   : > { %6927 = vmatpush3.bf16.msra.mxu0 %v7664_v45 }
0x1bc8   : > { %6928 = vmatprep.subr.bf16.mxu0 %v7665_v56 }
0x1bcb   : > { %6929 = vmatpush3.bf16.msra.mxu0 %v7666_v57 }
0x1bcc   : > { %6930 = vmatprep.subr.bf16.mxu0 %v7667_v58 }
0x1bcf   : > { %6931 = vmatpush3.bf16.msra.mxu0 %v7668_v59 }
0x1c85   : > { %v5771_v48 = vpop.f32.mrb[56].mxu0 }
0x1c86   : > { %v5772_v52 = vadd.f32 %v6691_v49, %v5771_v48  ;;  %v7244_v5 = vpop.f32.mrb[57].mxu0 }
0x1c87   : > { %v5774_v50 = vpop.f32.mrb[58].mxu0 }
0x1c88   : > { %v7245_v9 = vpop.f32.mrb[59].mxu0  ;;  %v5777_v13 = vadd.f32 %v5772_v52, %v8863_v6  ;;  %v7638_v6 = vld [vmem:[#allocation8 + $0x130] ss:$8 sps:$4 sm:$0xff]  }
0x1c89   : > { %5925 = vmatpush1.bf16.msra.mxu1 %v7638_v6  ;;  %v7672_v6 = vld [vmem:[%s9219_s17 + $0x18] sm:$0xff]  }
0x1c8a   : > { %5778 = vadd.xlane.f32.xlu0 %v5777_v13  ;;  %5926 = vmatprep.subr.bf16.mxu1 %v7643_v29  ;;  %v7673_v29 = vld [vmem:[%s9219_s17 + $0x20] sm:$0xff]  }
0x1c8d   : > { %5927 = vmatpush1.bf16.msra.mxu1 %v7641_v30  ;;  %v7674_v30 = vld [vmem:[%s9219_s17 + $0x28] sm:$0xff]  }
0x1c8e   : > { %5928 = vmatprep.subr.bf16.mxu1 %v7646_v31  ;;  %v7675_v31 = vld [vmem:[%s9219_s17 + $0x30] sm:$0xff]  }
0x1c91   : > { %5929 = vmatpush1.bf16.msra.mxu1 %v7644_v33  ;;  %v7676_v33 = vld [vmem:[%s9219_s17 + $0x38] sm:$0xff]  }
0x1c92   : > { %5930 = vmatprep.subr.bf16.mxu1 %v7649_v34 }
0x1c95   : > { %5931 = vmatpush1.bf16.msra.mxu1 %v7647_v62 }
0x1c96   : > { %5932 = vmatprep.subr.bf16.mxu1 %v7652_v10 }
0x1c99   : > { %5933 = vmatpush1.bf16.msra.mxu1 %v7650_v1 }
0x1c9a   : > { %7246 = vmatprep.subr.bf16.mxu1 %v8064_v7 }
0x1d17   : > { %v5779_v23 = vpop.xlane.xlu0 %5778 }
0x1d18   : > { %v5780_v24 = vmul.f32 0.0078125, %v5779_v23 }
0x1d1a   : > { %v5781_v25 = vsub.f32 %v5777_v13, %v5780_v24  ;;  %v6721_v13 = vld [vmem:[#allocation11 + $0x2] ss:$0 sm:$0xff] }
0x1d1c   : > { %v5782_v27 = vmul.f32 %v5781_v25, %v5781_v25 }
0x1d1e   : > { %5783 = vadd.xlane.f32.xlu1 %v5782_v27 }
0x1dab   : > { %v5784_v46 = vpop.xlane.xlu1 %5783 }
0x1dac   : > { %v5785_v51 = vmul.f32 0.0078125, %v5784_v46 }
0x1dae   : > { %v5786_v8 = vadd.f32 1e-05, %v5785_v51 }
0x1db0   : > { %7733 = vrsqrt.f32 %v5786_v8 }
0x1dba   : > { %v7734_v22 = vpop.eup %7733 }
0x1dbb   : > { %v5788_v12 = vmul.f32 %v7734_v22, %v5781_v25 }
0x1dbd   : > { %v5797_v53 = vmul.f32 %v6701_v16, %v5788_v12 }
0x1dbf   : > { %v5806_v54 = vadd.f32 %v6703_v15, %v5797_v53 }
0x1dc1   : > { %v5807_v55 = vpack.c.bf16 %v5806_v54, %v5806_v54 }
0x1dc3   : > { %5951 = vmatmul.mubr.bf16.vlgmr.msra.gmra.mrb[92].mxu1 %v5807_v55 }
0x1dc4   : > { %7262 = vmatprep.mubr.msk.bf16.mxu1 %vm8063_vm0, %v8064_v7  ;;  %7247 = vmatpush3.bf16.msra.mxu1 %v7669_v20 }
0x1dc5   : > { %7248 = vmatprep.subr.bf16.mxu1 %v8064_v7 }
0x1dc8   : > { %7249 = vmatpush3.bf16.msra.mxu1 %v7670_v21 }
0x1dc9   : > { %7250 = vmatprep.subr.bf16.mxu1 %v8064_v7 }
0x1dcc   : > { %7251 = vmatpush3.bf16.msra.mxu1 %v7671_v28 }
0x1dcd   : > { %7252 = vmatprep.subr.bf16.mxu1 %v8064_v7 }
0x1dd0   : > { %7253 = vmatpush3.bf16.msra.mxu1 %v7672_v6 }
0x1dd1   : > { %7254 = vmatprep.subr.bf16.mxu1 %v8064_v7 }
0x1dd4   : > { %7255 = vmatpush3.bf16.msra.mxu1 %v7673_v29 }
0x1dd5   : > { %7256 = vmatprep.subr.bf16.mxu1 %v8064_v7 }
0x1dd8   : > { %7257 = vmatpush3.bf16.msra.mxu1 %v7674_v30 }
0x1dd9   : > { %7258 = vmatprep.subr.bf16.mxu1 %v8064_v7 }
0x1ddc   : > { %7259 = vmatpush3.bf16.msra.mxu1 %v7675_v31 }
0x1ddd   : > { %7260 = vmatprep.subr.bf16.mxu1 %v8064_v7  ;;  %v6740_v7 = vld [vmem:[%s9221_s22] ss:$0 sm:$0xff] }
0x1de0   : > { %7261 = vmatpush3.bf16.msra.mxu1 %v7676_v33 }
0x1e96   : > { %v5952_v61 = vpop.f32.mrb[92].mxu1 }
0x1e97   : > { %v5953_v3 = vadd.f32 %v5952_v61, %v5831_v26  ;;  %v5954_v63 = vpop.f32.mrb[93].mxu1 }
0x1e98   : > { %v5955_v0 = vadd.f32 %v5954_v63, %v5835_v47  ;;  %v5956_v32 = vpop.f32.mrb[94].mxu1 }
0x1e99   : > { %v5959_v49 = vmax.f32 %v5953_v3, 0.0  ;;  %v5957_v48 = vpop.f32.mrb[95].mxu1 }
0x1e9a   : > { %v5960_v52 = vmax.f32 %v5955_v0, 0.0 }
0x1e9b   : > { %v5961_v50 = vpack.c.bf16 %v5959_v49, %v5959_v49 }
0x1e9c   : > { %v5962_v5 = vpack.c.bf16 %v5960_v52, %v5960_v52 }
0x1e9e   : > { %6132 = vmatprep.mubr.bf16.mxu0 %v5962_v5 }
0x1e9f   : > { %6133 = vmatmul.mubr.bf16.vlgmr.msra.gmra.mrb[60].mxu0 %v5961_v50 }
0x1f72   : > { %v6932_v9 = vpop.f32.mrb[60].mxu0 }
0x1f73   : > { %v6933_v14 = vpop.f32.mrb[61].mxu0 }
0x1f74   : > { %v6934_v17 = vadd.f32 %v6933_v14, %v6932_v9  ;;  %v6935_v18 = vpop.f32.mrb[62].mxu0 }
0x1f75   : > { %v6936_v4 = vpop.f32.mrb[63].mxu0 }
0x1f76   : > { %v6135_v19 = vadd.f32 %v6934_v17, %v6721_v13 }
0x1f78   : > { %v6140_v2 = vadd.f32 %v6135_v19, %v5806_v54 }
0x1f7a   : > { %6141 = vadd.xlane.f32.xlu0 %v6140_v2 }
0x2007   : > { %v6142_v23 = vpop.xlane.xlu0 %6141 }
0x2008   : > { %v6143_v24 = vmul.f32 0.0078125, %v6142_v23 }
0x200a   : > { %v6144_v25 = vsub.f32 %v6140_v2, %v6143_v24 }
0x200c   : > { %v6145_v27 = vmul.f32 %v6144_v25, %v6144_v25 }
0x200e   : > { %6146 = vadd.xlane.f32.xlu0 %v6145_v27 }
0x209b   : > { %v6147_v34 = vpop.xlane.xlu0 %6146 }
0x209c   : > { %v6148_v62 = vmul.f32 0.0078125, %v6147_v34 }
0x209e   : > { %v6149_v10 = vadd.f32 1e-05, %v6148_v62 }
0x20a0   : > { %7735 = vrsqrt.f32 %v6149_v10 }
0x20aa   : > { %v7736_v1 = vpop.eup %7735 }
0x20ab   : > { %v6151_v36 = vmul.f32 %v7736_v1, %v6144_v25 }
0x20ad   : > { %v6160_v38 = vmul.f32 %v6738_v35, %v6151_v36 }
0x20af   : > { %v6169_v39 = vadd.f32 %v6739_v37, %v6160_v38 }
0x20b1   : > { %v6170_v11 = vpack.c.bf16 %v6169_v39, %v6169_v39 }
0x20b3   : > { %7263 = vmatmul.mubr.bf16.vlgmr.msra.gmra.mrb[96].mxu1 %v6170_v11 }
0x2186   : > { %v6276_v40 = vpop.f32.mrb[96].mxu1 }
0x2187   : > { %v6277_v41 = vadd.f32 %v6740_v7, %v6276_v40  ;;  %v7264_v42 = vpop.f32.mrb[97].mxu1 }
0x2188   : > { %v6279_v43 = vpop.f32.mrb[98].mxu1 }
0x2189   : > { %6282 = vst [vmem:[%s696_s25] sm:$0xff] %v6277_v41  ;;  %v7265_v44 = vpop.f32.mrb[99].mxu1 }
0x218a   : > { %7974 = shalt.err (!%p7971_p13)
}
0x218b   : > { %s7975_s9 = scalar_lea.hbm %s9090_s16, 128  ;;  %s7979_s20 = scalar_lea.hbm %s9223_s18, 256 }
0x218c   : > { %p7976_p12 = scmp.ne.s32.totalorder %s9090_s16, %s7975_s9  ;;  %p7980_p3 = scmp.lt.u32.totalorder %s9090_s16, %s9223_s18 }
0x218d   : > { %p7981_p4 = scmp.lt.u32.totalorder %s7979_s20, %s7975_s9  ;;  %p7983_p8 = scmp.lt.u32.totalorder %s7975_s9, %s9090_s16 }
0x218e   : > { %p7977_p1 = pnand %p7976_p12, %p9224_p11 }
0x218f   : > { %p7982_p7 = por %p7981_p4, %p7980_p3 }
0x2190   : > { %p7978_p2 = pneg %p7977_p1 }
0x2191   : > { %p7984_p5 = por %p7983_p8, %p7982_p7 }
0x2193   : > { %p7985_p0 = pnand %p7984_p5, %p7978_p2 }
0x2195   : > { %7988 = shalt.err (!%p7985_p0)
}
0x2196   : > { %7322 = dma.vmem_to_hbm [thread:$0]  (%p9224_p11), %s9092_s23, 128, %s9090_s16, %s6284_s29  }
0x2197 PF: > { %s9225_s25 = sld [smem:[#allocation26_spill]]  ;;  %s9226_s10 = sld [smem:[#allocation23_spill]] }
0x2198   : > { %s9227_s27 = sld [smem:[#allocation30_spill]] }
0x219d   : > { %p7369_p6 = scmp.ge.s32.totalorder %s9225_s25, 2  ;;  %s6309_s0 = sand.u32 1, %s9226_s10  }
0x219e   : > { %p9228_p9 = scmp.ne.s32.totalorder %s9227_s27, 0  ;;  %s6310_s30 = scalar_lea.sflag [#allocation4], %s6309_s0 }
0x21a0   : > { %p7350_p10 = pnand %p7369_p6, %p9228_p9 }
0x21a2   : > { %8026 = dma.done.wait (!%p7350_p10), %s6310_s30, 128  }
0x21a3   : > { %8028 = vsyncadd (!%p7350_p10), %s6310_s30, 4294967168  ;;  %s9229_s30 = sld [smem:[#allocation27_spill]]  ;;  %s9230_s27 = sld [smem:[#allocation24_spill]] }
0x21a4   : > { %s9231_s28 = sld [smem:[#allocation25_spill]]  ;;  %s9232_s29 = sld [smem:[#allocation28_spill]] }
0x21a9   : > { %p33_p13 = scmp.ge.s32.totalorder %s9229_s30, 4  }
0x21ab   :  { %35 = sbr.rel (!%p33_p13) target bundleno = 19 (0x13), region = 187 }
0x21b2   :  { %6315 = vsyncpa [#allocation3], 1 }
0x21b3   :  { %6317 = vsyncpa [#allocation3 + $0x1], 1 }
0x21b4   :  { %6318 = vsyncpa [#allocation6], 1 }
0x21b5   :  { %6319 = vsyncpa [#allocation9], 1 }
0x21b6   :  { %6320 = vsyncpa [#allocation12], 1 }
0x21b7   :  { %6321 = vsyncpa [#allocation15], 1 }
0x21b8   :  { %6322 = vsyncpa [#allocation4], 1 }
0x21b9   :  { %6324 = vsyncpa [#allocation4 + $0x1], 1 }

</bundles_post_ra>
